<compile_context>
chip_gen: v5e
topology: v5e:2x2
jax: 0.10.0
libtpu: 0.0.40
codegen_flags: <defaults>
</compile_context>

<pallas_src>
import functools

import jax
import jax.numpy as jnp
from jax.experimental import pallas as pl
from jax.experimental.pallas import tpu as pltpu


def _conv_bn_relu_kernel(x_ref, w_ref, bias_ref, o_ref, *, kh_size, kw_size,
                         ho, wo):
    # x_ref:    (1, H, W, Cin)              one batch element (compute dtype)
    # w_ref:    (KH*KW*Cin, Cout_pad)       BN-scale-folded weight (compute dtype)
    # bias_ref: (1, Cout_pad)               folded BN bias (f32)
    # o_ref:    (1, Ho*Wo, Cout_pad)        lane-dense output slab (f32)
    cin = x_ref.shape[-1]

    # Build the im2col patch matrix once: each tap sliced a single time, then
    # concatenated along the contraction dim -> one fat matmul on the MXU.
    taps = []
    for kh in range(kh_size):
        for kw in range(kw_size):
            taps.append(
                x_ref[0, kh:kh + ho, kw:kw + wo, :].reshape(ho * wo, cin))
    patch = jnp.concatenate(taps, axis=1)          # (Ho*Wo, KH*KW*Cin)

    acc = jnp.dot(patch, w_ref[...],               # single MXU matmul
                  preferred_element_type=jnp.float32)

    y = acc + bias_ref[...]                        # (Ho*Wo, Cout_pad) + (1, Cout_pad)
    o_ref[0] = jnp.maximum(y, 0.0).astype(o_ref.dtype)


def basic_conv2d(x_nchw, weight_oihw, gamma, beta, running_mean, running_var,
                 eps=1e-5, compute_dtype=jnp.float32):
    """Forward of BasicConv2d: Conv2d(stride=1, no padding) + BN(eval) + ReLU.

    Args:
      x_nchw:      (N, Cin, H, W) float32
      weight_oihw: (Cout, Cin, KH, KW) float32
      gamma/beta/running_mean/running_var: (Cout,) float32
      compute_dtype: dtype fed to the MXU (jnp.bfloat16 recommended on
        v6e/v7x); accumulation and the epilogue are always float32.
    Returns:
      (N, Cout, Ho, Wo) float32, Ho = H-KH+1, Wo = W-KW+1
    """
    # TODO(synk): stride/padding kwargs of nn.Conv2d are not plumbed (the spec
    # module uses the defaults: stride=1, padding=0).
    N, Cin, H, W = x_nchw.shape
    Cout, _, KH, KW = weight_oihw.shape
    Ho, Wo = H - KH + 1, W - KW + 1
    K = KH * KW * Cin
    Cout_pad = pl.cdiv(Cout, 128) * 128            # lane-dense output channels

    # Fold eval-mode BatchNorm: scale goes into the weight, bias stays.
    inv_std = gamma / jnp.sqrt(running_var + eps)
    scale = gamma * jnp.reciprocal(jnp.sqrt(running_var + eps))
    bias = beta - running_mean * scale

    # Weight: fold scale, OIHW -> HWIO -> (KH*KW*Cin, Cout_pad).
    w = weight_oihw * scale[:, None, None, None]
    w = jnp.transpose(w, (2, 3, 1, 0)).reshape(K, Cout)
    w = jnp.pad(w, ((0, 0), (0, Cout_pad - Cout))).astype(compute_dtype)

    bias_p = jnp.pad(bias, (0, Cout_pad - Cout)).reshape(1, Cout_pad)
    bias_p = bias_p.astype(jnp.float32)

    # Layout plumbing: NCHW -> NHWC.
    x = jnp.transpose(x_nchw, (0, 2, 3, 1)).astype(compute_dtype)

    kernel = functools.partial(_conv_bn_relu_kernel,
                               kh_size=KH, kw_size=KW, ho=Ho, wo=Wo)

    out = pl.pallas_call(
        kernel,
        out_shape=jax.ShapeDtypeStruct((N, Ho * Wo, Cout_pad), jnp.float32),
        grid_spec=pltpu.PrefetchScalarGridSpec(
            num_scalar_prefetch=0,
            grid=(N,),
            in_specs=[
                pl.BlockSpec((1, H, W, Cin), lambda n: (n, 0, 0, 0)),
                # Weight / bias: constant index_map -> resident across grid.
                pl.BlockSpec((K, Cout_pad), lambda n: (0, 0)),
                pl.BlockSpec((1, Cout_pad), lambda n: (0, 0)),
            ],
            out_specs=pl.BlockSpec((1, Ho * Wo, Cout_pad),
                                   lambda n: (n, 0, 0)),
        ),
        compiler_params=pltpu.CompilerParams(
            dimension_semantics=("parallel",),
            vmem_limit_bytes=32 * 1024 * 1024),
    )(x, w, bias_p)

    # Wrapper-side layout plumbing: drop channel padding, back to NCHW.
    out = out[:, :, :Cout].reshape(N, Ho, Wo, Cout)
    return jnp.transpose(out, (0, 3, 1, 2))


def _reference(x_nchw, weight_oihw, gamma, beta, running_mean, running_var,
               eps=1e-5):
    y = jax.lax.conv_general_dilated(
        x_nchw, weight_oihw, window_strides=(1, 1), padding="VALID",
        dimension_numbers=("NCHW", "OIHW", "NCHW"))
    scale = gamma / jnp.sqrt(running_var + eps)
    bias = beta - running_mean * scale
    y = y * scale[None, :, None, None] + bias[None, :, None, None]
    return jnp.maximum(y, 0.0)


if __name__ == "__main__":
    key = jax.random.PRNGKey(0)
    k_x, k_w, k_g, k_b, k_m, k_v = jax.random.split(key, 6)

    N, Cin, H, W = 2, 4, 16, 16
    Cout, KH, KW = 8, 3, 3

    x = jax.random.normal(k_x, (N, Cin, H, W), dtype=jnp.float32)
    weight = jax.random.normal(k_w, (Cout, Cin, KH, KW), dtype=jnp.float32) * 0.1
    gamma = 1.0 + 0.1 * jax.random.normal(k_g, (Cout,), dtype=jnp.float32)
    beta = 0.1 * jax.random.normal(k_b, (Cout,), dtype=jnp.float32)
    running_mean = 0.1 * jax.random.normal(k_m, (Cout,), dtype=jnp.float32)
    running_var = jnp.abs(jax.random.normal(k_v, (Cout,), dtype=jnp.float32)) + 0.5

    ref = _reference(x, weight, gamma, beta, running_mean, running_var)

    # float32 path (default): tight tolerance.
    out = basic_conv2d(x, weight, gamma, beta, running_mean, running_var)
    out = jax.block_until_ready(out)
    assert out.shape == (N, Cout, H - KH + 1, W - KW + 1)
    assert jnp.allclose(out, ref, atol=1e-4, rtol=1e-4)

    # bf16 MXU path (v6e/v7x optimization): loose tolerance.
    out_bf16 = basic_conv2d(x, weight, gamma, beta, running_mean, running_var,
                            compute_dtype=jnp.bfloat16)
    out_bf16 = jax.block_until_ready(out_bf16)
    assert jnp.allclose(out_bf16, ref, atol=5e-2, rtol=5e-2)

    print("KERNEL_OK")
</pallas_src>

<mosaic_0001>
module attributes {stable_mosaic.version = 11 : i64} {
  func.func @_conv_bn_relu_kernel(%arg0: i32, %arg1: memref<1x16x16x4xf32, #tpu.memory_space<vmem>>, %arg2: memref<36x128xf32, #tpu.memory_space<vmem>>, %arg3: memref<1x128xf32, #tpu.memory_space<vmem>>, %arg4: memref<1x196x128xf32, #tpu.memory_space<vmem>>) attributes {dimension_semantics = [#tpu.dimension_semantics<parallel>], iteration_bounds = array<i64: 2>, scalar_prefetch = 0 : i64, scratch_operands = 0 : i64, tpu.core_type = #tpu.core_type<tc>, window_params = [{transform_indices = @transform_0, window_bounds = array<i64: 1, 16, 16, 4>}, {pipeline_mode = #tpu.pipeline_mode<synchronous>, transform_indices = @transform_1, window_bounds = array<i64: 36, 128>}, {pipeline_mode = #tpu.pipeline_mode<synchronous>, transform_indices = @transform_2, window_bounds = array<i64: 1, 128>}, {transform_indices = @transform_3, window_bounds = array<i64: 1, 196, 128>}]} {
    %c0 = arith.constant 0 : index
    %c0_0 = arith.constant 0 : index
    %c0_1 = arith.constant 0 : index
    %c0_2 = arith.constant 0 : index
    %0 = vector.load %arg1[%c0, %c0_0, %c0_1, %c0_2] : memref<1x16x16x4xf32, #tpu.memory_space<vmem>>, vector<1x14x14x4xf32>
    %1 = vector.shape_cast %0 : vector<1x14x14x4xf32> to vector<14x14x4xf32>
    %2 = vector.shape_cast %1 : vector<14x14x4xf32> to vector<196x4xf32>
    %c0_3 = arith.constant 0 : index
    %c0_4 = arith.constant 0 : index
    %c1 = arith.constant 1 : index
    %c0_5 = arith.constant 0 : index
    %3 = vector.load %arg1[%c0_3, %c0_4, %c1, %c0_5] : memref<1x16x16x4xf32, #tpu.memory_space<vmem>>, vector<1x14x14x4xf32>
    %4 = vector.shape_cast %3 : vector<1x14x14x4xf32> to vector<14x14x4xf32>
    %5 = vector.shape_cast %4 : vector<14x14x4xf32> to vector<196x4xf32>
    %c0_6 = arith.constant 0 : index
    %c0_7 = arith.constant 0 : index
    %c2 = arith.constant 2 : index
    %c0_8 = arith.constant 0 : index
    %6 = vector.load %arg1[%c0_6, %c0_7, %c2, %c0_8] : memref<1x16x16x4xf32, #tpu.memory_space<vmem>>, vector<1x14x14x4xf32>
    %7 = vector.shape_cast %6 : vector<1x14x14x4xf32> to vector<14x14x4xf32>
    %8 = vector.shape_cast %7 : vector<14x14x4xf32> to vector<196x4xf32>
    %c0_9 = arith.constant 0 : index
    %c1_10 = arith.constant 1 : index
    %c0_11 = arith.constant 0 : index
    %c0_12 = arith.constant 0 : index
    %9 = vector.load %arg1[%c0_9, %c1_10, %c0_11, %c0_12] : memref<1x16x16x4xf32, #tpu.memory_space<vmem>>, vector<1x14x14x4xf32>
    %10 = vector.shape_cast %9 : vector<1x14x14x4xf32> to vector<14x14x4xf32>
    %11 = vector.shape_cast %10 : vector<14x14x4xf32> to vector<196x4xf32>
    %c0_13 = arith.constant 0 : index
    %c1_14 = arith.constant 1 : index
    %c1_15 = arith.constant 1 : index
    %c0_16 = arith.constant 0 : index
    %12 = vector.load %arg1[%c0_13, %c1_14, %c1_15, %c0_16] : memref<1x16x16x4xf32, #tpu.memory_space<vmem>>, vector<1x14x14x4xf32>
    %13 = vector.shape_cast %12 : vector<1x14x14x4xf32> to vector<14x14x4xf32>
    %14 = vector.shape_cast %13 : vector<14x14x4xf32> to vector<196x4xf32>
    %c0_17 = arith.constant 0 : index
    %c1_18 = arith.constant 1 : index
    %c2_19 = arith.constant 2 : index
    %c0_20 = arith.constant 0 : index
    %15 = vector.load %arg1[%c0_17, %c1_18, %c2_19, %c0_20] : memref<1x16x16x4xf32, #tpu.memory_space<vmem>>, vector<1x14x14x4xf32>
    %16 = vector.shape_cast %15 : vector<1x14x14x4xf32> to vector<14x14x4xf32>
    %17 = vector.shape_cast %16 : vector<14x14x4xf32> to vector<196x4xf32>
    %c0_21 = arith.constant 0 : index
    %c2_22 = arith.constant 2 : index
    %c0_23 = arith.constant 0 : index
    %c0_24 = arith.constant 0 : index
    %18 = vector.load %arg1[%c0_21, %c2_22, %c0_23, %c0_24] : memref<1x16x16x4xf32, #tpu.memory_space<vmem>>, vector<1x14x14x4xf32>
    %19 = vector.shape_cast %18 : vector<1x14x14x4xf32> to vector<14x14x4xf32>
    %20 = vector.shape_cast %19 : vector<14x14x4xf32> to vector<196x4xf32>
    %c0_25 = arith.constant 0 : index
    %c2_26 = arith.constant 2 : index
    %c1_27 = arith.constant 1 : index
    %c0_28 = arith.constant 0 : index
    %21 = vector.load %arg1[%c0_25, %c2_26, %c1_27, %c0_28] : memref<1x16x16x4xf32, #tpu.memory_space<vmem>>, vector<1x14x14x4xf32>
    %22 = vector.shape_cast %21 : vector<1x14x14x4xf32> to vector<14x14x4xf32>
    %23 = vector.shape_cast %22 : vector<14x14x4xf32> to vector<196x4xf32>
    %c0_29 = arith.constant 0 : index
    %c2_30 = arith.constant 2 : index
    %c2_31 = arith.constant 2 : index
    %c0_32 = arith.constant 0 : index
    %24 = vector.load %arg1[%c0_29, %c2_30, %c2_31, %c0_32] : memref<1x16x16x4xf32, #tpu.memory_space<vmem>>, vector<1x14x14x4xf32>
    %25 = vector.shape_cast %24 : vector<1x14x14x4xf32> to vector<14x14x4xf32>
    %26 = vector.shape_cast %25 : vector<14x14x4xf32> to vector<196x4xf32>
    %27 = tpu.concatenate %2, %5, %8, %11, %14, %17, %20, %23, %26 in 1 : vector<196x4xf32>, vector<196x4xf32>, vector<196x4xf32>, vector<196x4xf32>, vector<196x4xf32>, vector<196x4xf32>, vector<196x4xf32>, vector<196x4xf32>, vector<196x4xf32> -> vector<196x36xf32>
    %c0_33 = arith.constant 0 : index
    %c0_34 = arith.constant 0 : index
    %28 = vector.load %arg2[%c0_33, %c0_34] : memref<36x128xf32, #tpu.memory_space<vmem>>, vector<36x128xf32>
    %cst = arith.constant dense<0.000000e+00> : vector<196x128xf32>
    %29 = tpu.matmul %27, %28, %cst {dimension_numbers = #tpu.dot_dimension_numbers<[1], [0], [0], [1], [0, 0, 1, 1], [], []>} : vector<196x36xf32>, vector<36x128xf32>, vector<196x128xf32> -> vector<196x128xf32>
    %c0_35 = arith.constant 0 : index
    %c0_36 = arith.constant 0 : index
    %30 = vector.load %arg3[%c0_35, %c0_36] : memref<1x128xf32, #tpu.memory_space<vmem>>, vector<1x128xf32>
    %31 = vector.broadcast %30 : vector<1x128xf32> to vector<196x128xf32>
    %32 = arith.addf %29, %31 : vector<196x128xf32>
    %cst_37 = arith.constant 0.000000e+00 : f32
    %33 = vector.broadcast %cst_37 : f32 to vector<196x128xf32>
    %34 = arith.maximumf %32, %33 : vector<196x128xf32>
    %c0_38 = arith.constant 0 : index
    %c0_39 = arith.constant 0 : index
    %c0_40 = arith.constant 0 : index
    %35 = vector.load %arg4[%c0_38, %c0_39, %c0_40] : memref<1x196x128xf32, #tpu.memory_space<vmem>>, vector<1x196x128xf32>
    %36 = vector.shape_cast %35 : vector<1x196x128xf32> to vector<196x128xf32>
    %37 = vector.shape_cast %34 : vector<196x128xf32> to vector<1x196x128xf32>
    tpu.vector_store %arg4[%c0_38, %c0_39, %c0_40], %37 {strides = array<i32>} : memref<1x196x128xf32, #tpu.memory_space<vmem>>, vector<1x196x128xf32>,
    return
  }
  func.func @transform_0(%arg0: i32) -> (i32, i32, i32, i32) {
    %c0_i32 = arith.constant 0 : i32
    %c0_i32_0 = arith.constant 0 : i32
    %c0_i32_1 = arith.constant 0 : i32
    %c0_i32_2 = arith.constant 0 : i32
    return %arg0, %c0_i32, %c0_i32_0, %c0_i32_1 : i32, i32, i32, i32
  }
  func.func @transform_1(%arg0: i32) -> (i32, i32) {
    %c0_i32 = arith.constant 0 : i32
    %c0_i32_0 = arith.constant 0 : i32
    %c0_i32_1 = arith.constant 0 : i32
    return %c0_i32, %c0_i32_0 : i32, i32
  }
  func.func @transform_2(%arg0: i32) -> (i32, i32) {
    %c0_i32 = arith.constant 0 : i32
    %c0_i32_0 = arith.constant 0 : i32
    %c0_i32_1 = arith.constant 0 : i32
    return %c0_i32, %c0_i32_0 : i32, i32
  }
  func.func @transform_3(%arg0: i32) -> (i32, i32, i32) {
    %c0_i32 = arith.constant 0 : i32
    %c0_i32_0 = arith.constant 0 : i32
    %c0_i32_1 = arith.constant 0 : i32
    return %arg0, %c0_i32, %c0_i32_0 : i32, i32, i32
  }
}

</mosaic_0001>

<bundles_post_ra>
// kernel: tpu_custom_call.1
= control target key start
LH: loop header
LB: loop body
LE: loop exit
PB: predicated region body
PF: predicated region fallthrough
CT: control target
= control target key end

     0   :  { %s3870_s12 = smov 0   ;;  %s5925_s0 = inlined_call_operand.vmem [shape: f32[2,16,16,4], index: 0, kind: input, shape index: {}]   ;;  %s5926_s1 = inlined_call_operand.vmem [shape: f32[36,128], index: 1, kind: input, shape index: {}]   ;;  %s5927_s2 = inlined_call_operand.vmem [shape: f32[1,128], index: 2, kind: input, shape index: {}]   ;;  %s5928_s3 = inlined_call_operand.vmem [shape: f32[2,196,128], index: 3, kind: output, shape index: {}]  }
   0x1 LB: > { %s3596_s13 = sadd.s32 4294967295, %s3840_s12   ;;  %p3600_p0 = scmp.ge.s32.totalorder %s3840_s12, 1  ;;  %s3840_s12 = sphi %s3870_s12, %s13_s12  }
   0x2   : > { %p137_p1 = scmp.lt.s32.totalorder %s3840_s12, 3 }
   0x4   : > { %p138_p2 = pnand %p3600_p0, %p137_p1 }
   0x6   : > { %141 = sbr.rel (%p138_p2) target bundleno = 1575 (0x627), region = 32 }
   0xb   : > { %p161_p3 = scmp.lt.s32.totalorder %s3596_s13, 1  ;;  %s3842_s18 = smov 4   ;;  %vm3102_vm0 = vcmask 31744   ;;  %vm3128_vm1 = vcmask 64512   ;;  %vm3154_vm2 = vcmask 97280   ;;  %vm3180_vm3 = vcmask 130048  }
   0xc   : > { %s3843_s19 = smov 8   ;;  %s3844_s20 = smov 12   ;;  %vm3206_vm4 = vcmask 162816   ;;  %vm3232_vm5 = vcmask 195584   ;;  %vm3258_vm6 = vcmask 228352   ;;  %vm3395_vm7 = vcmask 1043456  }
   0xd   : > { %s6036_s13 = smov (!%p161_p3, %s3596_s13), 1  ;;  %s3845_s21 = smov 16   ;;  %vm3319_vm8 = vcmask 293888   ;;  %vm3284_vm9 = vcmask 261120  }
   0xe   : > { %s3800_s14 = sshll.u32 %s6036_s13, 8  ;;  %s3846_s22 = smov 20  }
   0xf   : > { %s3884_s17 = scalar_lea.vmem %s5925_s0, %s3800_s14  ;;  %s3847_s23 = smov 24  }
  0x10   : > { %v172_v0 = vld [vmem:[%s3884_s17 + $0x8] sm:$0x3f]  ;;  %v173_v3 = vld [vmem:[%s3884_s17 + $0x10] sm:$0xff]  ;;  %v174_v4 = vld [vmem:[%s3884_s17 + $0x18] sm:$0x3f]  ;;  %s3848_s24 = smov 28  }
  0x11   : > { %v230_v1 = vrot.slane %v172_v0, 2  ;;  %v231_v2 = vrot.slane %v172_v0, 4  ;;  %1315 = vst [vmem:[#allocation1 + $0x20] ss:$4 sm:$0xff] %v172_v0  ;;  %v171_v5 = vld [vmem:[%s3884_s17] sm:$0xff]  ;;  %v235_v7 = vrot.slane %v174_v4, 2 }
  0x12   : > { %1321 = vst [vmem:[#allocation1 + $0x23] ss:$4 sm:$0xff] %v173_v3  ;;  %v175_v6 = vld [vmem:[%s3884_s17 + $0x20] sm:$0xff]  ;;  %v236_v8 = vrot.slane %v174_v4, 4  ;;  %v227_v11 = vrot.slane %v171_v5, 2  ;;  %v228_v12 = vrot.slane %v171_v5, 4 }
  0x13   : > { %1317 = vst [vmem:[#allocation1 + $0x21] ss:$4 sm:$0xff] %v230_v1  ;;  %v237_v9 = vrot.slane %v175_v6, 2  ;;  %v229_v13 = vrot.slane %v171_v5, 6  ;;  %v176_v14 = vld [vmem:[%s3884_s17 + $0x28] sm:$0x3f] }
  0x14   : > { %1319 = vst [vmem:[#allocation1 + $0x22] ss:$4 sm:$0xff] %v231_v2  ;;  %v177_v15 = vld [vmem:[%s3884_s17 + $0x30] sm:$0xff]  ;;  %v241_v16 = vrot.slane %v176_v14, 4  ;;  %v232_v20 = vrot.slane %v173_v3, 2  ;;  %v233_v21 = vrot.slane %v173_v3, 4 }
  0x15   : > { %1307 = vst [vmem:[#allocation1] ss:$4 sm:$0xff] %v171_v5  ;;  %v242_v17 = vrot.slane %v177_v15, 2  ;;  %v243_v18 = vrot.slane %v177_v15, 4  ;;  %v234_v22 = vrot.slane %v173_v3, 6  ;;  %v179_v24 = vld [vmem:[%s3884_s17 + $0x40] sm:$0xff] }
  0x16   : > { %1309 = vst [vmem:[#allocation1 + $0x1] ss:$4 sm:$0xff] %v227_v11  ;;  %v247_v25 = vrot.slane %v179_v24, 2  ;;  %v248_v26 = vrot.slane %v179_v24, 4  ;;  %v249_v27 = vrot.slane %v179_v24, 6  ;;  %v238_v29 = vrot.slane %v175_v6, 4 }
  0x17   : > { %1311 = vst [vmem:[#allocation1 + $0x2] ss:$4 sm:$0xff] %v228_v12  ;;  %v239_v30 = vrot.slane %v175_v6, 6  ;;  %v240_v31 = vrot.slane %v176_v14, 2  ;;  %v181_v33 = vld [vmem:[%s3884_s17 + $0x50] sm:$0xff]  ;;  %v244_v40 = vrot.slane %v177_v15, 6 }
  0x18   : > { %1313 = vst [vmem:[#allocation1 + $0x3] ss:$4 sm:$0xff] %v229_v13  ;;  %v252_v34 = vrot.slane %v181_v33, 2  ;;  %v253_v35 = vrot.slane %v181_v33, 4  ;;  %v254_v36 = vrot.slane %v181_v33, 6  ;;  %v183_v44 = vld [vmem:[%s3884_s17 + $0x60] sm:$0xff] }
  0x19   : > { %v178_v37 = vld [vmem:[%s3884_s17 + $0x38] sm:$0x3f]  ;;  %v184_v45 = vld [vmem:[%s3884_s17 + $0x68] sm:$0x3f]  ;;  %v258_v46 = vrot.slane %v183_v44, 4  ;;  %v259_v47 = vrot.slane %v183_v44, 6 }
  0x1a   : > { %v182_v39 = vld [vmem:[%s3884_s17 + $0x58] sm:$0x3f]  ;;  %v245_v41 = vrot.slane %v178_v37, 2  ;;  %v246_v42 = vrot.slane %v178_v37, 4  ;;  %v180_v48 = vld [vmem:[%s3884_s17 + $0x48] sm:$0x3f] }
  0x1b   : > { %v3891_v10 = vld.sshfl [vmem:[#allocation1 + $0x20] sm:$0xff pattern:$0x73625140]  ;;  %v260_v49 = vrot.slane %v184_v45, 2  ;;  %v250_v51 = vrot.slane %v180_v48, 2  ;;  %v251_v52 = vrot.slane %v180_v48, 4 }
  0x1c   : > { %5929 = vst [vmem:[#allocation2_spill] sm:$0xff] %v3891_v10  ;;  %v185_v54 = vld [vmem:[%s3884_s17 + $0x70] sm:$0xff]  ;;  %v186_v55 = vld [vmem:[%s3884_s17 + $0x78] sm:$0x3f]  ;;  %v255_v60 = vrot.slane %v182_v39, 2  ;;  %v256_v61 = vrot.slane %v182_v39, 4 }
  0x1d   : > { %1328 = vst [vmem:[#allocation1 + $0x20] ss:$4 sm:$0xff] %v235_v7  ;;  %v264_v56 = vrot.slane %v185_v54, 6  ;;  %v265_v57 = vrot.slane %v186_v55, 2  ;;  %v266_v58 = vrot.slane %v186_v55, 4  ;;  %v257_v62 = vrot.slane %v183_v44, 2 }
  0x1e   : > { %1329 = vst [vmem:[#allocation1 + $0x21] ss:$4 sm:$0xff] %v236_v8  ;;  %v188_v0 = vld [vmem:[%s3884_s17 + $0x88] sm:$0x3f]  ;;  %v261_v5 = vrot.slane %v184_v45, 4  ;;  %v263_v7 = vrot.slane %v185_v54, 4 }
  0x1f   : > { %1330 = vst [vmem:[#allocation1 + $0x22] ss:$4 sm:$0xff] %v175_v6  ;;  %v3897_v23 = vld.sshfl [vmem:[#allocation1] sm:$0xff pattern:$0x73625140]  ;;  %v270_v1 = vrot.slane %v188_v0, 2 }
  0x20   : > { %1331 = vst [vmem:[#allocation1 + $0x23] ss:$4 sm:$0xff] %v237_v9  ;;  %v271_v2 = vrot.slane %v188_v0, 4  ;;  %v262_v6 = vrot.slane %v185_v54, 2  ;;  %v190_v9 = vld [vmem:[%s3884_s17 + $0x98] sm:$0x3f] }
  0x21   : > { %1324 = vst [vmem:[#allocation1] ss:$4 sm:$0xff] %v232_v20  ;;  %v191_v11 = vld [vmem:[%s3884_s17 + $0xa0] sm:$0xff]  ;;  %v275_v12 = vrot.slane %v190_v9, 2  ;;  %v276_v13 = vrot.slane %v190_v9, 4  ;;  %s3849_s25 = smov 32  }
  0x22   : > { %1325 = vst [vmem:[#allocation1 + $0x1] ss:$4 sm:$0xff] %v233_v21  ;;  %s3816_s11 = smul.u32 200, %s6036_s13 }
  0x23   : > { %1326 = vst [vmem:[#allocation1 + $0x2] ss:$4 sm:$0xff] %v234_v22  ;;  %v192_v22 = vld [vmem:[%s3884_s17 + $0xa8] sm:$0x3f] }
  0x24   : > { %1327 = vst [vmem:[#allocation1 + $0x3] ss:$4 sm:$0xff] %v174_v4  ;;  %v189_v4 = vld [vmem:[%s3884_s17 + $0x90] sm:$0xff]  ;;  %s5840_s16 = scalar_lea.vmem %s5928_s3, %s3816_s11 }
  0x27   : > { %v3895_v19 = vld.sshfl [vmem:[#allocation1 + $0x20] sm:$0xff pattern:$0x73625140] }
  0x28   : > { %5930 = vst [vmem:[#allocation3_spill] sm:$0xff] %v3895_v19 }
  0x29   : > { %1338 = vst [vmem:[#allocation1 + $0x20] ss:$4 sm:$0xff] %v241_v16 }
  0x2a   : > { %1339 = vst [vmem:[#allocation1 + $0x21] ss:$4 sm:$0xff] %v177_v15  ;;  %v277_v15 = vrot.slane %v191_v11, 2 }
  0x2b   : > { %1340 = vst [vmem:[#allocation1 + $0x22] ss:$4 sm:$0xff] %v242_v17  ;;  %v3902_v32 = vld.sshfl [vmem:[#allocation1] sm:$0xff pattern:$0x73625140] }
  0x2c   : > { %1341 = vst [vmem:[#allocation1 + $0x23] ss:$4 sm:$0xff] %v243_v18 }
  0x2d   : > { %1334 = vst [vmem:[#allocation1] ss:$4 sm:$0xff] %v238_v29 }
  0x2e   : > { %1335 = vst [vmem:[#allocation1 + $0x1] ss:$4 sm:$0xff] %v239_v30  ;;  %v272_v30 = vrot.slane %v189_v4, 2 }
  0x2f   : > { %1336 = vst [vmem:[#allocation1 + $0x2] ss:$4 sm:$0xff] %v176_v14  ;;  %v187_v14 = vld [vmem:[%s3884_s17 + $0x80] sm:$0xff] }
  0x30   : > { %1337 = vst [vmem:[#allocation1 + $0x3] ss:$4 sm:$0xff] %v240_v31  ;;  %v267_v17 = vrot.slane %v187_v14, 2  ;;  %v268_v18 = vrot.slane %v187_v14, 4  ;;  %v269_v20 = vrot.slane %v187_v14, 6  ;;  %v273_v31 = vrot.slane %v189_v4, 4 }
  0x33   : > { %v3900_v28 = vld.sshfl [vmem:[#allocation1 + $0x20] sm:$0xff pattern:$0x73625140] }
  0x34   : > { %5931 = vst [vmem:[#allocation4_spill] sm:$0xff] %v3900_v28  ;;  %v4383_v28 = vld [vmem:[%s3884_s17 + $0x41] sm:$0xff] }
  0x35   : > { %1348 = vst [vmem:[#allocation1 + $0x20] ss:$4 sm:$0xff] %v179_v24  ;;  %v193_v24 = vld [vmem:[%s3884_s17 + $0xb0] sm:$0xff] }
  0x36   : > { %1349 = vst [vmem:[#allocation1 + $0x21] ss:$4 sm:$0xff] %v247_v25  ;;  %v281_v25 = vrot.slane %v192_v22, 4 }
  0x37   : > { %1350 = vst [vmem:[#allocation1 + $0x22] ss:$4 sm:$0xff] %v248_v26  ;;  %v3909_v43 = vld.sshfl [vmem:[#allocation1] sm:$0xff pattern:$0x73625140]  ;;  %v282_v26 = vrot.slane %v193_v24, 2 }
  0x38   : > { %1351 = vst [vmem:[#allocation1 + $0x23] ss:$4 sm:$0xff] %v249_v27  ;;  %v283_v27 = vrot.slane %v193_v24, 4 }
  0x39   : > { %1344 = vst [vmem:[#allocation1] ss:$4 sm:$0xff] %v244_v40 }
  0x3a   : > { %1345 = vst [vmem:[#allocation1 + $0x1] ss:$4 sm:$0xff] %v178_v37 }
  0x3b   : > { %1346 = vst [vmem:[#allocation1 + $0x2] ss:$4 sm:$0xff] %v245_v41  ;;  %v278_v41 = vrot.slane %v191_v11, 4 }
  0x3c   : > { %1347 = vst [vmem:[#allocation1 + $0x3] ss:$4 sm:$0xff] %v246_v42  ;;  %v279_v42 = vrot.slane %v191_v11, 6 }
  0x3f   : > { %v3906_v38 = vld.sshfl [vmem:[#allocation1 + $0x20] sm:$0xff pattern:$0x73625140] }
  0x40   : > { %1358 = vst [vmem:[#allocation1 + $0x20] ss:$4 sm:$0xff] %v252_v34 }
  0x41   : > { %1359 = vst [vmem:[#allocation1 + $0x21] ss:$4 sm:$0xff] %v253_v35  ;;  %v195_v35 = vld [vmem:[%s3884_s17 + $0xc0] sm:$0xff] }
  0x42   : > { %1360 = vst [vmem:[#allocation1 + $0x22] ss:$4 sm:$0xff] %v254_v36  ;;  %v287_v36 = vrot.slane %v195_v35, 2  ;;  %v288_v37 = vrot.slane %v195_v35, 4 }
  0x43   : > { %1361 = vst [vmem:[#allocation1 + $0x23] ss:$4 sm:$0xff] %v182_v39  ;;  %v3916_v53 = vld.sshfl [vmem:[#allocation1] sm:$0xff pattern:$0x73625140]  ;;  %v289_v39 = vrot.slane %v195_v35, 6 }
  0x44   : > { %1354 = vst [vmem:[#allocation1] ss:$4 sm:$0xff] %v180_v48 }
  0x45   : > { %1355 = vst [vmem:[#allocation1 + $0x1] ss:$4 sm:$0xff] %v250_v51  ;;  %v194_v51 = vld [vmem:[%s3884_s17 + $0xb8] sm:$0x3f] }
  0x46   : > { %1356 = vst [vmem:[#allocation1 + $0x2] ss:$4 sm:$0xff] %v251_v52 }
  0x47   : > { %1357 = vst [vmem:[#allocation1 + $0x3] ss:$4 sm:$0xff] %v181_v33  ;;  %v274_v33 = vrot.slane %v189_v4, 6 }
  0x4a   : > { %v3914_v50 = vld.sshfl [vmem:[#allocation1 + $0x20] sm:$0xff pattern:$0x73625140] }
  0x4b   : > { %1368 = vst [vmem:[#allocation1 + $0x20] ss:$4 sm:$0xff] %v258_v46  ;;  %v197_v46 = vld [vmem:[%s3884_s17 + $0xd0] sm:$0xff] }
  0x4c   : > { %1369 = vst [vmem:[#allocation1 + $0x21] ss:$4 sm:$0xff] %v259_v47  ;;  %v292_v47 = vrot.slane %v197_v46, 2  ;;  %v293_v48 = vrot.slane %v197_v46, 4 }
  0x4d   : > { %1370 = vst [vmem:[#allocation1 + $0x22] ss:$4 sm:$0xff] %v184_v45 }
  0x4e   : > { %1371 = vst [vmem:[#allocation1 + $0x23] ss:$4 sm:$0xff] %v260_v49  ;;  %v3922_v63 = vld.sshfl [vmem:[#allocation1] sm:$0xff pattern:$0x73625140]  ;;  %v294_v49 = vrot.slane %v197_v46, 6 }
  0x4f   : > { %1364 = vst [vmem:[#allocation1] ss:$4 sm:$0xff] %v255_v60  ;;  %v298_v60 = vld [vmem:[%s3884_s17 + $0x9] sm:$0x3f] }
  0x50   : > { %1365 = vst [vmem:[#allocation1 + $0x1] ss:$4 sm:$0xff] %v256_v61  ;;  %v356_v61 = vrot.slane %v298_v60, 2 }
  0x51   : > { %1366 = vst [vmem:[#allocation1 + $0x2] ss:$4 sm:$0xff] %v183_v44  ;;  %v280_v44 = vrot.slane %v192_v22, 2 }
  0x52   : > { %1367 = vst [vmem:[#allocation1 + $0x3] ss:$4 sm:$0xff] %v257_v62  ;;  %v196_v62 = vld [vmem:[%s3884_s17 + $0xc8] sm:$0x3f] }
  0x55   : > { %v3920_v59 = vld.sshfl [vmem:[#allocation1 + $0x20] sm:$0xff pattern:$0x73625140] }
  0x56   : > { %1378 = vst [vmem:[#allocation1 + $0x20] ss:$4 sm:$0xff] %v264_v56  ;;  %v285_v56 = vrot.slane %v194_v51, 2 }
  0x57   : > { %1379 = vst [vmem:[#allocation1 + $0x21] ss:$4 sm:$0xff] %v186_v55  ;;  %v284_v55 = vrot.slane %v193_v24, 6 }
  0x58   : > { %1380 = vst [vmem:[#allocation1 + $0x22] ss:$4 sm:$0xff] %v265_v57  ;;  %v286_v57 = vrot.slane %v194_v51, 4 }
  0x59   : > { %1381 = vst [vmem:[#allocation1 + $0x23] ss:$4 sm:$0xff] %v266_v58  ;;  %v3928_v8 = vld.sshfl [vmem:[#allocation1] sm:$0xff pattern:$0x73625140] }
  0x5a   : > { %5932 = vst [vmem:[#allocation5_spill] sm:$0xff] %v3928_v8 }
  0x5b   : > { %1374 = vst [vmem:[#allocation1] ss:$4 sm:$0xff] %v261_v5  ;;  %v291_v5 = vrot.slane %v196_v62, 4 }
  0x5c   : > { %1375 = vst [vmem:[#allocation1 + $0x1] ss:$4 sm:$0xff] %v185_v54  ;;  %v198_v54 = vld [vmem:[%s3884_s17 + $0xd8] sm:$0x3f] }
  0x5d   : > { %1376 = vst [vmem:[#allocation1 + $0x2] ss:$4 sm:$0xff] %v262_v6 }
  0x5e   : > { %1377 = vst [vmem:[#allocation1 + $0x3] ss:$4 sm:$0xff] %v263_v7  ;;  %v300_v7 = vld [vmem:[%s3884_s17 + $0x19] sm:$0x3f] }
  0x60   : > { %v3925_v3 = vld.sshfl [vmem:[#allocation1 + $0x20] sm:$0xff pattern:$0x73625140] }
  0x61   : > { %1388 = vst [vmem:[#allocation1 + $0x20] ss:$4 sm:$0xff] %v188_v0  ;;  %v357_v0 = vrot.slane %v298_v60, 4 }
  0x62   : > { %1389 = vst [vmem:[#allocation1 + $0x21] ss:$4 sm:$0xff] %v270_v1 }
  0x63   : > { %1390 = vst [vmem:[#allocation1 + $0x22] ss:$4 sm:$0xff] %v271_v2  ;;  %v299_v2 = vld [vmem:[%s3884_s17 + $0x11] sm:$0xff] }
  0x64   : > { %1391 = vst [vmem:[#allocation1 + $0x23] ss:$4 sm:$0xff] %v189_v4  ;;  %v290_v4 = vrot.slane %v196_v62, 2 }
  0x65   : > { %v3935_v21 = vld.sshfl [vmem:[#allocation1] sm:$0xff pattern:$0x73625140] }
  0x66   : > { %5933 = vst [vmem:[#allocation6_spill] sm:$0xff] %v3935_v21  ;;  %v4510_v21 = vld [vmem:[%s3884_s17 + $0xb9] sm:$0x3f] }
  0x67   : > { %1384 = vst [vmem:[#allocation1] ss:$4 sm:$0xff] %v187_v14 }
  0x68   : > { %1385 = vst [vmem:[#allocation1 + $0x1] ss:$4 sm:$0xff] %v267_v17  ;;  %v296_v17 = vrot.slane %v198_v54, 4 }
  0x69   : > { %1386 = vst [vmem:[#allocation1 + $0x2] ss:$4 sm:$0xff] %v268_v18 }
  0x6a   : > { %1387 = vst [vmem:[#allocation1 + $0x3] ss:$4 sm:$0xff] %v269_v20  ;;  %v302_v20 = vld [vmem:[%s3884_s17 + $0x29] sm:$0x3f] }
  0x6b   : > { %v3933_v16 = vld.sshfl [vmem:[#allocation1 + $0x20] sm:$0xff pattern:$0x73625140] }
  0x6c   : > { %1398 = vst [vmem:[#allocation1 + $0x20] ss:$4 sm:$0xff] %v275_v12  ;;  %v362_v12 = vrot.slane %v300_v7, 4 }
  0x6d   : > { %1399 = vst [vmem:[#allocation1 + $0x21] ss:$4 sm:$0xff] %v276_v13 }
  0x6e   : > { %1400 = vst [vmem:[#allocation1 + $0x22] ss:$4 sm:$0xff] %v191_v11  ;;  %v361_v11 = vrot.slane %v300_v7, 2 }
  0x6f   : > { %1401 = vst [vmem:[#allocation1 + $0x23] ss:$4 sm:$0xff] %v277_v15  ;;  %v295_v15 = vrot.slane %v198_v54, 2 }
  0x71   : > { %v3941_v34 = vld.sshfl [vmem:[#allocation1] sm:$0xff pattern:$0x73625140] }
  0x72   : > { %1394 = vst [vmem:[#allocation1] ss:$4 sm:$0xff] %v272_v30 }
  0x73   : > { %1395 = vst [vmem:[#allocation1 + $0x1] ss:$4 sm:$0xff] %v273_v31 }
  0x74   : > { %1396 = vst [vmem:[#allocation1 + $0x2] ss:$4 sm:$0xff] %v274_v33 }
  0x75   : > { %1397 = vst [vmem:[#allocation1 + $0x3] ss:$4 sm:$0xff] %v190_v9  ;;  %v3964_v9 = vld [vmem:[%s3884_s17 + $0x21] sm:$0xff] }
  0x76   : > { %v3939_v29 = vld.sshfl [vmem:[#allocation1 + $0x20] sm:$0xff pattern:$0x73625140]  ;;  %v363_v14 = vrot.slane %v3964_v9, 2 }
  0x77   : > { %1408 = vst [vmem:[#allocation1 + $0x20] ss:$4 sm:$0xff] %v281_v25 }
  0x78   : > { %1409 = vst [vmem:[#allocation1 + $0x21] ss:$4 sm:$0xff] %v193_v24  ;;  %v367_v24 = vrot.slane %v302_v20, 4 }
  0x79   : > { %1410 = vst [vmem:[#allocation1 + $0x22] ss:$4 sm:$0xff] %v282_v26 }
  0x7a   : > { %1411 = vst [vmem:[#allocation1 + $0x23] ss:$4 sm:$0xff] %v283_v27  ;;  %v303_v27 = vld [vmem:[%s3884_s17 + $0x31] sm:$0xff] }
  0x7c   : > { %v3946_v45 = vld.sshfl [vmem:[#allocation1] sm:$0xff pattern:$0x73625140] }
  0x7d   : > { %5935 = vst [vmem:[#allocation8_spill] sm:$0xff] %v3946_v45 }
  0x7e   : > { %1404 = vst [vmem:[#allocation1] ss:$4 sm:$0xff] %v278_v41  ;;  %v305_v41 = vld [vmem:[%s3884_s17 + $0x41] sm:$0xff] }
  0x7f   : > { %1405 = vst [vmem:[#allocation1 + $0x1] ss:$4 sm:$0xff] %v279_v42 }
  0x80   : > { %1406 = vst [vmem:[#allocation1 + $0x2] ss:$4 sm:$0xff] %v192_v22  ;;  %v297_v22 = vld [vmem:[%s3884_s17 + $0x1] sm:$0xff] }
  0x81   : > { %v3944_v40 = vld.sshfl [vmem:[#allocation1 + $0x20] sm:$0xff pattern:$0x73625140]  ;;  %1407 = vst [vmem:[#allocation1 + $0x3] ss:$4 sm:$0xff] %v280_v44  ;;  %v353_v25 = vrot.slane %v297_v22, 2 }
  0x82   : > { %5934 = vst [vmem:[#allocation7_spill] sm:$0xff] %v3944_v40  ;;  %v354_v30 = vrot.slane %v297_v22, 4  ;;  %v355_v31 = vrot.slane %v297_v22, 6  ;;  %v360_v44 = vrot.slane %v299_v2, 6  ;;  %v4458_v40 = vld [vmem:[%s3884_s17 + $0x81] sm:$0xff] }
  0x83   : > { %1418 = vst [vmem:[#allocation1 + $0x20] ss:$4 sm:$0xff] %v195_v35  ;;  %v368_v35 = vrot.slane %v303_v27, 2 }
  0x84   : > { %1419 = vst [vmem:[#allocation1 + $0x21] ss:$4 sm:$0xff] %v287_v36  ;;  %v369_v36 = vrot.slane %v303_v27, 4 }
  0x85   : > { %1420 = vst [vmem:[#allocation1 + $0x22] ss:$4 sm:$0xff] %v288_v37  ;;  %v358_v37 = vrot.slane %v299_v2, 2 }
  0x86   : > { %1421 = vst [vmem:[#allocation1 + $0x23] ss:$4 sm:$0xff] %v289_v39  ;;  %v359_v39 = vrot.slane %v299_v2, 4 }
  0x88   : > { %v3953_v58 = vld.sshfl [vmem:[#allocation1] sm:$0xff pattern:$0x73625140] }
  0x89   : > { %5937 = vst [vmem:[#allocation10_spill] sm:$0xff] %v3953_v58  ;;  %v3632_v58 = vld [vmem:[%s3884_s17 + $0x11] sm:$0xff] }
  0x8a   : > { %1414 = vst [vmem:[#allocation1] ss:$4 sm:$0xff] %v284_v55  ;;  %v307_v55 = vld [vmem:[%s3884_s17 + $0x51] sm:$0xff] }
  0x8b   : > { %1415 = vst [vmem:[#allocation1 + $0x1] ss:$4 sm:$0xff] %v194_v51  ;;  %v364_v51 = vrot.slane %v3964_v9, 4 }
  0x8c   : > { %1416 = vst [vmem:[#allocation1 + $0x2] ss:$4 sm:$0xff] %v285_v56  ;;  %v366_v56 = vrot.slane %v302_v20, 2 }
  0x8d   : > { %v3950_v52 = vld.sshfl [vmem:[#allocation1 + $0x20] sm:$0xff pattern:$0x73625140]  ;;  %1417 = vst [vmem:[#allocation1 + $0x3] ss:$4 sm:$0xff] %v286_v57 }
  0x8e   : > { %5936 = vst [vmem:[#allocation9_spill] sm:$0xff] %v3950_v52 }
  0x8f   : > { %1428 = vst [vmem:[#allocation1 + $0x20] ss:$4 sm:$0xff] %v292_v47  ;;  %v373_v47 = vrot.slane %v305_v41, 2 }
  0x90   : > { %1429 = vst [vmem:[#allocation1 + $0x21] ss:$4 sm:$0xff] %v293_v48  ;;  %v374_v48 = vrot.slane %v305_v41, 4 }
  0x91   : > { %1430 = vst [vmem:[#allocation1 + $0x22] ss:$4 sm:$0xff] %v294_v49  ;;  %v375_v49 = vrot.slane %v305_v41, 6 }
  0x92   : > { %1431 = vst [vmem:[#allocation1 + $0x23] ss:$4 sm:$0xff] %v198_v54  ;;  %v365_v54 = vrot.slane %v3964_v9, 6 }
  0x94   : > { %v3960_v6 = vld.sshfl [vmem:[#allocation1] sm:$0xff pattern:$0x73625140] }
  0x95   : > { %5939 = vst [vmem:[#allocation12_spill] sm:$0xff] %v3960_v6  ;;  %v749_v6 = vrot.slane %v4383_v28, 6 }
  0x96   : > { %1424 = vst [vmem:[#allocation1] ss:$4 sm:$0xff] %v196_v62  ;;  %v380_v62 = vrot.slane %v307_v55, 6 }
  0x97   : > { %1425 = vst [vmem:[#allocation1 + $0x1] ss:$4 sm:$0xff] %v290_v4  ;;  %v304_v4 = vld [vmem:[%s3884_s17 + $0x39] sm:$0x3f] }
  0x98   : > { %1426 = vst [vmem:[#allocation1 + $0x2] ss:$4 sm:$0xff] %v291_v5  ;;  %v370_v5 = vrot.slane %v303_v27, 6 }
  0x99   : > { %v3957_v1 = vld.sshfl [vmem:[#allocation1 + $0x20] sm:$0xff pattern:$0x73625140]  ;;  %1427 = vst [vmem:[#allocation1 + $0x3] ss:$4 sm:$0xff] %v197_v46 }
  0x9a   : > { %5938 = vst [vmem:[#allocation11_spill] sm:$0xff] %v3957_v1 }
  0x9b   : > { %1470 = vst [vmem:[#allocation1 + $0x20] ss:$4 sm:$0xff] %v298_v60  ;;  %v378_v60 = vrot.slane %v307_v55, 2 }
  0x9c   : > { %1472 = vst [vmem:[#allocation1 + $0x21] ss:$4 sm:$0xff] %v356_v61  ;;  %v379_v61 = vrot.slane %v307_v55, 4 }
  0x9d   : > { %1474 = vst [vmem:[#allocation1 + $0x22] ss:$4 sm:$0xff] %v357_v0 }
  0x9e   : > { %1476 = vst [vmem:[#allocation1 + $0x23] ss:$4 sm:$0xff] %v299_v2  ;;  %v308_v2 = vld [vmem:[%s3884_s17 + $0x59] sm:$0x3f] }
  0xa0   : > { %v3969_v18 = vld.sshfl [vmem:[#allocation1] sm:$0xff pattern:$0x73625140] }
  0xa1   : > { %5940 = vst [vmem:[#allocation13_spill] sm:$0xff] %v3969_v18 }
  0xa2   : > { %1434 = vst [vmem:[#allocation1] ss:$4 sm:$0xff] %v295_v15 }
  0xa3   : > { %1435 = vst [vmem:[#allocation1 + $0x1] ss:$4 sm:$0xff] %v296_v17 }
  0xa5   : > { %v1478_v13 = vld.sshfl [vmem:[#allocation1 + $0x20] sm:$0xff pattern:$0x73625140] }
  0xa6   : > { %1594 = vrot.lane.b32.xlu0 %v1478_v13, %s3842_s18  ;;  %1483 = vst [vmem:[#allocation1 + $0x20] ss:$4 sm:$0xff] %v361_v11  ;;  %v372_v11 = vrot.slane %v304_v4, 4  ;;  %v310_v13 = vld [vmem:[%s3884_s17 + $0x69] sm:$0x3f] }
  0xa7   : > { %1484 = vst [vmem:[#allocation1 + $0x21] ss:$4 sm:$0xff] %v362_v12 }
  0xa8   : > { %1485 = vst [vmem:[#allocation1 + $0x22] ss:$4 sm:$0xff] %v3964_v9  ;;  %v309_v9 = vld [vmem:[%s3884_s17 + $0x61] sm:$0xff] }
  0xa9   : > { %1486 = vst [vmem:[#allocation1 + $0x23] ss:$4 sm:$0xff] %v363_v14  ;;  %v384_v14 = vrot.slane %v309_v9, 4  ;;  %v385_v15 = vrot.slane %v309_v9, 6 }
  0xaa   : > { %v3975_v33 = vld.sshfl [vmem:[#allocation1] sm:$0xff pattern:$0x73625140] }
  0xab   : > { %5941 = vst [vmem:[#allocation14_spill] sm:$0xff] %v3975_v33 }
  0xac   : > { %1462 = vst [vmem:[#allocation1] ss:$4 sm:$0xff] %v297_v22  ;;  %v306_v22 = vld [vmem:[%s3884_s17 + $0x49] sm:$0x3f] }
  0xad   : > { %1464 = vst [vmem:[#allocation1 + $0x1] ss:$4 sm:$0xff] %v353_v25  ;;  %v376_v25 = vrot.slane %v306_v22, 2 }
  0xae   : > { %1466 = vst [vmem:[#allocation1 + $0x2] ss:$4 sm:$0xff] %v354_v30  ;;  %v312_v30 = vld [vmem:[%s3884_s17 + $0x79] sm:$0x3f] }
  0xaf   : > { %1468 = vst [vmem:[#allocation1 + $0x3] ss:$4 sm:$0xff] %v355_v31 }
  0xb0   : > { %v1488_v26 = vld.sshfl [vmem:[#allocation1 + $0x20] sm:$0xff pattern:$0x73625140] }
  0xb1   : > { %1598 = vrot.lane.b32.xlu1 %v1488_v26, %s3842_s18  ;;  %1493 = vst [vmem:[#allocation1 + $0x20] ss:$4 sm:$0xff] %v367_v24  ;;  %v311_v24 = vld [vmem:[%s3884_s17 + $0x71] sm:$0xff]  ;;  %v377_v26 = vrot.slane %v306_v22, 4 }
  0xb2   : > { %1494 = vst [vmem:[#allocation1 + $0x21] ss:$4 sm:$0xff] %v303_v27  ;;  %v390_v31 = vrot.slane %v311_v24, 6 }
  0xb3   : > { %1495 = vst [vmem:[#allocation1 + $0x22] ss:$4 sm:$0xff] %v368_v35  ;;  %v391_v35 = vrot.slane %v312_v30, 2 }
  0xb4   : > { %1496 = vst [vmem:[#allocation1 + $0x23] ss:$4 sm:$0xff] %v369_v36 }
  0xb6   : > { %v1477_v42 = vld.sshfl [vmem:[#allocation1] sm:$0xff pattern:$0x73625140] }
  0xb7   : > { %1482 = vst [vmem:[#allocation1 + $0x3] ss:$4 sm:$0xff] %v300_v7  ;;  %1592 = vrot.lane.b32.xlu0 %v1477_v42, %s3842_s18  ;;  %v371_v7 = vrot.slane %v304_v4, 2  ;;  %v314_v42 = vld [vmem:[%s3884_s17 + $0x89] sm:$0x3f] }
  0xb8   : > { %1479 = vst [vmem:[#allocation1] ss:$4 sm:$0xff] %v358_v37  ;;  %v392_v37 = vrot.slane %v312_v30, 4 }
  0xb9   : > { %1480 = vst [vmem:[#allocation1 + $0x1] ss:$4 sm:$0xff] %v359_v39  ;;  %v381_v39 = vrot.slane %v308_v2, 2 }
  0xba   : > { %1481 = vst [vmem:[#allocation1 + $0x2] ss:$4 sm:$0xff] %v360_v44  ;;  %v383_v44 = vrot.slane %v309_v9, 2 }
  0xbb   : > { %v1498_v46 = vld.sshfl [vmem:[#allocation1 + $0x20] sm:$0xff pattern:$0x73625140] }
  0xbc   : > { %1602 = vrot.lane.b32.xlu2 %v1498_v46, %s3842_s18  ;;  %1503 = vst [vmem:[#allocation1 + $0x20] ss:$4 sm:$0xff] %v305_v41  ;;  %v382_v41 = vrot.slane %v308_v2, 4 }
  0xbd   : > { %1504 = vst [vmem:[#allocation1 + $0x21] ss:$4 sm:$0xff] %v373_v47  ;;  %v396_v47 = vrot.slane %v314_v42, 2 }
  0xbe   : > { %1505 = vst [vmem:[#allocation1 + $0x22] ss:$4 sm:$0xff] %v374_v48  ;;  %v397_v48 = vrot.slane %v314_v42, 4 }
  0xbf   : > { %1506 = vst [vmem:[#allocation1 + $0x23] ss:$4 sm:$0xff] %v375_v49 }
  0xc1   : > { %v1487_v57 = vld.sshfl [vmem:[#allocation1] sm:$0xff pattern:$0x73625140] }
  0xc2   : > { %1489 = vst [vmem:[#allocation1] ss:$4 sm:$0xff] %v364_v51  ;;  %1596 = vrot.lane.b32.xlu1 %v1487_v57, %s3842_s18  ;;  %v315_v51 = vld [vmem:[%s3884_s17 + $0x91] sm:$0xff]  ;;  %v389_v57 = vrot.slane %v311_v24, 4 }
  0xc3   : > { %1490 = vst [vmem:[#allocation1 + $0x1] ss:$4 sm:$0xff] %v365_v54  ;;  %v387_v54 = vrot.slane %v310_v13, 4 }
  0xc4   : > { %1491 = vst [vmem:[#allocation1 + $0x2] ss:$4 sm:$0xff] %v302_v20  ;;  %v386_v20 = vrot.slane %v310_v13, 2 }
  0xc5   : > { %1492 = vst [vmem:[#allocation1 + $0x3] ss:$4 sm:$0xff] %v366_v56  ;;  %v316_v56 = vld [vmem:[%s3884_s17 + $0x99] sm:$0x3f] }
  0xc6   : > { %v1508_v0 = vld.sshfl [vmem:[#allocation1 + $0x20] sm:$0xff pattern:$0x73625140] }
  0xc7   : > { %1513 = vst [vmem:[#allocation1 + $0x20] ss:$4 sm:$0xff] %v378_v60 }
  0xc8   : > { %1514 = vst [vmem:[#allocation1 + $0x21] ss:$4 sm:$0xff] %v379_v61  ;;  %v317_v61 = vld [vmem:[%s3884_s17 + $0xa1] sm:$0xff] }
  0xc9   : > { %1515 = vst [vmem:[#allocation1 + $0x22] ss:$4 sm:$0xff] %v380_v62  ;;  %v401_v62 = vrot.slane %v316_v56, 2 }
  0xca   : > { %1516 = vst [vmem:[#allocation1 + $0x23] ss:$4 sm:$0xff] %v308_v2  ;;  %1606 = vrot.lane.b32.xlu1 %v1508_v0, %s3842_s18  ;;  %v402_v0 = vrot.slane %v316_v56, 4 }
  0xcc   : > { %v1497_v12 = vld.sshfl [vmem:[#allocation1] sm:$0xff pattern:$0x73625140] }
  0xcd   : > { %1499 = vst [vmem:[#allocation1] ss:$4 sm:$0xff] %v370_v5  ;;  %1600 = vrot.lane.b32.xlu2 %v1497_v12, %s3842_s18  ;;  %v313_v5 = vld [vmem:[%s3884_s17 + $0x81] sm:$0xff] }
  0xce   : > { %1500 = vst [vmem:[#allocation1 + $0x1] ss:$4 sm:$0xff] %v304_v4  ;;  %v403_v4 = vrot.slane %v317_v61, 2 }
  0xcf   : > { %1501 = vst [vmem:[#allocation1 + $0x2] ss:$4 sm:$0xff] %v371_v7  ;;  %v318_v7 = vld [vmem:[%s3884_s17 + $0xa9] sm:$0x3f] }
  0xd0   : > { %1502 = vst [vmem:[#allocation1 + $0x3] ss:$4 sm:$0xff] %v372_v11  ;;  %v394_v11 = vrot.slane %v313_v5, 4 }
  0xd1   : > { %v1518_v17 = vld.sshfl [vmem:[#allocation1 + $0x20] sm:$0xff pattern:$0x73625140] }
  0xd2   : > { %1525 = vst [vmem:[#allocation1 + $0x22] ss:$4 sm:$0xff] %v310_v13  ;;  %v395_v13 = vrot.slane %v313_v5, 6 }
  0xd3   : > { %1523 = vst [vmem:[#allocation1 + $0x20] ss:$4 sm:$0xff] %v384_v14  ;;  %v319_v14 = vld [vmem:[%s3884_s17 + $0xb1] sm:$0xff] }
  0xd4   : > { %1524 = vst [vmem:[#allocation1 + $0x21] ss:$4 sm:$0xff] %v385_v15  ;;  %v407_v15 = vrot.slane %v318_v7, 4 }
  0xd5   : > { %1526 = vst [vmem:[#allocation1 + $0x23] ss:$4 sm:$0xff] %v386_v20 }
  0xd7   : > { %v1507_v27 = vld.sshfl [vmem:[#allocation1] sm:$0xff pattern:$0x73625140] }
  0xd8   : > { %1604 = vrot.lane.b32.xlu0 %v1507_v27, %s3842_s18  ;;  %1509 = vst [vmem:[#allocation1] ss:$4 sm:$0xff] %v306_v22  ;;  %v409_v22 = vrot.slane %v319_v14, 4  ;;  %v321_v27 = vld [vmem:[%s3884_s17 + $0xc1] sm:$0xff] }
  0xd9   : > { %1510 = vst [vmem:[#allocation1 + $0x1] ss:$4 sm:$0xff] %v376_v25  ;;  %v399_v25 = vrot.slane %v315_v51, 4 }
  0xda   : > { %1511 = vst [vmem:[#allocation1 + $0x2] ss:$4 sm:$0xff] %v377_v26  ;;  %v400_v26 = vrot.slane %v315_v51, 6 }
  0xdb   : > { %1512 = vst [vmem:[#allocation1 + $0x3] ss:$4 sm:$0xff] %v307_v55  ;;  %v388_v55 = vrot.slane %v311_v24, 2 }
  0xdc   : > { %v1528_v36 = vld.sshfl [vmem:[#allocation1 + $0x20] sm:$0xff pattern:$0x73625140] }
  0xdd   : > { %1533 = vst [vmem:[#allocation1 + $0x20] ss:$4 sm:$0xff] %v390_v31  ;;  %v413_v31 = vrot.slane %v321_v27, 2 }
  0xde   : > { %1534 = vst [vmem:[#allocation1 + $0x21] ss:$4 sm:$0xff] %v312_v30 }
  0xdf   : > { %1535 = vst [vmem:[#allocation1 + $0x22] ss:$4 sm:$0xff] %v391_v35  ;;  %v414_v35 = vrot.slane %v321_v27, 4 }
  0xe0   : > { %1536 = vst [vmem:[#allocation1 + $0x23] ss:$4 sm:$0xff] %v392_v37  ;;  %1610 = vrot.lane.b32.xlu0 %v1518_v17, %s3842_s18  ;;  %v408_v17 = vrot.slane %v319_v14, 2  ;;  %v415_v37 = vrot.slane %v321_v27, 6 }
  0xe2   : > { %v1517_v46 = vld.sshfl [vmem:[#allocation1] sm:$0xff pattern:$0x73625140] }
  0xe3   : > { %1519 = vst [vmem:[#allocation1] ss:$4 sm:$0xff] %v381_v39  ;;  %1608 = vrot.lane.b32.xlu2 %v1517_v46, %s3842_s18  ;;  %v404_v39 = vrot.slane %v317_v61, 4 }
  0xe4   : > { %1520 = vst [vmem:[#allocation1 + $0x1] ss:$4 sm:$0xff] %v382_v41  ;;  %v405_v41 = vrot.slane %v317_v61, 6 }
  0xe5   : > { %1521 = vst [vmem:[#allocation1 + $0x2] ss:$4 sm:$0xff] %v309_v9  ;;  %v393_v9 = vrot.slane %v313_v5, 2 }
  0xe6   : > { %1522 = vst [vmem:[#allocation1 + $0x3] ss:$4 sm:$0xff] %v383_v44  ;;  %v406_v44 = vrot.slane %v318_v7, 2 }
  0xe7   : > { %v1538_v49 = vld.sshfl [vmem:[#allocation1 + $0x20] sm:$0xff pattern:$0x73625140] }
  0xe8   : > { %1543 = vst [vmem:[#allocation1 + $0x20] ss:$4 sm:$0xff] %v314_v42  ;;  %v323_v42 = vld [vmem:[%s3884_s17 + $0xd1] sm:$0xff] }
  0xe9   : > { %1544 = vst [vmem:[#allocation1 + $0x21] ss:$4 sm:$0xff] %v396_v47  ;;  %v324_v47 = vld [vmem:[%s3884_s17 + $0xd9] sm:$0x3f] }
  0xea   : > { %1545 = vst [vmem:[#allocation1 + $0x22] ss:$4 sm:$0xff] %v397_v48  ;;  %v418_v48 = vrot.slane %v323_v42, 2 }
  0xeb   : > { %1546 = vst [vmem:[#allocation1 + $0x23] ss:$4 sm:$0xff] %v315_v51  ;;  %1614 = vrot.lane.b32.xlu2 %v1528_v36, %s3842_s18 }
  0xed   : > { %v1527_v60 = vld.sshfl [vmem:[#allocation1] sm:$0xff pattern:$0x73625140] }
  0xee   : > { %1529 = vst [vmem:[#allocation1] ss:$4 sm:$0xff] %v387_v54  ;;  %1612 = vrot.lane.b32.xlu1 %v1527_v60, %s3842_s18  ;;  %v420_v54 = vrot.slane %v323_v42, 6  ;;  %v424_v60 = vld [vmem:[%s3884_s17 + $0xa] sm:$0x3f] }
  0xef   : > { %1530 = vst [vmem:[#allocation1 + $0x1] ss:$4 sm:$0xff] %v311_v24  ;;  %v398_v24 = vrot.slane %v315_v51, 2 }
  0xf0   : > { %1531 = vst [vmem:[#allocation1 + $0x2] ss:$4 sm:$0xff] %v388_v55  ;;  %v320_v55 = vld [vmem:[%s3884_s17 + $0xb9] sm:$0x3f] }
  0xf1   : > { %1532 = vst [vmem:[#allocation1 + $0x3] ss:$4 sm:$0xff] %v389_v57  ;;  %v411_v57 = vrot.slane %v320_v55, 2 }
  0xf2   : > { %v1548_v2 = vld.sshfl [vmem:[#allocation1 + $0x20] sm:$0xff pattern:$0x73625140] }
  0xf3   : > { %1555 = vst [vmem:[#allocation1 + $0x22] ss:$4 sm:$0xff] %v317_v61 }
  0xf4   : > { %1553 = vst [vmem:[#allocation1 + $0x20] ss:$4 sm:$0xff] %v401_v62  ;;  %v412_v62 = vrot.slane %v320_v55, 4 }
  0xf5   : > { %1554 = vst [vmem:[#allocation1 + $0x21] ss:$4 sm:$0xff] %v402_v0  ;;  %v482_v0 = vrot.slane %v424_v60, 2 }
  0xf6   : > { %1556 = vst [vmem:[#allocation1 + $0x23] ss:$4 sm:$0xff] %v403_v4  ;;  %1618 = vrot.lane.b32.xlu1 %v1538_v49, %s3842_s18  ;;  %v419_v49 = vrot.slane %v323_v42, 4 }
  0xf8   : > { %v1537_v12 = vld.sshfl [vmem:[#allocation1] sm:$0xff pattern:$0x73625140] }
  0xf9   : > { %1616 = vrot.lane.b32.xlu0 %v1537_v12, %s3842_s18  ;;  %1539 = vst [vmem:[#allocation1] ss:$4 sm:$0xff] %v313_v5  ;;  %v4019_v5 = vld [vmem:[%s3884_s17 + $0x12] sm:$0xff] }
  0xfa   : > { %1540 = vst [vmem:[#allocation1 + $0x1] ss:$4 sm:$0xff] %v393_v9 }
  0xfb   : > { %1541 = vst [vmem:[#allocation1 + $0x2] ss:$4 sm:$0xff] %v394_v11  ;;  %v4025_v11 = vld [vmem:[%s3884_s17 + $0x1a] sm:$0x3f] }
  0xfc   : > { %1542 = vst [vmem:[#allocation1 + $0x3] ss:$4 sm:$0xff] %v395_v13 }
  0xfd   : > { %v1558_v20 = vld.sshfl [vmem:[#allocation1 + $0x20] sm:$0xff pattern:$0x73625140] }
  0xfe   : > { %1563 = vst [vmem:[#allocation1 + $0x20] ss:$4 sm:$0xff] %v407_v15  ;;  %v487_v15 = vrot.slane %v4025_v11, 2 }
  0xff   : > { %1564 = vst [vmem:[#allocation1 + $0x21] ss:$4 sm:$0xff] %v319_v14 }
 0x100   : > { %1565 = vst [vmem:[#allocation1 + $0x22] ss:$4 sm:$0xff] %v408_v17  ;;  %v488_v17 = vrot.slane %v4025_v11, 4 }
 0x101   : > { %1566 = vst [vmem:[#allocation1 + $0x23] ss:$4 sm:$0xff] %v409_v22  ;;  %1622 = vrot.lane.b32.xlu0 %v1548_v2, %s3842_s18  ;;  %v483_v2 = vrot.slane %v424_v60, 4 }
 0x103   : > { %v1547_v30 = vld.sshfl [vmem:[#allocation1] sm:$0xff pattern:$0x73625140] }
 0x104   : > { %1549 = vst [vmem:[#allocation1] ss:$4 sm:$0xff] %v398_v24  ;;  %1620 = vrot.lane.b32.xlu2 %v1547_v30, %s3842_s18  ;;  %v421_v24 = vrot.slane %v324_v47, 2  ;;  %v4040_v30 = vld [vmem:[%s3884_s17 + $0x32] sm:$0xff] }
 0x105   : > { %1550 = vst [vmem:[#allocation1 + $0x1] ss:$4 sm:$0xff] %v399_v25  ;;  %v422_v25 = vrot.slane %v324_v47, 4 }
 0x106   : > { %1551 = vst [vmem:[#allocation1 + $0x2] ss:$4 sm:$0xff] %v400_v26  ;;  %v4037_v26 = vld [vmem:[%s3884_s17 + $0x2a] sm:$0x3f] }
 0x107   : > { %1552 = vst [vmem:[#allocation1 + $0x3] ss:$4 sm:$0xff] %v316_v56  ;;  %v410_v56 = vrot.slane %v319_v14, 6  ;;  %v4029_v14 = vld [vmem:[%s3884_s17 + $0x22] sm:$0xff] }
 0x108   : > { %v1568_v36 = vld.sshfl [vmem:[#allocation1 + $0x20] sm:$0xff pattern:$0x73625140] }
 0x109   : > { %1573 = vst [vmem:[#allocation1 + $0x20] ss:$4 sm:$0xff] %v321_v27 }
 0x10a   : > { %1574 = vst [vmem:[#allocation1 + $0x21] ss:$4 sm:$0xff] %v413_v31  ;;  %v493_v31 = vrot.slane %v4037_v26, 4 }
 0x10b   : > { %1575 = vst [vmem:[#allocation1 + $0x22] ss:$4 sm:$0xff] %v414_v35  ;;  %v494_v35 = vrot.slane %v4040_v30, 2 }
 0x10c   : > { %1576 = vst [vmem:[#allocation1 + $0x23] ss:$4 sm:$0xff] %v415_v37  ;;  %1626 = vrot.lane.b32.xlu2 %v1558_v20, %s3842_s18  ;;  %v489_v20 = vrot.slane %v4029_v14, 2 }
 0x10e   : > { %v1557_v46 = vld.sshfl [vmem:[#allocation1] sm:$0xff pattern:$0x73625140] }
 0x10f   : > { %1559 = vst [vmem:[#allocation1] ss:$4 sm:$0xff] %v404_v39  ;;  %1624 = vrot.lane.b32.xlu1 %v1557_v46, %s3842_s18  ;;  %v495_v39 = vrot.slane %v4040_v30, 4 }
 0x110   : > { %1560 = vst [vmem:[#allocation1 + $0x1] ss:$4 sm:$0xff] %v405_v41 }
 0x111   : > { %1561 = vst [vmem:[#allocation1 + $0x2] ss:$4 sm:$0xff] %v318_v7  ;;  %v322_v7 = vld [vmem:[%s3884_s17 + $0xc9] sm:$0x3f] }
 0x112   : > { %1562 = vst [vmem:[#allocation1 + $0x3] ss:$4 sm:$0xff] %v406_v44  ;;  %v416_v9 = vrot.slane %v322_v7, 2  ;;  %v417_v12 = vrot.slane %v322_v7, 4 }
 0x113   : > { %v1578_v51 = vld.sshfl [vmem:[#allocation1 + $0x20] sm:$0xff pattern:$0x73625140] }
 0x114   : > { %1586 = vst [vmem:[#allocation1 + $0x23] ss:$4 sm:$0xff] %v324_v47  ;;  %v431_v47 = vld [vmem:[%s3884_s17 + $0x42] sm:$0xff] }
 0x115   : > { %1583 = vst [vmem:[#allocation1 + $0x20] ss:$4 sm:$0xff] %v418_v48  ;;  %v499_v48 = vrot.slane %v431_v47, 2 }
 0x116   : > { %1584 = vst [vmem:[#allocation1 + $0x21] ss:$4 sm:$0xff] %v419_v49  ;;  %v500_v49 = vrot.slane %v431_v47, 4 }
 0x117   : > { %1585 = vst [vmem:[#allocation1 + $0x22] ss:$4 sm:$0xff] %v420_v54  ;;  %1630 = vrot.lane.b32.xlu1 %v1568_v36, %s3842_s18  ;;  %v423_v36 = vld [vmem:[%s3884_s17 + $0x2] sm:$0xff]  ;;  %v501_v54 = vrot.slane %v431_v47, 6 }
 0x118   : > { %v479_v41 = vrot.slane %v423_v36, 2  ;;  %v481_v46 = vrot.slane %v423_v36, 6 }
 0x119   : > { %v1567_v61 = vld.sshfl [vmem:[#allocation1] sm:$0xff pattern:$0x73625140] }
 0x11a   : > { %1628 = vrot.lane.b32.xlu0 %v1567_v61, %s3842_s18  ;;  %1569 = vst [vmem:[#allocation1] ss:$4 sm:$0xff] %v410_v56  ;;  %v485_v56 = vrot.slane %v4019_v5, 4  ;;  %v433_v61 = vld [vmem:[%s3884_s17 + $0x52] sm:$0xff] }
 0x11b   : > { %1570 = vst [vmem:[#allocation1 + $0x1] ss:$4 sm:$0xff] %v320_v55  ;;  %v484_v55 = vrot.slane %v4019_v5, 2 }
 0x11c   : > { %1571 = vst [vmem:[#allocation1 + $0x2] ss:$4 sm:$0xff] %v411_v57  ;;  %v486_v57 = vrot.slane %v4019_v5, 6 }
 0x11d   : > { %1572 = vst [vmem:[#allocation1 + $0x3] ss:$4 sm:$0xff] %v412_v62  ;;  %v504_v62 = vrot.slane %v433_v61, 2 }
 0x11e   : > { %v1588_v4 = vld.sshfl [vmem:[#allocation1 + $0x20] sm:$0xff pattern:$0x73625140] }
 0x11f   : > { %1675 = vst [vmem:[#allocation1 + $0x20] ss:$4 sm:$0xff] %v424_v60 }
 0x120   : > { %1677 = vst [vmem:[#allocation1 + $0x21] ss:$4 sm:$0xff] %v482_v0  ;;  %v505_v0 = vrot.slane %v433_v61, 4 }
 0x121   : > { %1679 = vst [vmem:[#allocation1 + $0x22] ss:$4 sm:$0xff] %v483_v2  ;;  %v506_v2 = vrot.slane %v433_v61, 6 }
 0x122   : > { %1681 = vst [vmem:[#allocation1 + $0x23] ss:$4 sm:$0xff] %v4019_v5  ;;  %1634 = vrot.lane.b32.xlu0 %v1578_v51, %s3842_s18  ;;  %v491_v5 = vrot.slane %v4029_v14, 6 }
 0x124   : > { %v1577_v13 = vld.sshfl [vmem:[#allocation1] sm:$0xff pattern:$0x73625140] }
 0x125   : > { %1579 = vst [vmem:[#allocation1] ss:$4 sm:$0xff] %v322_v7  ;;  %1632 = vrot.lane.b32.xlu2 %v1577_v13, %s3842_s18  ;;  %v4061_v7 = vld [vmem:[%s3884_s17 + $0x5a] sm:$0x3f]  ;;  %v4068_v13 = vld [vmem:[%s3884_s17 + $0x62] sm:$0xff] }
 0x126   : > { %1580 = vst [vmem:[#allocation1 + $0x1] ss:$4 sm:$0xff] %v416_v9  ;;  %v490_v9 = vrot.slane %v4029_v14, 4 }
 0x127   : > { %1581 = vst [vmem:[#allocation1 + $0x2] ss:$4 sm:$0xff] %v417_v12 }
 0x128   : > { %1582 = vst [vmem:[#allocation1 + $0x3] ss:$4 sm:$0xff] %v323_v42  ;;  %v480_v42 = vrot.slane %v423_v36, 4 }
 0x129   : > { %v1683_v22 = vld.sshfl [vmem:[#allocation1 + $0x20] sm:$0xff pattern:$0x73625140] }
 0x12a   : > { %1688 = vst [vmem:[#allocation1 + $0x20] ss:$4 sm:$0xff] %v487_v15  ;;  %v4073_v15 = vld [vmem:[%s3884_s17 + $0x6a] sm:$0x3f] }
 0x12b   : > { %1689 = vst [vmem:[#allocation1 + $0x21] ss:$4 sm:$0xff] %v488_v17  ;;  %v510_v17 = vrot.slane %v4068_v13, 4 }
 0x12c   : > { %1690 = vst [vmem:[#allocation1 + $0x22] ss:$4 sm:$0xff] %v4029_v14  ;;  %v511_v14 = vrot.slane %v4068_v13, 6 }
 0x12d   : > { %1691 = vst [vmem:[#allocation1 + $0x23] ss:$4 sm:$0xff] %v489_v20  ;;  %1638 = vrot.lane.b32.xlu2 %v1588_v4, %s3842_s18 }
 0x12f   : > { %v1587_v27 = vld.sshfl [vmem:[#allocation1] sm:$0xff pattern:$0x73625140] }
 0x130   : > { %1589 = vst [vmem:[#allocation1] ss:$4 sm:$0xff] %v421_v24  ;;  %1636 = vrot.lane.b32.xlu1 %v1587_v27, %s3842_s18  ;;  %v430_v24 = vld [vmem:[%s3884_s17 + $0x3a] sm:$0x3f] }
 0x131   : > { %1590 = vst [vmem:[#allocation1 + $0x1] ss:$4 sm:$0xff] %v422_v25  ;;  %v496_v25 = vrot.slane %v4040_v30, 6  ;;  %v498_v27 = vrot.slane %v430_v24, 4 }
 0x134   : > { %v1693_v37 = vld.sshfl [vmem:[#allocation1 + $0x20] sm:$0xff pattern:$0x73625140] }
 0x135   : > { %1698 = vst [vmem:[#allocation1 + $0x20] ss:$4 sm:$0xff] %v493_v31  ;;  %1799 = vrot.lane.b32.xlu2 %v1683_v22, %s3843_s19  ;;  %v512_v22 = vrot.slane %v4073_v15, 2 }
 0x136   : > { %1699 = vst [vmem:[#allocation1 + $0x21] ss:$4 sm:$0xff] %v4040_v30 }
 0x137   : > { %1700 = vst [vmem:[#allocation1 + $0x22] ss:$4 sm:$0xff] %v494_v35  ;;  %v4083_v35 = vld [vmem:[%s3884_s17 + $0x72] sm:$0xff] }
 0x138   : > { %1701 = vst [vmem:[#allocation1 + $0x23] ss:$4 sm:$0xff] %v495_v39  ;;  %v1591_v44 = vld.sshfl [vmem:[#allocation1] sm:$0xff pattern:$0x73625140]  ;;  %1803 = vrot.lane.b32.xlu1 %v1693_v37, %s3843_s19  ;;  %v516_v37 = vrot.slane %v4083_v35, 6 }
 0x139   : > { %1640 = vrot.lane.b32.xlu0 %v1591_v44, %s3842_s18  ;;  %1667 = vst [vmem:[#allocation1] ss:$4 sm:$0xff] %v423_v36  ;;  %v438_v36 = vld [vmem:[%s3884_s17 + $0x7a] sm:$0x3f] }
 0x13a   : > { %1669 = vst [vmem:[#allocation1 + $0x1] ss:$4 sm:$0xff] %v479_v41  ;;  %v517_v30 = vrot.slane %v438_v36, 2  ;;  %v518_v41 = vrot.slane %v438_v36, 4 }
 0x13b   : > { %1671 = vst [vmem:[#allocation1 + $0x2] ss:$4 sm:$0xff] %v480_v42  ;;  %v432_v42 = vld [vmem:[%s3884_s17 + $0x4a] sm:$0x3f] }
 0x13c   : > { %1673 = vst [vmem:[#allocation1 + $0x3] ss:$4 sm:$0xff] %v481_v46  ;;  %v502_v44 = vrot.slane %v432_v42, 2 }
 0x13f   : > { %v1703_v51 = vld.sshfl [vmem:[#allocation1 + $0x20] sm:$0xff pattern:$0x73625140] }
 0x140   : > { %1708 = vst [vmem:[#allocation1 + $0x20] ss:$4 sm:$0xff] %v431_v47  ;;  %v503_v47 = vrot.slane %v432_v42, 4 }
 0x141   : > { %1709 = vst [vmem:[#allocation1 + $0x21] ss:$4 sm:$0xff] %v499_v48  ;;  %1807 = vrot.lane.b32.xlu0 %v1703_v51, %s3843_s19  ;;  %v440_v48 = vld [vmem:[%s3884_s17 + $0x8a] sm:$0x3f] }
 0x142   : > { %1710 = vst [vmem:[#allocation1 + $0x22] ss:$4 sm:$0xff] %v500_v49  ;;  %v522_v49 = vrot.slane %v440_v48, 2  ;;  %v523_v51 = vrot.slane %v440_v48, 4 }
 0x143   : > { %1711 = vst [vmem:[#allocation1 + $0x23] ss:$4 sm:$0xff] %v501_v54  ;;  %v1682_v60 = vld.sshfl [vmem:[#allocation1] sm:$0xff pattern:$0x73625140] }
 0x144   : > { %1684 = vst [vmem:[#allocation1] ss:$4 sm:$0xff] %v484_v55  ;;  %1797 = vrot.lane.b32.xlu1 %v1682_v60, %s3843_s19  ;;  %v4094_v55 = vld [vmem:[%s3884_s17 + $0x92] sm:$0xff]  ;;  %v509_v60 = vrot.slane %v4068_v13, 2 }
 0x145   : > { %1685 = vst [vmem:[#allocation1 + $0x1] ss:$4 sm:$0xff] %v485_v56  ;;  %v507_v56 = vrot.slane %v4061_v7, 2 }
 0x146   : > { %1686 = vst [vmem:[#allocation1 + $0x2] ss:$4 sm:$0xff] %v486_v57  ;;  %v508_v57 = vrot.slane %v4061_v7, 4 }
 0x147   : > { %1687 = vst [vmem:[#allocation1 + $0x3] ss:$4 sm:$0xff] %v4025_v11  ;;  %v492_v11 = vrot.slane %v4037_v26, 2 }
 0x14a   : > { %v1713_v4 = vld.sshfl [vmem:[#allocation1 + $0x20] sm:$0xff pattern:$0x73625140] }
 0x14b   : > { %1811 = vrot.lane.b32.xlu2 %v1713_v4, %s3843_s19  ;;  %1718 = vst [vmem:[#allocation1 + $0x20] ss:$4 sm:$0xff] %v504_v62  ;;  %v4101_v62 = vld [vmem:[%s3884_s17 + $0x9a] sm:$0x3f] }
 0x14c   : > { %1719 = vst [vmem:[#allocation1 + $0x21] ss:$4 sm:$0xff] %v505_v0  ;;  %v4106_v0 = vld [vmem:[%s3884_s17 + $0xa2] sm:$0xff]  ;;  %v528_v4 = vrot.slane %v4101_v62, 4 }
 0x14d   : > { %1720 = vst [vmem:[#allocation1 + $0x22] ss:$4 sm:$0xff] %v506_v2  ;;  %v527_v2 = vrot.slane %v4101_v62, 2 }
 0x14e   : > { %1721 = vst [vmem:[#allocation1 + $0x23] ss:$4 sm:$0xff] %v4061_v7  ;;  %v1692_v12 = vld.sshfl [vmem:[#allocation1] sm:$0xff pattern:$0x73625140] }
 0x14f   : > { %1695 = vst [vmem:[#allocation1 + $0x1] ss:$4 sm:$0xff] %v491_v5  ;;  %1801 = vrot.lane.b32.xlu0 %v1692_v12, %s3843_s19  ;;  %v529_v5 = vrot.slane %v4106_v0, 2  ;;  %v514_v12 = vrot.slane %v4083_v35, 2 }
 0x150   : > { %1696 = vst [vmem:[#allocation1 + $0x2] ss:$4 sm:$0xff] %v4037_v26  ;;  %v497_v26 = vrot.slane %v430_v24, 2 }
 0x151   : > { %1694 = vst [vmem:[#allocation1] ss:$4 sm:$0xff] %v490_v9  ;;  %v513_v9 = vrot.slane %v4073_v15, 4 }
 0x152   : > { %1697 = vst [vmem:[#allocation1 + $0x3] ss:$4 sm:$0xff] %v492_v11 }
 0x155   : > { %v1723_v20 = vld.sshfl [vmem:[#allocation1 + $0x20] sm:$0xff pattern:$0x73625140] }
 0x156   : > { %1815 = vrot.lane.b32.xlu1 %v1723_v20, %s3843_s19  ;;  %1728 = vst [vmem:[#allocation1 + $0x20] ss:$4 sm:$0xff] %v510_v17  ;;  %v4117_v17 = vld [vmem:[%s3884_s17 + $0xaa] sm:$0x3f] }
 0x157   : > { %1729 = vst [vmem:[#allocation1 + $0x21] ss:$4 sm:$0xff] %v511_v14  ;;  %v4122_v14 = vld [vmem:[%s3884_s17 + $0xb2] sm:$0xff] }
 0x158   : > { %1730 = vst [vmem:[#allocation1 + $0x22] ss:$4 sm:$0xff] %v4073_v15  ;;  %v533_v15 = vrot.slane %v4117_v17, 4  ;;  %v534_v20 = vrot.slane %v4122_v14, 2 }
 0x159   : > { %1731 = vst [vmem:[#allocation1 + $0x23] ss:$4 sm:$0xff] %v512_v22  ;;  %v1702_v31 = vld.sshfl [vmem:[#allocation1] sm:$0xff pattern:$0x73625140] }
 0x15a   : > { %1704 = vst [vmem:[#allocation1] ss:$4 sm:$0xff] %v496_v25  ;;  %1805 = vrot.lane.b32.xlu2 %v1702_v31, %s3843_s19  ;;  %v439_v22 = vld [vmem:[%s3884_s17 + $0x82] sm:$0xff]  ;;  %v535_v25 = vrot.slane %v4122_v14, 4 }
 0x15b   : > { %1705 = vst [vmem:[#allocation1 + $0x1] ss:$4 sm:$0xff] %v430_v24  ;;  %v521_v31 = vrot.slane %v439_v22, 6 }
 0x15c   : > { %1706 = vst [vmem:[#allocation1 + $0x2] ss:$4 sm:$0xff] %v497_v26  ;;  %v519_v26 = vrot.slane %v439_v22, 2 }
 0x15d   : > { %1707 = vst [vmem:[#allocation1 + $0x3] ss:$4 sm:$0xff] %v498_v27  ;;  %v520_v27 = vrot.slane %v439_v22, 4 }
 0x160   : > { %v1733_v39 = vld.sshfl [vmem:[#allocation1 + $0x20] sm:$0xff pattern:$0x73625140] }
 0x161   : > { %1819 = vrot.lane.b32.xlu0 %v1733_v39, %s3843_s19  ;;  %1738 = vst [vmem:[#allocation1 + $0x20] ss:$4 sm:$0xff] %v516_v37 }
 0x162   : > { %1739 = vst [vmem:[#allocation1 + $0x21] ss:$4 sm:$0xff] %v438_v36  ;;  %v447_v36 = vld [vmem:[%s3884_s17 + $0xc2] sm:$0xff] }
 0x163   : > { %1740 = vst [vmem:[#allocation1 + $0x22] ss:$4 sm:$0xff] %v517_v30  ;;  %v539_v37 = vrot.slane %v447_v36, 2  ;;  %v540_v30 = vrot.slane %v447_v36, 4 }
 0x164   : > { %1741 = vst [vmem:[#allocation1 + $0x23] ss:$4 sm:$0xff] %v518_v41  ;;  %v1712_v46 = vld.sshfl [vmem:[#allocation1] sm:$0xff pattern:$0x73625140]  ;;  %v541_v41 = vrot.slane %v447_v36, 6 }
 0x165   : > { %1717 = vst [vmem:[#allocation1 + $0x3] ss:$4 sm:$0xff] %v433_v61  ;;  %1809 = vrot.lane.b32.xlu1 %v1712_v46, %s3843_s19  ;;  %v526_v46 = vrot.slane %v4094_v55, 6 }
 0x166   : > { %1714 = vst [vmem:[#allocation1] ss:$4 sm:$0xff] %v432_v42  ;;  %v524_v42 = vrot.slane %v4094_v55, 2 }
 0x167   : > { %1715 = vst [vmem:[#allocation1 + $0x1] ss:$4 sm:$0xff] %v502_v44  ;;  %v525_v44 = vrot.slane %v4094_v55, 4 }
 0x168   : > { %1716 = vst [vmem:[#allocation1 + $0x2] ss:$4 sm:$0xff] %v503_v47 }
 0x16b   : > { %v1743_v54 = vld.sshfl [vmem:[#allocation1 + $0x20] sm:$0xff pattern:$0x73625140] }
 0x16c   : > { %1823 = vrot.lane.b32.xlu2 %v1743_v54, %s3843_s19  ;;  %1748 = vst [vmem:[#allocation1 + $0x20] ss:$4 sm:$0xff] %v440_v48  ;;  %v4137_v48 = vld [vmem:[%s3884_s17 + $0xd2] sm:$0xff] }
 0x16d   : > { %1749 = vst [vmem:[#allocation1 + $0x21] ss:$4 sm:$0xff] %v522_v49  ;;  %v544_v49 = vrot.slane %v4137_v48, 2  ;;  %v546_v54 = vrot.slane %v4137_v48, 6 }
 0x16e   : > { %1750 = vst [vmem:[#allocation1 + $0x22] ss:$4 sm:$0xff] %v523_v51  ;;  %v545_v51 = vrot.slane %v4137_v48, 4 }
 0x16f   : > { %1751 = vst [vmem:[#allocation1 + $0x23] ss:$4 sm:$0xff] %v4094_v55  ;;  %v1722_v61 = vld.sshfl [vmem:[#allocation1] sm:$0xff pattern:$0x73625140] }
 0x170   : > { %1724 = vst [vmem:[#allocation1] ss:$4 sm:$0xff] %v507_v56  ;;  %1813 = vrot.lane.b32.xlu0 %v1722_v61, %s3843_s19  ;;  %v4146_v55 = vld [vmem:[%s3884_s17 + $0xda] sm:$0x3f]  ;;  %v532_v61 = vrot.slane %v4117_v17, 2 }
 0x171   : > { %1725 = vst [vmem:[#allocation1 + $0x1] ss:$4 sm:$0xff] %v508_v57  ;;  %v530_v57 = vrot.slane %v4106_v0, 4 }
 0x172   : > { %1726 = vst [vmem:[#allocation1 + $0x2] ss:$4 sm:$0xff] %v4068_v13  ;;  %v515_v13 = vrot.slane %v4083_v35, 4 }
 0x173   : > { %1727 = vst [vmem:[#allocation1 + $0x3] ss:$4 sm:$0xff] %v509_v60  ;;  %v531_v60 = vrot.slane %v4106_v0, 6 }
 0x176   : > { %v1753_v7 = vld.sshfl [vmem:[#allocation1 + $0x20] sm:$0xff pattern:$0x73625140] }
 0x177   : > { %1827 = vrot.lane.b32.xlu1 %v1753_v7, %s3843_s19  ;;  %1758 = vst [vmem:[#allocation1 + $0x20] ss:$4 sm:$0xff] %v527_v2  ;;  %v3605_v2 = vld [vmem:[%s3884_s17 + $0x18] sm:$0x3f] }
 0x178   : > { %1759 = vst [vmem:[#allocation1 + $0x21] ss:$4 sm:$0xff] %v528_v4  ;;  %v609_v4 = vrot.slane %v3605_v2, 2  ;;  %v610_v7 = vrot.slane %v3605_v2, 4 }
 0x179   : > { %1760 = vst [vmem:[#allocation1 + $0x22] ss:$4 sm:$0xff] %v4106_v0  ;;  %v4158_v0 = vld [vmem:[%s3884_s17 + $0x20] sm:$0xff] }
 0x17a   : > { %1761 = vst [vmem:[#allocation1 + $0x23] ss:$4 sm:$0xff] %v529_v5  ;;  %v1732_v11 = vld.sshfl [vmem:[#allocation1] sm:$0xff pattern:$0x73625140] }
 0x17b   : > { %1734 = vst [vmem:[#allocation1] ss:$4 sm:$0xff] %v513_v9  ;;  %1817 = vrot.lane.b32.xlu2 %v1732_v11, %s3843_s19  ;;  %v446_v9 = vld [vmem:[%s3884_s17 + $0xba] sm:$0x3f] }
 0x17c   : > { %1735 = vst [vmem:[#allocation1 + $0x1] ss:$4 sm:$0xff] %v4083_v35  ;;  %v537_v11 = vrot.slane %v446_v9, 2 }
 0x17d   : > { %1736 = vst [vmem:[#allocation1 + $0x2] ss:$4 sm:$0xff] %v514_v12  ;;  %v536_v12 = vrot.slane %v4122_v14, 6 }
 0x17e   : > { %1737 = vst [vmem:[#allocation1 + $0x3] ss:$4 sm:$0xff] %v515_v13  ;;  %v538_v13 = vrot.slane %v446_v9, 4 }
 0x181   : > { %v1763_v24 = vld.sshfl [vmem:[#allocation1 + $0x20] sm:$0xff pattern:$0x73625140] }
 0x182   : > { %1831 = vrot.lane.b32.xlu0 %v1763_v24, %s3843_s19  ;;  %1768 = vst [vmem:[#allocation1 + $0x20] ss:$4 sm:$0xff] %v533_v15  ;;  %v4163_v15 = vld [vmem:[%s3884_s17 + $0x28] sm:$0x3f] }
 0x183   : > { %1769 = vst [vmem:[#allocation1 + $0x21] ss:$4 sm:$0xff] %v4122_v14  ;;  %v614_v14 = vrot.slane %v4163_v15, 2  ;;  %v448_v24 = vld [vmem:[%s3884_s17 + $0xca] sm:$0x3f] }
 0x184   : > { %1770 = vst [vmem:[#allocation1 + $0x22] ss:$4 sm:$0xff] %v534_v20  ;;  %v4167_v20 = vld [vmem:[%s3884_s17 + $0x30] sm:$0xff] }
 0x185   : > { %1771 = vst [vmem:[#allocation1 + $0x23] ss:$4 sm:$0xff] %v535_v25  ;;  %v1742_v35 = vld.sshfl [vmem:[#allocation1] sm:$0xff pattern:$0x73625140] }
 0x186   : > { %1744 = vst [vmem:[#allocation1] ss:$4 sm:$0xff] %v439_v22  ;;  %1821 = vrot.lane.b32.xlu1 %v1742_v35, %s3843_s19  ;;  %v615_v22 = vrot.slane %v4163_v15, 4 }
 0x187   : > { %1745 = vst [vmem:[#allocation1 + $0x1] ss:$4 sm:$0xff] %v519_v26  ;;  %v616_v26 = vrot.slane %v4167_v20, 2 }
 0x188   : > { %1746 = vst [vmem:[#allocation1 + $0x2] ss:$4 sm:$0xff] %v520_v27  ;;  %v542_v27 = vrot.slane %v448_v24, 2 }
 0x189   : > { %1747 = vst [vmem:[#allocation1 + $0x3] ss:$4 sm:$0xff] %v521_v31  ;;  %v543_v31 = vrot.slane %v448_v24, 4 }
 0x18c   : > { %v1773_v39 = vld.sshfl [vmem:[#allocation1 + $0x20] sm:$0xff pattern:$0x73625140] }
 0x18d   : > { %1835 = vrot.lane.b32.xlu2 %v1773_v39, %s3843_s19  ;;  %1778 = vst [vmem:[#allocation1 + $0x20] ss:$4 sm:$0xff] %v447_v36  ;;  %v4175_v36 = vld [vmem:[%s3884_s17 + $0x38] sm:$0x3f] }
 0x18e   : > { %1779 = vst [vmem:[#allocation1 + $0x21] ss:$4 sm:$0xff] %v539_v37  ;;  %v4179_v37 = vld [vmem:[%s3884_s17 + $0x40] sm:$0xff] }
 0x18f   : > { %1780 = vst [vmem:[#allocation1 + $0x22] ss:$4 sm:$0xff] %v540_v30  ;;  %v620_v30 = vrot.slane %v4175_v36, 4  ;;  %v621_v39 = vrot.slane %v4179_v37, 2 }
 0x190   : > { %1781 = vst [vmem:[#allocation1 + $0x23] ss:$4 sm:$0xff] %v541_v41  ;;  %v1752_v47 = vld.sshfl [vmem:[#allocation1] sm:$0xff pattern:$0x73625140] }
 0x191   : > { %1754 = vst [vmem:[#allocation1] ss:$4 sm:$0xff] %v524_v42  ;;  %1825 = vrot.lane.b32.xlu0 %v1752_v47, %s3843_s19  ;;  %v622_v42 = vrot.slane %v4179_v37, 4 }
 0x192   : > { %1755 = vst [vmem:[#allocation1 + $0x1] ss:$4 sm:$0xff] %v525_v44  ;;  %v547_v44 = vrot.slane %v4146_v55, 2 }
 0x193   : > { %1756 = vst [vmem:[#allocation1 + $0x2] ss:$4 sm:$0xff] %v526_v46  ;;  %v548_v46 = vrot.slane %v4146_v55, 4 }
 0x194   : > { %1757 = vst [vmem:[#allocation1 + $0x3] ss:$4 sm:$0xff] %v4101_v62 }
 0x197   : > { %v1783_v56 = vld.sshfl [vmem:[#allocation1 + $0x20] sm:$0xff pattern:$0x73625140] }
 0x198   : > { %1839 = vrot.lane.b32.xlu1 %v1783_v56, %s3843_s19  ;;  %1788 = vst [vmem:[#allocation1 + $0x20] ss:$4 sm:$0xff] %v544_v49  ;;  %v3604_v49 = vld [vmem:[%s3884_s17 + $0x10] sm:$0xff] }
 0x199   : > { %1789 = vst [vmem:[#allocation1 + $0x21] ss:$4 sm:$0xff] %v545_v51 }
 0x19a   : > { %1790 = vst [vmem:[#allocation1 + $0x22] ss:$4 sm:$0xff] %v546_v54 }
 0x19b   : > { %1791 = vst [vmem:[#allocation1 + $0x23] ss:$4 sm:$0xff] %v4146_v55  ;;  %v1762_v62 = vld.sshfl [vmem:[#allocation1] sm:$0xff pattern:$0x73625140] }
 0x19c   : > { %1766 = vst [vmem:[#allocation1 + $0x2] ss:$4 sm:$0xff] %v4117_v17  ;;  %1829 = vrot.lane.b32.xlu2 %v1762_v62, %s3843_s19 }
 0x19d   : > { %1764 = vst [vmem:[#allocation1] ss:$4 sm:$0xff] %v530_v57  ;;  %v606_v57 = vrot.slane %v3604_v49, 2 }
 0x19e   : > { %1765 = vst [vmem:[#allocation1 + $0x1] ss:$4 sm:$0xff] %v531_v60  ;;  %v607_v60 = vrot.slane %v3604_v49, 4 }
 0x19f   : > { %1767 = vst [vmem:[#allocation1 + $0x3] ss:$4 sm:$0xff] %v532_v61  ;;  %v608_v61 = vrot.slane %v3604_v49, 6 }
 0x1a2   : > { %v1793_v5 = vld.sshfl [vmem:[#allocation1 + $0x20] sm:$0xff pattern:$0x73625140] }
 0x1a3   : > { %1843 = vrot.lane.b32.xlu0 %v1793_v5, %s3843_s19  ;;  %1880 = vst [vmem:[#allocation1 + $0x20] ss:$4 sm:$0xff] %v3605_v2  ;;  %v611_v2 = vrot.slane %v4158_v0, 2  ;;  %v613_v5 = vrot.slane %v4158_v0, 6 }
 0x1a4   : > { %1882 = vst [vmem:[#allocation1 + $0x21] ss:$4 sm:$0xff] %v609_v4  ;;  %v4197_v4 = vld [vmem:[%s3884_s17 + $0x60] sm:$0xff] }
 0x1a5   : > { %1884 = vst [vmem:[#allocation1 + $0x22] ss:$4 sm:$0xff] %v610_v7  ;;  %v612_v7 = vrot.slane %v4158_v0, 4 }
 0x1a6   : > { %1886 = vst [vmem:[#allocation1 + $0x23] ss:$4 sm:$0xff] %v4158_v0  ;;  %v1772_v17 = vld.sshfl [vmem:[#allocation1] sm:$0xff pattern:$0x73625140] }
 0x1a7   : > { %1774 = vst [vmem:[#allocation1] ss:$4 sm:$0xff] %v536_v12  ;;  %1833 = vrot.lane.b32.xlu1 %v1772_v17, %s3843_s19  ;;  %v633_v17 = vrot.slane %v4197_v4, 6  ;;  %v4208_v0 = vld [vmem:[%s3884_s17 + $0x68] sm:$0x3f] }
 0x1a8   : > { %1775 = vst [vmem:[#allocation1 + $0x1] ss:$4 sm:$0xff] %v446_v9 }
 0x1a9   : > { %1776 = vst [vmem:[#allocation1 + $0x2] ss:$4 sm:$0xff] %v537_v11  ;;  %v631_v11 = vrot.slane %v4197_v4, 2 }
 0x1aa   : > { %1777 = vst [vmem:[#allocation1 + $0x3] ss:$4 sm:$0xff] %v538_v13  ;;  %v632_v13 = vrot.slane %v4197_v4, 4 }
 0x1ad   : > { %v1888_v25 = vld.sshfl [vmem:[#allocation1 + $0x20] sm:$0xff pattern:$0x73625140] }
 0x1ae   : > { %1893 = vst [vmem:[#allocation1 + $0x20] ss:$4 sm:$0xff] %v614_v14  ;;  %v618_v14 = vrot.slane %v4167_v20, 6 }
 0x1af   : > { %1894 = vst [vmem:[#allocation1 + $0x21] ss:$4 sm:$0xff] %v615_v22  ;;  %v4214_v22 = vld [vmem:[%s3884_s17 + $0x70] sm:$0xff] }
 0x1b0   : > { %1895 = vst [vmem:[#allocation1 + $0x22] ss:$4 sm:$0xff] %v4167_v20 }
 0x1b1   : > { %1896 = vst [vmem:[#allocation1 + $0x23] ss:$4 sm:$0xff] %v616_v26  ;;  %v1782_v35 = vld.sshfl [vmem:[#allocation1] sm:$0xff pattern:$0x73625140] }
 0x1b2   : > { %1784 = vst [vmem:[#allocation1] ss:$4 sm:$0xff] %v448_v24  ;;  %1837 = vrot.lane.b32.xlu0 %v1782_v35, %s3843_s19  ;;  %v4216_v24 = vpop.permute.xlu2 %1602  ;;  %v638_v35 = vrot.slane %v4214_v22, 6 }
 0x1b3   : > { %1785 = vst [vmem:[#allocation1 + $0x1] ss:$4 sm:$0xff] %v542_v27  ;;  %v4221_v27 = vld [vmem:[%s3884_s17 + $0x78] sm:$0x3f] }
 0x1b4   : > { %1786 = vst [vmem:[#allocation1 + $0x2] ss:$4 sm:$0xff] %v543_v31  ;;  %v637_v31 = vrot.slane %v4214_v22, 4 }
 0x1b5   : > { %1787 = vst [vmem:[#allocation1 + $0x3] ss:$4 sm:$0xff] %v4137_v48  ;;  %v3612_v48 = vld [vmem:[%s3884_s17 + $0x50] sm:$0xff] }
 0x1b6   : > { %v626_v51 = vrot.slane %v3612_v48, 2  ;;  %v627_v54 = vrot.slane %v3612_v48, 4  ;;  %v628_v62 = vrot.slane %v3612_v48, 6  ;;  %5942 = vst [vmem:[#allocation15_spill] sm:$0xff] %v4216_v24  ;;  %v748_v24 = vrot.slane %v4383_v28, 4 }
 0x1b8   : > { %v1898_v41 = vld.sshfl [vmem:[#allocation1 + $0x20] sm:$0xff pattern:$0x73625140] }
 0x1b9   : > { %1903 = vst [vmem:[#allocation1 + $0x20] ss:$4 sm:$0xff] %v620_v30  ;;  %v639_v30 = vrot.slane %v4221_v27, 2 }
 0x1ba   : > { %1904 = vst [vmem:[#allocation1 + $0x21] ss:$4 sm:$0xff] %v4179_v37  ;;  %2004 = vrot.lane.b32.xlu0 %v1888_v25, %s3844_s20  ;;  %v619_v25 = vrot.slane %v4175_v36, 2 }
 0x1bb   : > { %1905 = vst [vmem:[#allocation1 + $0x22] ss:$4 sm:$0xff] %v621_v39  ;;  %v3611_v39 = vld [vmem:[%s3884_s17 + $0x48] sm:$0x3f] }
 0x1bc   : > { %1906 = vst [vmem:[#allocation1 + $0x23] ss:$4 sm:$0xff] %v622_v42  ;;  %v1792_v47 = vld.sshfl [vmem:[#allocation1] sm:$0xff pattern:$0x73625140]  ;;  %v4231_v42 = vpop.permute.xlu2 %1600 }
 0x1bd   : > { %1794 = vst [vmem:[#allocation1] ss:$4 sm:$0xff] %v547_v44  ;;  %1841 = vrot.lane.b32.xlu2 %v1792_v47, %s3843_s19  ;;  %v4234_v44 = vld [vmem:[%s3884_s17 + $0x80] sm:$0xff] }
 0x1be   : > { %1795 = vst [vmem:[#allocation1 + $0x1] ss:$4 sm:$0xff] %v548_v46  ;;  %v4236_v46 = vpop.permute.xlu0 %1594 }
 0x1bf   : > { %5943 = vst [vmem:[#allocation16_spill] sm:$0xff] %v4236_v46 }
 0x1c3   : > { %v1908_v56 = vld.sshfl [vmem:[#allocation1 + $0x20] sm:$0xff pattern:$0x73625140] }
 0x1c4   : > { %1913 = vst [vmem:[#allocation1 + $0x20] ss:$4 sm:$0xff] %v3612_v48  ;;  %v625_v48 = vrot.slane %v3611_v39, 4 }
 0x1c5   : > { %1914 = vst [vmem:[#allocation1 + $0x21] ss:$4 sm:$0xff] %v626_v51  ;;  %v1796_v55 = vld.sshfl [vmem:[#allocation1] sm:$0xff pattern:$0x73625140]  ;;  %2008 = vrot.lane.b32.xlu2 %v1898_v41, %s3844_s20  ;;  %v623_v41 = vrot.slane %v4179_v37, 6 }
 0x1c6   : > { %1915 = vst [vmem:[#allocation1 + $0x22] ss:$4 sm:$0xff] %v627_v54  ;;  %1845 = vrot.lane.b32.xlu1 %v1796_v55, %s3843_s19  ;;  %v643_v51 = vrot.slane %v4234_v44, 6 }
 0x1c7   : > { %1872 = vst [vmem:[#allocation1] ss:$4 sm:$0xff] %v3604_v49  ;;  %v3619_v49 = vld [vmem:[%s3884_s17 + $0x88] sm:$0x3f] }
 0x1c8   : > { %1874 = vst [vmem:[#allocation1 + $0x1] ss:$4 sm:$0xff] %v606_v57  ;;  %v644_v37 = vrot.slane %v3619_v49, 2  ;;  %v3613_v57 = vld [vmem:[%s3884_s17 + $0x58] sm:$0x3f] }
 0x1c9   : > { %1876 = vst [vmem:[#allocation1 + $0x2] ss:$4 sm:$0xff] %v607_v60  ;;  %v4243_v60 = vpop.permute.xlu2 %1608  ;;  %v629_v55 = vrot.slane %v3613_v57, 2 }
 0x1ca   : > { %1878 = vst [vmem:[#allocation1 + $0x3] ss:$4 sm:$0xff] %v608_v61  ;;  %v4245_v61 = vpop.permute.xlu1 %1598 }
 0x1cb   : > { %1916 = vst [vmem:[#allocation1 + $0x23] ss:$4 sm:$0xff] %v628_v62  ;;  %v4247_v62 = vpop.permute.xlu0 %1592 }
 0x1cc   : > { %5944 = vst [vmem:[#allocation17_spill] sm:$0xff] %v4245_v61 }
 0x1ce   : > { %2012 = vrot.lane.b32.xlu1 %v1908_v56, %s3844_s20  ;;  %v645_v56 = vrot.slane %v3619_v49, 4 }
 0x1d1   : > { %v1887_v9 = vld.sshfl [vmem:[#allocation1] sm:$0xff pattern:$0x73625140] }
 0x1d2   : > { %1892 = vst [vmem:[#allocation1 + $0x3] ss:$4 sm:$0xff] %v4163_v15  ;;  %v1918_v12 = vld.sshfl [vmem:[#allocation1 + $0x20] sm:$0xff pattern:$0x73625140]  ;;  %2002 = vrot.lane.b32.xlu2 %v1887_v9, %s3844_s20  ;;  %v617_v15 = vrot.slane %v4167_v20, 4 }
 0x1d3   : > { %1889 = vst [vmem:[#allocation1] ss:$4 sm:$0xff] %v611_v2  ;;  %2016 = vrot.lane.b32.xlu0 %v1918_v12, %s3844_s20  ;;  %v630_v2 = vrot.slane %v3613_v57, 4 }
 0x1d4   : > { %1890 = vst [vmem:[#allocation1 + $0x1] ss:$4 sm:$0xff] %v612_v7  ;;  %v3621_v7 = vld [vmem:[%s3884_s17 + $0x98] sm:$0x3f] }
 0x1d5   : > { %1891 = vst [vmem:[#allocation1 + $0x2] ss:$4 sm:$0xff] %v613_v5  ;;  %v649_v9 = vrot.slane %v3621_v7, 2  ;;  %v650_v12 = vrot.slane %v3621_v7, 4 }
 0x1d6   : > { %1923 = vst [vmem:[#allocation1 + $0x20] ss:$4 sm:$0xff] %v631_v11 }
 0x1d7   : > { %1924 = vst [vmem:[#allocation1 + $0x21] ss:$4 sm:$0xff] %v632_v13  ;;  %v4254_v13 = vld [vmem:[%s3884_s17 + $0xa0] sm:$0xff] }
 0x1d8   : > { %1925 = vst [vmem:[#allocation1 + $0x22] ss:$4 sm:$0xff] %v633_v17  ;;  %v4256_v17 = vpop.permute.xlu2 %1614 }
 0x1d9   : > { %1926 = vst [vmem:[#allocation1 + $0x23] ss:$4 sm:$0xff] %v4208_v0 }
 0x1dc   : > { %v1897_v26 = vld.sshfl [vmem:[#allocation1] sm:$0xff pattern:$0x73625140] }
 0x1dd   : > { %1899 = vst [vmem:[#allocation1] ss:$4 sm:$0xff] %v617_v15  ;;  %2006 = vrot.lane.b32.xlu1 %v1897_v26, %s3844_s20  ;;  %v634_v15 = vrot.slane %v4208_v0, 2  ;;  %v4266_v26 = vld [vmem:[%s3884_s17 + $0xa8] sm:$0x3f] }
 0x1de   : > { %1900 = vst [vmem:[#allocation1 + $0x1] ss:$4 sm:$0xff] %v618_v14  ;;  %v4260_v14 = vpop.permute.xlu1 %1596 }
 0x1df   : > { %1901 = vst [vmem:[#allocation1 + $0x2] ss:$4 sm:$0xff] %v4175_v36  ;;  %v624_v36 = vrot.slane %v3611_v39, 2 }
 0x1e0   : > { %1902 = vst [vmem:[#allocation1 + $0x3] ss:$4 sm:$0xff] %v619_v25  ;;  %v1928_v20 = vld.sshfl [vmem:[#allocation1 + $0x20] sm:$0xff pattern:$0x73625140]  ;;  %v4262_v25 = vpop.permute.xlu0 %1604 }
 0x1e1   : > { %2020 = vrot.lane.b32.xlu2 %v1928_v20, %s3844_s20  ;;  %1933 = vst [vmem:[#allocation1 + $0x20] ss:$4 sm:$0xff] %v637_v31  ;;  %v4271_v20 = vld [vmem:[%s3884_s17 + $0xb0] sm:$0xff] }
 0x1e2   : > { %1934 = vst [vmem:[#allocation1 + $0x21] ss:$4 sm:$0xff] %v638_v35  ;;  %v636_v35 = vrot.slane %v4214_v22, 2 }
 0x1e3   : > { %1935 = vst [vmem:[#allocation1 + $0x22] ss:$4 sm:$0xff] %v4221_v27 }
 0x1e4   : > { %1936 = vst [vmem:[#allocation1 + $0x23] ss:$4 sm:$0xff] %v639_v30  ;;  %v654_v30 = vrot.slane %v4266_v26, 2 }
 0x1e7   : > { %v1907_v47 = vld.sshfl [vmem:[#allocation1] sm:$0xff pattern:$0x73625140] }
 0x1e8   : > { %1909 = vst [vmem:[#allocation1] ss:$4 sm:$0xff] %v623_v41  ;;  %2010 = vrot.lane.b32.xlu0 %v1907_v47, %s3844_s20  ;;  %v656_v41 = vrot.slane %v4271_v20, 2  ;;  %v4281_v47 = vpop.permute.xlu1 %1606 }
 0x1e9   : > { %1910 = vst [vmem:[#allocation1 + $0x1] ss:$4 sm:$0xff] %v3611_v39  ;;  %v655_v39 = vrot.slane %v4266_v26, 4 }
 0x1ea   : > { %1911 = vst [vmem:[#allocation1 + $0x2] ss:$4 sm:$0xff] %v624_v36  ;;  %v4278_v36 = vpop.permute.xlu2 %1620 }
 0x1eb   : > { %1912 = vst [vmem:[#allocation1 + $0x3] ss:$4 sm:$0xff] %v625_v48  ;;  %v1938_v54 = vld.sshfl [vmem:[#allocation1 + $0x20] sm:$0xff pattern:$0x73625140]  ;;  %v4283_v48 = vpop.permute.xlu0 %1610 }
 0x1ec   : > { %2024 = vrot.lane.b32.xlu1 %v1938_v54, %s3844_s20  ;;  %1943 = vst [vmem:[#allocation1 + $0x20] ss:$4 sm:$0xff] %v643_v51  ;;  %v641_v51 = vrot.slane %v4234_v44, 2  ;;  %v642_v54 = vrot.slane %v4234_v44, 4 }
 0x1ed   : > { %1944 = vst [vmem:[#allocation1 + $0x21] ss:$4 sm:$0xff] %v3619_v49  ;;  %v640_v49 = vrot.slane %v4221_v27, 4 }
 0x1ee   : > { %1945 = vst [vmem:[#allocation1 + $0x22] ss:$4 sm:$0xff] %v644_v37 }
 0x1ef   : > { %1946 = vst [vmem:[#allocation1 + $0x23] ss:$4 sm:$0xff] %v645_v56  ;;  %v4292_v56 = vld [vmem:[%s3884_s17 + $0xc0] sm:$0xff] }
 0x1f0   : > { %v661_v27 = vrot.slane %v4292_v56, 2 }
 0x1f2   : > { %v1917_v5 = vld.sshfl [vmem:[#allocation1] sm:$0xff pattern:$0x73625140] }
 0x1f3   : > { %1919 = vst [vmem:[#allocation1] ss:$4 sm:$0xff] %v3613_v57  ;;  %2014 = vrot.lane.b32.xlu2 %v1917_v5, %s3844_s20  ;;  %v3620_v5 = vld [vmem:[%s3884_s17 + $0x90] sm:$0xff] }
 0x1f4   : > { %1920 = vst [vmem:[#allocation1 + $0x1] ss:$4 sm:$0xff] %v629_v55 }
 0x1f5   : > { %1921 = vst [vmem:[#allocation1 + $0x2] ss:$4 sm:$0xff] %v630_v2  ;;  %v662_v2 = vrot.slane %v4292_v56, 4 }
 0x1f6   : > { %1922 = vst [vmem:[#allocation1 + $0x3] ss:$4 sm:$0xff] %v4197_v4  ;;  %v1948_v11 = vld.sshfl [vmem:[#allocation1 + $0x20] sm:$0xff pattern:$0x73625140]  ;;  %v635_v4 = vrot.slane %v4208_v0, 4 }
 0x1f7   : > { %2028 = vrot.lane.b32.xlu0 %v1948_v11, %s3844_s20  ;;  %1953 = vst [vmem:[#allocation1 + $0x20] ss:$4 sm:$0xff] %v3621_v7  ;;  %v4299_v7 = vpop.permute.xlu2 %1626  ;;  %v647_v11 = vrot.slane %v3620_v5, 4 }
 0x1f8   : > { %1954 = vst [vmem:[#allocation1 + $0x21] ss:$4 sm:$0xff] %v649_v9  ;;  %v4304_v9 = vpop.permute.xlu1 %1612 }
 0x1f9   : > { %1955 = vst [vmem:[#allocation1 + $0x22] ss:$4 sm:$0xff] %v650_v12  ;;  %v4306_v12 = vpop.permute.xlu0 %1616 }
 0x1fa   : > { %1956 = vst [vmem:[#allocation1 + $0x23] ss:$4 sm:$0xff] %v4254_v13 }
 0x1fb   : > { %5945 = vst [vmem:[#allocation18_spill] sm:$0xff] %v4304_v9 }
 0x1fc   : > { %5946 = vst [vmem:[#allocation19_spill] sm:$0xff] %v4306_v12 }
 0x1fd   : > { %v1927_v31 = vld.sshfl [vmem:[#allocation1] sm:$0xff pattern:$0x73625140] }
 0x1fe   : > { %1929 = vst [vmem:[#allocation1] ss:$4 sm:$0xff] %v634_v15  ;;  %2018 = vrot.lane.b32.xlu1 %v1927_v31, %s3844_s20  ;;  %v3628_v15 = vld [vmem:[%s3884_s17 + $0xd0] sm:$0xff]  ;;  %v648_v31 = vrot.slane %v3620_v5, 6 }
 0x1ff   : > { %1930 = vst [vmem:[#allocation1 + $0x1] ss:$4 sm:$0xff] %v635_v4 }
 0x200   : > { %1931 = vst [vmem:[#allocation1 + $0x2] ss:$4 sm:$0xff] %v4214_v22  ;;  %v4287_v22 = vld [vmem:[%s3884_s17 + $0xb8] sm:$0x3f] }
 0x201   : > { %1932 = vst [vmem:[#allocation1 + $0x3] ss:$4 sm:$0xff] %v636_v35  ;;  %v1958_v0 = vld.sshfl [vmem:[#allocation1 + $0x20] sm:$0xff pattern:$0x73625140]  ;;  %v660_v57 = vrot.slane %v4287_v22, 4 }
 0x202   : > { %2032 = vrot.lane.b32.xlu2 %v1958_v0, %s3844_s20  ;;  %1963 = vst [vmem:[#allocation1 + $0x20] ss:$4 sm:$0xff] %v654_v30  ;;  %v666_v35 = vrot.slane %v3628_v15, 2  ;;  %v667_v30 = vrot.slane %v3628_v15, 4 }
 0x203   : > { %1964 = vst [vmem:[#allocation1 + $0x21] ss:$4 sm:$0xff] %v655_v39  ;;  %v4310_v39 = vpop.permute.xlu2 %1632 }
 0x204   : > { %1965 = vst [vmem:[#allocation1 + $0x22] ss:$4 sm:$0xff] %v4271_v20 }
 0x205   : > { %1966 = vst [vmem:[#allocation1 + $0x23] ss:$4 sm:$0xff] %v656_v41  ;;  %v668_v41 = vrot.slane %v3628_v15, 6 }
 0x206   : > { %5947 = vst [vmem:[#allocation20_spill] sm:$0xff] %v4310_v39 }
 0x208   : > { %v1937_v37 = vld.sshfl [vmem:[#allocation1] sm:$0xff pattern:$0x73625140] }
 0x209   : > { %1939 = vst [vmem:[#allocation1] ss:$4 sm:$0xff] %v640_v49  ;;  %2022 = vrot.lane.b32.xlu0 %v1937_v37, %s3844_s20  ;;  %v4313_v49 = vpop.permute.xlu1 %1618  ;;  %v651_v37 = vrot.slane %v4254_v13, 2 }
 0x20a   : > { %1940 = vst [vmem:[#allocation1 + $0x1] ss:$4 sm:$0xff] %v4234_v44  ;;  %v646_v44 = vrot.slane %v3620_v5, 2 }
 0x20b   : > { %1941 = vst [vmem:[#allocation1 + $0x2] ss:$4 sm:$0xff] %v641_v51  ;;  %v4315_v51 = vpop.permute.xlu0 %1622 }
 0x20c   : > { %1942 = vst [vmem:[#allocation1 + $0x3] ss:$4 sm:$0xff] %v642_v54  ;;  %v1968_v55 = vld.sshfl [vmem:[#allocation1 + $0x20] sm:$0xff pattern:$0x73625140]  ;;  %v652_v54 = vrot.slane %v4254_v13, 4 }
 0x20d   : > { %2036 = vrot.lane.b32.xlu1 %v1968_v55, %s3844_s20  ;;  %1973 = vst [vmem:[#allocation1 + $0x20] ss:$4 sm:$0xff] %v660_v57  ;;  %v4320_v57 = vld [vmem:[%s3884_s17 + $0xe0] sm:$0xff] }
 0x20e   : > { %1974 = vst [vmem:[#allocation1 + $0x21] ss:$4 sm:$0xff] %v4292_v56 }
 0x20f   : > { %1975 = vst [vmem:[#allocation1 + $0x22] ss:$4 sm:$0xff] %v661_v27  ;;  %v653_v27 = vrot.slane %v4254_v13, 6 }
 0x210   : > { %1976 = vst [vmem:[#allocation1 + $0x23] ss:$4 sm:$0xff] %v662_v2  ;;  %v671_v2 = vrot.slane %v4320_v57, 2 }
 0x213   : > { %v1947_v4 = vld.sshfl [vmem:[#allocation1] sm:$0xff pattern:$0x73625140]  ;;  %v4332_v13 = vpop.permute.xlu0 %1628 }
 0x214   : > { %2026 = vrot.lane.b32.xlu2 %v1947_v4, %s3844_s20  ;;  %1949 = vst [vmem:[#allocation1] ss:$4 sm:$0xff] %v3620_v5  ;;  %v672_v5 = vrot.slane %v4320_v57, 4  ;;  %v4330_v4 = vpop.permute.xlu1 %1624 }
 0x215   : > { %1950 = vst [vmem:[#allocation1 + $0x1] ss:$4 sm:$0xff] %v646_v44  ;;  %v4326_v44 = vpop.permute.xlu2 %1638 }
 0x216   : > { %1951 = vst [vmem:[#allocation1 + $0x2] ss:$4 sm:$0xff] %v647_v11  ;;  %v673_v11 = vrot.slane %v4320_v57, 6 }
 0x217   : > { %v1978_v0 = vld.sshfl [vmem:[#allocation1 + $0x20] sm:$0xff pattern:$0x73625140]  ;;  %1952 = vst [vmem:[#allocation1 + $0x3] ss:$4 sm:$0xff] %v648_v31 }
 0x218   : > { %2040 = vrot.lane.b32.xlu0 %v1978_v0, %s3844_s20  ;;  %1983 = vst [vmem:[#allocation1 + $0x20] ss:$4 sm:$0xff] %v3628_v15  ;;  %v4336_v31 = vld [vmem:[%s3884_s17 + $0xe8] sm:$0x3f]  ;;  %v659_v0 = vrot.slane %v4287_v22, 2 }
 0x219   : > { %1984 = vst [vmem:[#allocation1 + $0x21] ss:$4 sm:$0xff] %v666_v35  ;;  %v657_v35 = vrot.slane %v4271_v20, 4 }
 0x21a   : > { %1985 = vst [vmem:[#allocation1 + $0x22] ss:$4 sm:$0xff] %v667_v30  ;;  %v658_v30 = vrot.slane %v4271_v20, 6 }
 0x21b   : > { %1986 = vst [vmem:[#allocation1 + $0x23] ss:$4 sm:$0xff] %v668_v41  ;;  %v4349_v20 = vpop.permute.xlu0 %1634 }
 0x21c   : > { %5948 = vst [vmem:[#allocation21_spill] sm:$0xff] %v4326_v44 }
 0x21d   : > { %5949 = vst [vmem:[#allocation22_spill] sm:$0xff] %v4330_v4  ;;  %v4432_v4 = vld [vmem:[%s3884_s17 + $0x71] sm:$0xff] }
 0x21e   : > { %v1957_v55 = vld.sshfl [vmem:[#allocation1] sm:$0xff pattern:$0x73625140]  ;;  %5950 = vst [vmem:[#allocation23_spill] sm:$0xff] %v4332_v13  ;;  %v733_v13 = vrot.slane %v3632_v58, 4 }
 0x21f   : > { %2030 = vrot.lane.b32.xlu1 %v1957_v55, %s3844_s20  ;;  %1959 = vst [vmem:[#allocation1] ss:$4 sm:$0xff] %v651_v37  ;;  %v4344_v37 = vpop.permute.xlu2 %1799  ;;  %v4347_v55 = vpop.permute.xlu1 %1630 }
 0x220   : > { %1960 = vst [vmem:[#allocation1 + $0x1] ss:$4 sm:$0xff] %v652_v54 }
 0x221   : > { %1961 = vst [vmem:[#allocation1 + $0x2] ss:$4 sm:$0xff] %v653_v27 }
 0x222   : > { %1962 = vst [vmem:[#allocation1 + $0x3] ss:$4 sm:$0xff] %v4266_v26  ;;  %v1988_v15 = vld.sshfl [vmem:[#allocation1 + $0x20] sm:$0xff pattern:$0x73625140] }
 0x223   : > { %2044 = vrot.lane.b32.xlu2 %v1988_v15, %s3844_s20  ;;  %1993 = vst [vmem:[#allocation1 + $0x20] ss:$4 sm:$0xff] %v671_v2  ;;  %v3633_v26 = vld [vmem:[%s3884_s17 + $0x19] sm:$0x3f]  ;;  %v663_v15 = vrot.slane %v4292_v56, 6 }
 0x224   : > { %1994 = vst [vmem:[#allocation1 + $0x21] ss:$4 sm:$0xff] %v672_v5  ;;  %v735_v54 = vrot.slane %v3633_v26, 2  ;;  %v736_v27 = vrot.slane %v3633_v26, 4  ;;  %v4353_v5 = vld [vmem:[%s3884_s17 + $0x21] sm:$0xff] }
 0x225   : > { %1995 = vst [vmem:[#allocation1 + $0x22] ss:$4 sm:$0xff] %v673_v11  ;;  %v3627_v11 = vld [vmem:[%s3884_s17 + $0xc8] sm:$0x3f] }
 0x226   : > { %1996 = vst [vmem:[#allocation1 + $0x23] ss:$4 sm:$0xff] %v4336_v31 }
 0x227   : > { %5951 = vst [vmem:[#allocation24_spill] sm:$0xff] %v4344_v37  ;;  %v4361_v33 = vpop.permute.xlu2 %1811  ;;  %v4369_v56 = vpop.permute.xlu1 %1636 }
 0x228   : > { %5952 = vst [vmem:[#allocation25_spill] sm:$0xff] %v4347_v55  ;;  %v3639_v55 = vld [vmem:[%s3884_s17 + $0x49] sm:$0x3f] }
 0x229   : > { %v1967_v41 = vld.sshfl [vmem:[#allocation1] sm:$0xff pattern:$0x73625140]  ;;  %5953 = vst [vmem:[#allocation26_spill] sm:$0xff] %v4349_v20 }
 0x22a   : > { %2034 = vrot.lane.b32.xlu0 %v1967_v41, %s3844_s20  ;;  %1969 = vst [vmem:[#allocation1] ss:$4 sm:$0xff] %v657_v35  ;;  %v664_v35 = vrot.slane %v3627_v11, 2  ;;  %v665_v41 = vrot.slane %v3627_v11, 4 }
 0x22b   : > { %1970 = vst [vmem:[#allocation1 + $0x1] ss:$4 sm:$0xff] %v658_v30 }
 0x22c   : > { %1971 = vst [vmem:[#allocation1 + $0x2] ss:$4 sm:$0xff] %v4287_v22  ;;  %v4359_v22 = vld [vmem:[%s3884_s17 + $0x29] sm:$0x3f] }
 0x22d   : > { %1972 = vst [vmem:[#allocation1 + $0x3] ss:$4 sm:$0xff] %v659_v0  ;;  %v1998_v2 = vld.sshfl [vmem:[#allocation1 + $0x20] sm:$0xff pattern:$0x73625140]  ;;  %v4364_v0 = vld [vmem:[%s3884_s17 + $0x31] sm:$0xff] }
 0x22e   : > { %2048 = vrot.lane.b32.xlu1 %v1998_v2, %s3844_s20  ;;  %2085 = vst [vmem:[#allocation1 + $0x20] ss:$4 sm:$0xff] %v3633_v26  ;;  %v740_v2 = vrot.slane %v4359_v22, 2  ;;  %v741_v26 = vrot.slane %v4359_v22, 4 }
 0x22f   : > { %2087 = vst [vmem:[#allocation1 + $0x21] ss:$4 sm:$0xff] %v735_v54  ;;  %v4371_v54 = vpop.permute.xlu0 %1640 }
 0x230   : > { %2089 = vst [vmem:[#allocation1 + $0x22] ss:$4 sm:$0xff] %v736_v27  ;;  %v742_v27 = vrot.slane %v4364_v0, 2 }
 0x231   : > { %2091 = vst [vmem:[#allocation1 + $0x23] ss:$4 sm:$0xff] %v4353_v5 }
 0x232   : > { %5954 = vst [vmem:[#allocation27_spill] sm:$0xff] %v4369_v56 }
 0x233   : > { %5955 = vst [vmem:[#allocation28_spill] sm:$0xff] %v4371_v54  ;;  %v4380_v54 = vpop.permute.xlu2 %1805 }
 0x234   : > { %v1977_v30 = vld.sshfl [vmem:[#allocation1] sm:$0xff pattern:$0x73625140] }
 0x235   : > { %2038 = vrot.lane.b32.xlu2 %v1977_v30, %s3844_s20  ;;  %1979 = vst [vmem:[#allocation1] ss:$4 sm:$0xff] %v663_v15  ;;  %v3629_v15 = vld [vmem:[%s3884_s17 + $0xd8] sm:$0x3f] }
 0x236   : > { %1980 = vst [vmem:[#allocation1 + $0x1] ss:$4 sm:$0xff] %v3627_v11  ;;  %v669_v11 = vrot.slane %v3629_v15, 2  ;;  %v4378_v30 = vld [vmem:[%s3884_s17 + $0x39] sm:$0x3f]  ;;  %v670_v56 = vrot.slane %v3629_v15, 4 }
 0x237   : > { %1981 = vst [vmem:[#allocation1 + $0x2] ss:$4 sm:$0xff] %v664_v35 }
 0x238   : > { %v2093_v18 = vld.sshfl [vmem:[#allocation1 + $0x20] sm:$0xff pattern:$0x73625140]  ;;  %1982 = vst [vmem:[#allocation1 + $0x3] ss:$4 sm:$0xff] %v665_v41  ;;  %v746_v41 = vrot.slane %v4378_v30, 4 }
 0x239   : > { %2098 = vst [vmem:[#allocation1 + $0x20] ss:$4 sm:$0xff] %v740_v2  ;;  %2209 = vrot.lane.b32.xlu1 %v2093_v18, %s3845_s21  ;;  %v4386_v2 = vpop.permute.xlu1 %1803  ;;  %v4388_v18 = vpop.permute.xlu0 %1807 }
 0x23a   : > { %2099 = vst [vmem:[#allocation1 + $0x21] ss:$4 sm:$0xff] %v741_v26  ;;  %v747_v26 = vrot.slane %v4383_v28, 2 }
 0x23b   : > { %2100 = vst [vmem:[#allocation1 + $0x22] ss:$4 sm:$0xff] %v4364_v0 }
 0x23c   : > { %2101 = vst [vmem:[#allocation1 + $0x23] ss:$4 sm:$0xff] %v742_v27 }
 0x23d   : > { %5956 = vst [vmem:[#allocation29_spill] sm:$0xff] %v4386_v2 }
 0x23e   : > { %5957 = vst [vmem:[#allocation30_spill] sm:$0xff] %v4388_v18 }
 0x23f   : > { %v1987_v35 = vld.sshfl [vmem:[#allocation1] sm:$0xff pattern:$0x73625140] }
 0x240   : > { %1989 = vst [vmem:[#allocation1] ss:$4 sm:$0xff] %v3629_v15  ;;  %v674_v15 = vrot.slane %v4336_v31, 2 }
 0x241   : > { %1990 = vst [vmem:[#allocation1 + $0x1] ss:$4 sm:$0xff] %v669_v11  ;;  %2042 = vrot.lane.b32.xlu1 %v1987_v35, %s3844_s20  ;;  %v675_v11 = vrot.slane %v4336_v31, 4  ;;  %v3640_v35 = vld [vmem:[%s3884_s17 + $0x51] sm:$0xff]  ;;  %v4401_v2 = vpop.permute.xlu1 %1797  ;;  %v732_v31 = vrot.slane %v3632_v58, 2 }
 0x242   : > { %1991 = vst [vmem:[#allocation1 + $0x2] ss:$4 sm:$0xff] %v670_v56  ;;  %v4398_v56 = vpop.permute.xlu2 %1823 }
 0x243   : > { %v2103_v27 = vld.sshfl [vmem:[#allocation1 + $0x20] sm:$0xff pattern:$0x73625140]  ;;  %1992 = vst [vmem:[#allocation1 + $0x3] ss:$4 sm:$0xff] %v4320_v57  ;;  %v4403_v57 = vpop.permute.xlu0 %1801 }
 0x244   : > { %2213 = vrot.lane.b32.xlu0 %v2103_v27, %s3845_s21  ;;  %2108 = vst [vmem:[#allocation1 + $0x20] ss:$4 sm:$0xff] %v746_v41  ;;  %v752_v41 = vrot.slane %v3640_v35, 2 }
 0x245   : > { %2109 = vst [vmem:[#allocation1 + $0x21] ss:$4 sm:$0xff] %v4383_v28  ;;  %v3649_v28 = vld [vmem:[%s3884_s17 + $0x99] sm:$0x3f] }
 0x246   : > { %2110 = vst [vmem:[#allocation1 + $0x22] ss:$4 sm:$0xff] %v747_v26  ;;  %v753_v26 = vrot.slane %v3640_v35, 4 }
 0x247   : > { %2111 = vst [vmem:[#allocation1 + $0x23] ss:$4 sm:$0xff] %v748_v24  ;;  %v754_v24 = vrot.slane %v3640_v35, 6 }
 0x249   : > { %v4413_v61 = vpop.permute.xlu1 %1815 }
 0x24a   : > { %v1997_v18 = vld.sshfl [vmem:[#allocation1] sm:$0xff pattern:$0x73625140]  ;;  %v4408_v19 = vpop.permute.xlu2 %1817 }
 0x24b   : > { %1999 = vst [vmem:[#allocation1] ss:$4 sm:$0xff] %v674_v15  ;;  %v734_v15 = vrot.slane %v3632_v58, 6  ;;  %v4415_v45 = vpop.permute.xlu0 %1819 }
 0x24c   : > { %2046 = vrot.lane.b32.xlu0 %v1997_v18, %s3844_s20  ;;  %2000 = vst [vmem:[#allocation1 + $0x1] ss:$4 sm:$0xff] %v675_v11  ;;  %v4411_v11 = vld [vmem:[%s3884_s17 + $0x61] sm:$0xff] }
 0x24d   : > { %5958 = vst [vmem:[#allocation31_spill] sm:$0xff] %v4408_v19  ;;  %v4556_v19 = vld [vmem:[%s3884_s17 + $0xe9] sm:$0x3f] }
 0x24e   : > { %v2113_v27 = vld.sshfl [vmem:[#allocation1 + $0x20] sm:$0xff pattern:$0x73625140] }
 0x24f   : > { %2217 = vrot.lane.b32.xlu2 %v2113_v27, %s3845_s21  ;;  %2118 = vst [vmem:[#allocation1 + $0x20] ss:$4 sm:$0xff] %v3640_v35  ;;  %v757_v35 = vrot.slane %v4411_v11, 2 }
 0x250   : > { %2119 = vst [vmem:[#allocation1 + $0x21] ss:$4 sm:$0xff] %v752_v41  ;;  %v758_v41 = vrot.slane %v4411_v11, 4 }
 0x251   : > { %2120 = vst [vmem:[#allocation1 + $0x22] ss:$4 sm:$0xff] %v753_v26  ;;  %v759_v26 = vrot.slane %v4411_v11, 6 }
 0x252   : > { %2121 = vst [vmem:[#allocation1 + $0x23] ss:$4 sm:$0xff] %v754_v24  ;;  %v737_v24 = vrot.slane %v4353_v5, 2 }
 0x253   : > { %v2001_v18 = vld.sshfl [vmem:[#allocation1] sm:$0xff pattern:$0x73625140] }
 0x254   : > { %2077 = vst [vmem:[#allocation1] ss:$4 sm:$0xff] %v3632_v58  ;;  %v4423_v58 = vld [vmem:[%s3884_s17 + $0x69] sm:$0x3f] }
 0x255   : > { %2079 = vst [vmem:[#allocation1 + $0x1] ss:$4 sm:$0xff] %v732_v31  ;;  %v739_v31 = vrot.slane %v4353_v5, 6 }
 0x256   : > { %2081 = vst [vmem:[#allocation1 + $0x2] ss:$4 sm:$0xff] %v733_v13  ;;  %v738_v13 = vrot.slane %v4353_v5, 4  ;;  %v763_v5 = vrot.slane %v4432_v4, 4 }
 0x257   : > { %2083 = vst [vmem:[#allocation1 + $0x3] ss:$4 sm:$0xff] %v734_v15  ;;  %2050 = vrot.lane.b32.xlu2 %v2001_v18, %s3844_s20  ;;  %v4428_v15 = vpop.permute.xlu2 %1835 }
 0x258   : > { %5959 = vst [vmem:[#allocation32_spill] sm:$0xff] %v4428_v15 }
 0x259   : > { %v2123_v27 = vld.sshfl [vmem:[#allocation1 + $0x20] sm:$0xff pattern:$0x73625140] }
 0x25a   : > { %2221 = vrot.lane.b32.xlu1 %v2123_v27, %s3845_s21  ;;  %2128 = vst [vmem:[#allocation1 + $0x20] ss:$4 sm:$0xff] %v757_v35  ;;  %v4434_v27 = vpop.permute.xlu1 %1809  ;;  %v4437_v35 = vpop.permute.xlu0 %1813 }
 0x25b   : > { %2129 = vst [vmem:[#allocation1 + $0x21] ss:$4 sm:$0xff] %v758_v41  ;;  %v4440_v41 = vld [vmem:[%s3884_s17 + $0x79] sm:$0x3f] }
 0x25c   : > { %2130 = vst [vmem:[#allocation1 + $0x22] ss:$4 sm:$0xff] %v759_v26  ;;  %v764_v26 = vrot.slane %v4432_v4, 6  ;;  %v765_v20 = vrot.slane %v4440_v41, 2 }
 0x25d   : > { %2131 = vst [vmem:[#allocation1 + $0x23] ss:$4 sm:$0xff] %v4423_v58 }
 0x25e   : > { %v2092_v18 = vld.sshfl [vmem:[#allocation1] sm:$0xff pattern:$0x73625140] }
 0x25f   : > { %2207 = vrot.lane.b32.xlu0 %v2092_v18, %s3845_s21  ;;  %2094 = vst [vmem:[#allocation1] ss:$4 sm:$0xff] %v737_v24  ;;  %v743_v24 = vrot.slane %v4364_v0, 4 }
 0x260   : > { %2095 = vst [vmem:[#allocation1 + $0x1] ss:$4 sm:$0xff] %v738_v13  ;;  %v744_v13 = vrot.slane %v4364_v0, 6  ;;  %v3647_v0 = vld [vmem:[%s3884_s17 + $0x89] sm:$0x3f] }
 0x261   : > { %2096 = vst [vmem:[#allocation1 + $0x2] ss:$4 sm:$0xff] %v739_v31  ;;  %v4448_v31 = vpop.permute.xlu2 %1829 }
 0x262   : > { %2097 = vst [vmem:[#allocation1 + $0x3] ss:$4 sm:$0xff] %v4359_v22  ;;  %v745_v22 = vrot.slane %v4378_v30, 2  ;;  %v4453_v18 = vpop.permute.xlu1 %1827  ;;  %v4455_v15 = vpop.permute.xlu0 %1831 }
 0x263   : > { %5960 = vst [vmem:[#allocation33_spill] sm:$0xff] %v4448_v31  ;;  %v771_v31 = vrot.slane %v3647_v0, 4 }
 0x264   : > { %v2133_v52 = vld.sshfl [vmem:[#allocation1 + $0x20] sm:$0xff pattern:$0x73625140]  ;;  %5961 = vst [vmem:[#allocation34_spill] sm:$0xff] %v4453_v18 }
 0x265   : > { %2138 = vst [vmem:[#allocation1 + $0x20] ss:$4 sm:$0xff] %v763_v5 }
 0x266   : > { %2139 = vst [vmem:[#allocation1 + $0x21] ss:$4 sm:$0xff] %v764_v26 }
 0x267   : > { %2225 = vrot.lane.b32.xlu0 %v2133_v52, %s3845_s21  ;;  %2140 = vst [vmem:[#allocation1 + $0x22] ss:$4 sm:$0xff] %v4440_v41  ;;  %v769_v52 = vrot.slane %v4458_v40, 6 }
 0x268   : > { %2141 = vst [vmem:[#allocation1 + $0x23] ss:$4 sm:$0xff] %v765_v20  ;;  %v770_v20 = vrot.slane %v3647_v0, 2 }
 0x269   : > { %v2102_v5 = vld.sshfl [vmem:[#allocation1] sm:$0xff pattern:$0x73625140]  ;;  %v4466_v39 = vpop.permute.xlu2 %1841 }
 0x26a   : > { %2211 = vrot.lane.b32.xlu2 %v2102_v5, %s3845_s21  ;;  %2104 = vst [vmem:[#allocation1] ss:$4 sm:$0xff] %v743_v24  ;;  %v4469_v24 = vpop.permute.xlu1 %1821  ;;  %v751_v5 = vrot.slane %v3639_v55, 4 }
 0x26b   : > { %2105 = vst [vmem:[#allocation1 + $0x1] ss:$4 sm:$0xff] %v744_v13  ;;  %v4471_v13 = vpop.permute.xlu0 %1825 }
 0x26c   : > { %2106 = vst [vmem:[#allocation1 + $0x2] ss:$4 sm:$0xff] %v4378_v30  ;;  %v750_v30 = vrot.slane %v3639_v55, 2 }
 0x26d   : > { %2107 = vst [vmem:[#allocation1 + $0x3] ss:$4 sm:$0xff] %v745_v22 }
 0x26e   : > { %5962 = vst [vmem:[#allocation35_spill] sm:$0xff] %v4466_v39  ;;  %v4478_v39 = vld [vmem:[%s3884_s17 + $0xa1] sm:$0xff] }
 0x26f   : > { %v2143_v26 = vld.sshfl [vmem:[#allocation1 + $0x20] sm:$0xff pattern:$0x73625140]  ;;  %5963 = vst [vmem:[#allocation36_spill] sm:$0xff] %v4469_v24  ;;  %v4488_v24 = vld [vmem:[%s3884_s17 + $0xa9] sm:$0x3f] }
 0x270   : > { %2148 = vst [vmem:[#allocation1 + $0x20] ss:$4 sm:$0xff] %v769_v52  ;;  %v776_v52 = vrot.slane %v3649_v28, 4 }
 0x271   : > { %2149 = vst [vmem:[#allocation1 + $0x21] ss:$4 sm:$0xff] %v3647_v0  ;;  %v775_v0 = vrot.slane %v3649_v28, 2 }
 0x272   : > { %2229 = vrot.lane.b32.xlu2 %v2143_v26, %s3845_s21  ;;  %2150 = vst [vmem:[#allocation1 + $0x22] ss:$4 sm:$0xff] %v770_v20  ;;  %v4475_v26 = vpop.permute.xlu2 %2008 }
 0x273   : > { %2151 = vst [vmem:[#allocation1 + $0x23] ss:$4 sm:$0xff] %v771_v31  ;;  %v3641_v31 = vld [vmem:[%s3884_s17 + $0x59] sm:$0x3f] }
 0x274   : > { %v2112_v22 = vld.sshfl [vmem:[#allocation1] sm:$0xff pattern:$0x73625140]  ;;  %5964 = vst [vmem:[#allocation37_spill] sm:$0xff] %v4475_v26 }
 0x275   : > { %2215 = vrot.lane.b32.xlu1 %v2112_v22, %s3845_s21  ;;  %2114 = vst [vmem:[#allocation1] ss:$4 sm:$0xff] %v749_v6  ;;  %v4482_v22 = vpop.permute.xlu1 %1839  ;;  %v4484_v6 = vpop.permute.xlu0 %1843 }
 0x276   : > { %2115 = vst [vmem:[#allocation1 + $0x1] ss:$4 sm:$0xff] %v3639_v55  ;;  %v755_v55 = vrot.slane %v3641_v31, 2 }
 0x277   : > { %2116 = vst [vmem:[#allocation1 + $0x2] ss:$4 sm:$0xff] %v750_v30 }
 0x278   : > { %2117 = vst [vmem:[#allocation1 + $0x3] ss:$4 sm:$0xff] %v751_v5  ;;  %v756_v5 = vrot.slane %v3641_v31, 4 }
 0x279   : > { %5965 = vst [vmem:[#allocation38_spill] sm:$0xff] %v4482_v22 }
 0x27a   : > { %v2153_v20 = vld.sshfl [vmem:[#allocation1 + $0x20] sm:$0xff pattern:$0x73625140]  ;;  %5966 = vst [vmem:[#allocation39_spill] sm:$0xff] %v4484_v6  ;;  %v4497_v26 = vpop.permute.xlu2 %2002 }
 0x27b   : > { %2158 = vst [vmem:[#allocation1 + $0x20] ss:$4 sm:$0xff] %v3649_v28  ;;  %v4493_v28 = vld [vmem:[%s3884_s17 + $0xb1] sm:$0xff]  ;;  %v4573_v6 = vld [vmem:[%s3884_s17 + $0x22] sm:$0xff] }
 0x27c   : > { %2159 = vst [vmem:[#allocation1 + $0x21] ss:$4 sm:$0xff] %v775_v0  ;;  %v780_v0 = vrot.slane %v4488_v24, 2  ;;  %v782_v22 = vrot.slane %v4493_v28, 2 }
 0x27d   : > { %2233 = vrot.lane.b32.xlu1 %v2153_v20, %s3845_s21  ;;  %2160 = vst [vmem:[#allocation1 + $0x22] ss:$4 sm:$0xff] %v776_v52  ;;  %v781_v52 = vrot.slane %v4488_v24, 4 }
 0x27e   : > { %2161 = vst [vmem:[#allocation1 + $0x23] ss:$4 sm:$0xff] %v4478_v39 }
 0x27f   : > { %v2122_v30 = vld.sshfl [vmem:[#allocation1] sm:$0xff pattern:$0x73625140] }
 0x280   : > { %2219 = vrot.lane.b32.xlu0 %v2122_v30, %s3845_s21  ;;  %2127 = vst [vmem:[#allocation1 + $0x3] ss:$4 sm:$0xff] %v4411_v11  ;;  %v760_v30 = vrot.slane %v4423_v58, 2  ;;  %v4501_v11 = vpop.permute.xlu1 %1833 }
 0x281   : > { %2124 = vst [vmem:[#allocation1] ss:$4 sm:$0xff] %v3641_v31  ;;  %v4503_v31 = vpop.permute.xlu0 %1837 }
 0x282   : > { %2125 = vst [vmem:[#allocation1 + $0x1] ss:$4 sm:$0xff] %v755_v55  ;;  %v761_v55 = vrot.slane %v4423_v58, 4  ;;  %v786_v58 = vrot.slane %v4510_v21, 4 }
 0x283   : > { %2126 = vst [vmem:[#allocation1 + $0x2] ss:$4 sm:$0xff] %v756_v5  ;;  %v762_v5 = vrot.slane %v4432_v4, 2 }
 0x284   : > { %5967 = vst [vmem:[#allocation40_spill] sm:$0xff] %v4501_v11 }
 0x285   : > { %v2163_v20 = vld.sshfl [vmem:[#allocation1 + $0x20] sm:$0xff pattern:$0x73625140]  ;;  %5968 = vst [vmem:[#allocation41_spill] sm:$0xff] %v4503_v31 }
 0x286   : > { %2168 = vst [vmem:[#allocation1 + $0x20] ss:$4 sm:$0xff] %v780_v0  ;;  %v4514_v0 = vld [vmem:[%s3884_s17 + $0xc1] sm:$0xff] }
 0x287   : > { %2169 = vst [vmem:[#allocation1 + $0x21] ss:$4 sm:$0xff] %v781_v52  ;;  %v4518_v52 = vpop.permute.xlu2 %2020  ;;  %v788_v11 = vrot.slane %v4514_v0, 4 }
 0x288   : > { %2237 = vrot.lane.b32.xlu0 %v2163_v20, %s3845_s21  ;;  %2170 = vst [vmem:[#allocation1 + $0x22] ss:$4 sm:$0xff] %v4493_v28  ;;  %v4522_v31 = vpop.permute.xlu1 %1845 }
 0x289   : > { %2171 = vst [vmem:[#allocation1 + $0x23] ss:$4 sm:$0xff] %v782_v22  ;;  %v787_v22 = vrot.slane %v4514_v0, 2 }
 0x28a   : > { %v2132_v37 = vld.sshfl [vmem:[#allocation1] sm:$0xff pattern:$0x73625140]  ;;  %5969 = vst [vmem:[#allocation42_spill] sm:$0xff] %v4522_v31  ;;  %v3656_v31 = vld [vmem:[%s3884_s17 + $0xd1] sm:$0xff] }
 0x28b   : > { %2223 = vrot.lane.b32.xlu2 %v2132_v37, %s3845_s21  ;;  %2134 = vst [vmem:[#allocation1] ss:$4 sm:$0xff] %v760_v30  ;;  %v4524_v37 = vpop.permute.xlu0 %2004  ;;  %v766_v30 = vrot.slane %v4440_v41, 4  ;;  %v794_v10 = vrot.slane %v3656_v31, 6 }
 0x28c   : > { %2135 = vst [vmem:[#allocation1 + $0x1] ss:$4 sm:$0xff] %v761_v55  ;;  %v768_v55 = vrot.slane %v4458_v40, 4 }
 0x28d   : > { %2136 = vst [vmem:[#allocation1 + $0x2] ss:$4 sm:$0xff] %v4432_v4  ;;  %v767_v4 = vrot.slane %v4458_v40, 2 }
 0x28e   : > { %2137 = vst [vmem:[#allocation1 + $0x3] ss:$4 sm:$0xff] %v762_v5 }
 0x28f   : > { %5970 = vst [vmem:[#allocation43_spill] sm:$0xff] %v4524_v37  ;;  %v4534_v41 = vpop.permute.xlu2 %2014  ;;  %v3648_v37 = vld [vmem:[%s3884_s17 + $0x91] sm:$0xff] }
 0x290   : > { %v2173_v20 = vld.sshfl [vmem:[#allocation1 + $0x20] sm:$0xff pattern:$0x73625140]  ;;  %v4537_v12 = vpop.permute.xlu1 %2012 }
 0x291   : > { %2178 = vst [vmem:[#allocation1 + $0x20] ss:$4 sm:$0xff] %v786_v58  ;;  %v792_v58 = vrot.slane %v3656_v31, 2 }
 0x292   : > { %2179 = vst [vmem:[#allocation1 + $0x21] ss:$4 sm:$0xff] %v4514_v0 }
 0x293   : > { %2241 = vrot.lane.b32.xlu2 %v2173_v20, %s3845_s21  ;;  %2180 = vst [vmem:[#allocation1 + $0x22] ss:$4 sm:$0xff] %v787_v22  ;;  %v793_v20 = vrot.slane %v3656_v31, 4 }
 0x294   : > { %2181 = vst [vmem:[#allocation1 + $0x23] ss:$4 sm:$0xff] %v788_v11  ;;  %v4539_v11 = vpop.permute.xlu0 %2016 }
 0x295   : > { %v2142_v5 = vld.sshfl [vmem:[#allocation1] sm:$0xff pattern:$0x73625140]  ;;  %5971 = vst [vmem:[#allocation44_spill] sm:$0xff] %v4537_v12 }
 0x296   : > { %2227 = vrot.lane.b32.xlu1 %v2142_v5, %s3845_s21  ;;  %2144 = vst [vmem:[#allocation1] ss:$4 sm:$0xff] %v766_v30  ;;  %v772_v30 = vrot.slane %v3648_v37, 2  ;;  %v4543_v5 = vld [vmem:[%s3884_s17 + $0xe1] sm:$0xff] }
 0x297   : > { %2145 = vst [vmem:[#allocation1 + $0x1] ss:$4 sm:$0xff] %v4458_v40  ;;  %v773_v40 = vrot.slane %v3648_v37, 4  ;;  %v797_v12 = vrot.slane %v4543_v5, 2 }
 0x298   : > { %2146 = vst [vmem:[#allocation1 + $0x2] ss:$4 sm:$0xff] %v767_v4 }
 0x299   : > { %2147 = vst [vmem:[#allocation1 + $0x3] ss:$4 sm:$0xff] %v768_v55  ;;  %v774_v55 = vrot.slane %v3648_v37, 6 }
 0x29b   : > { %v2183_v22 = vld.sshfl [vmem:[#allocation1 + $0x20] sm:$0xff pattern:$0x73625140] }
 0x29c   : > { %2188 = vst [vmem:[#allocation1 + $0x20] ss:$4 sm:$0xff] %v3656_v31  ;;  %v4547_v31 = vpop.permute.xlu2 %2032 }
 0x29d   : > { %2189 = vst [vmem:[#allocation1 + $0x21] ss:$4 sm:$0xff] %v792_v58  ;;  %v798_v58 = vrot.slane %v4543_v5, 4 }
 0x29e   : > { %2245 = vrot.lane.b32.xlu1 %v2183_v22, %s3845_s21  ;;  %2190 = vst [vmem:[#allocation1 + $0x22] ss:$4 sm:$0xff] %v793_v20  ;;  %v799_v20 = vrot.slane %v4543_v5, 6  ;;  %v4553_v22 = vpop.permute.xlu0 %2010 }
 0x29f   : > { %2191 = vst [vmem:[#allocation1 + $0x23] ss:$4 sm:$0xff] %v794_v10  ;;  %v4551_v10 = vpop.permute.xlu1 %2006 }
 0x2a0   : > { %v2152_v4 = vld.sshfl [vmem:[#allocation1] sm:$0xff pattern:$0x73625140]  ;;  %5972 = vst [vmem:[#allocation45_spill] sm:$0xff] %v4547_v31 }
 0x2a1   : > { %2231 = vrot.lane.b32.xlu0 %v2152_v4, %s3845_s21  ;;  %2154 = vst [vmem:[#allocation1] ss:$4 sm:$0xff] %v3648_v37  ;;  %v777_v37 = vrot.slane %v4478_v39, 2 }
 0x2a2   : > { %2155 = vst [vmem:[#allocation1 + $0x1] ss:$4 sm:$0xff] %v772_v30  ;;  %v778_v30 = vrot.slane %v4478_v39, 4 }
 0x2a3   : > { %2156 = vst [vmem:[#allocation1 + $0x2] ss:$4 sm:$0xff] %v773_v40  ;;  %v779_v40 = vrot.slane %v4478_v39, 6 }
 0x2a4   : > { %2157 = vst [vmem:[#allocation1 + $0x3] ss:$4 sm:$0xff] %v774_v55  ;;  %v3661_v55 = vld [vmem:[%s3884_s17 + $0x1a] sm:$0x3f] }
 0x2a5   : > { %v862_v39 = vrot.slane %v3661_v55, 4 }
 0x2a6   : > { %v2193_v46 = vld.sshfl [vmem:[#allocation1 + $0x20] sm:$0xff pattern:$0x73625140] }
 0x2a7   : > { %2198 = vst [vmem:[#allocation1 + $0x20] ss:$4 sm:$0xff] %v797_v12  ;;  %v4565_v12 = vpop.permute.xlu2 %2026 }
 0x2a8   : > { %2199 = vst [vmem:[#allocation1 + $0x21] ss:$4 sm:$0xff] %v798_v58  ;;  %v861_v58 = vrot.slane %v3661_v55, 2 }
 0x2a9   : > { %2249 = vrot.lane.b32.xlu0 %v2193_v46, %s3845_s21  ;;  %2200 = vst [vmem:[#allocation1 + $0x22] ss:$4 sm:$0xff] %v799_v20  ;;  %v4568_v46 = vpop.permute.xlu1 %2024  ;;  %v4570_v20 = vpop.permute.xlu0 %2028 }
 0x2aa   : > { %2201 = vst [vmem:[#allocation1 + $0x23] ss:$4 sm:$0xff] %v4556_v19 }
 0x2ab   : > { %v2162_v4 = vld.sshfl [vmem:[#allocation1] sm:$0xff pattern:$0x73625140]  ;;  %5973 = vst [vmem:[#allocation46_spill] sm:$0xff] %v4565_v12 }
 0x2ac   : > { %2235 = vrot.lane.b32.xlu2 %v2162_v4, %s3845_s21  ;;  %2164 = vst [vmem:[#allocation1] ss:$4 sm:$0xff] %v777_v37  ;;  %v783_v37 = vrot.slane %v4493_v28, 4  ;;  %v4581_v4 = vld [vmem:[%s3884_s17 + $0x2a] sm:$0x3f] }
 0x2ad   : > { %2165 = vst [vmem:[#allocation1 + $0x1] ss:$4 sm:$0xff] %v778_v30  ;;  %v784_v30 = vrot.slane %v4493_v28, 6  ;;  %v4588_v28 = vld [vmem:[%s3884_s17 + $0x32] sm:$0xff]  ;;  %v867_v12 = vrot.slane %v4581_v4, 4 }
 0x2ae   : > { %2166 = vst [vmem:[#allocation1 + $0x2] ss:$4 sm:$0xff] %v779_v40 }
 0x2af   : > { %2167 = vst [vmem:[#allocation1 + $0x3] ss:$4 sm:$0xff] %v4488_v24  ;;  %v785_v24 = vrot.slane %v4510_v21, 2 }
 0x2b1   : > { %v2203_v31 = vld.sshfl [vmem:[#allocation1 + $0x20] sm:$0xff pattern:$0x73625140] }
 0x2b2   : > { %2290 = vst [vmem:[#allocation1 + $0x20] ss:$4 sm:$0xff] %v3661_v55  ;;  %v4584_v55 = vpop.permute.xlu2 %2044 }
 0x2b3   : > { %2292 = vst [vmem:[#allocation1 + $0x21] ss:$4 sm:$0xff] %v861_v58  ;;  %v4591_v58 = vpop.permute.xlu1 %2018 }
 0x2b4   : > { %2253 = vrot.lane.b32.xlu2 %v2203_v31, %s3845_s21  ;;  %2294 = vst [vmem:[#allocation1 + $0x22] ss:$4 sm:$0xff] %v862_v39  ;;  %v866_v31 = vrot.slane %v4581_v4, 2  ;;  %v4593_v39 = vpop.permute.xlu0 %2022 }
 0x2b5   : > { %2296 = vst [vmem:[#allocation1 + $0x23] ss:$4 sm:$0xff] %v4573_v6 }
 0x2b6   : > { %v2172_v40 = vld.sshfl [vmem:[#allocation1] sm:$0xff pattern:$0x73625140]  ;;  %5974 = vst [vmem:[#allocation47_spill] sm:$0xff] %v4584_v55 }
 0x2b7   : > { %2239 = vrot.lane.b32.xlu1 %v2172_v40, %s3845_s21  ;;  %2174 = vst [vmem:[#allocation1] ss:$4 sm:$0xff] %v783_v37  ;;  %v868_v37 = vrot.slane %v4588_v28, 2 }
 0x2b8   : > { %2175 = vst [vmem:[#allocation1 + $0x1] ss:$4 sm:$0xff] %v784_v30  ;;  %v789_v30 = vrot.slane %v4514_v0, 6 }
 0x2b9   : > { %2176 = vst [vmem:[#allocation1 + $0x2] ss:$4 sm:$0xff] %v4510_v21  ;;  %v3655_v21 = vld [vmem:[%s3884_s17 + $0xc9] sm:$0x3f] }
 0x2ba   : > { %5975 = vst [vmem:[#allocation48_spill] sm:$0xff] %v4593_v39  ;;  %v790_v55 = vrot.slane %v3655_v21, 2  ;;  %v791_v18 = vrot.slane %v3655_v21, 4  ;;  %v4604_v8 = vpop.permute.xlu2 %2038 }
 0x2bb   : > { %2177 = vst [vmem:[#allocation1 + $0x3] ss:$4 sm:$0xff] %v785_v24  ;;  %v4602_v24 = vld [vmem:[%s3884_s17 + $0x3a] sm:$0x3f] }
 0x2bc   : > { %v2298_v40 = vld.sshfl [vmem:[#allocation1 + $0x20] sm:$0xff pattern:$0x73625140]  ;;  %5976 = vst [vmem:[#allocation49_spill] sm:$0xff] %v4604_v8  ;;  %v4612_v0 = vpop.permute.xlu0 %2040 }
 0x2bd   : > { %2414 = vrot.lane.b32.xlu2 %v2298_v40, %s3846_s22  ;;  %2303 = vst [vmem:[#allocation1 + $0x20] ss:$4 sm:$0xff] %v866_v31  ;;  %v4608_v40 = vld [vmem:[%s3884_s17 + $0x42] sm:$0xff]  ;;  %v4610_v31 = vpop.permute.xlu1 %2036 }
 0x2be   : > { %2304 = vst [vmem:[#allocation1 + $0x21] ss:$4 sm:$0xff] %v867_v12  ;;  %v872_v12 = vrot.slane %v4602_v24, 4  ;;  %v874_v8 = vrot.slane %v4608_v40, 4 }
 0x2bf   : > { %2305 = vst [vmem:[#allocation1 + $0x22] ss:$4 sm:$0xff] %v4588_v28 }
 0x2c0   : > { %2306 = vst [vmem:[#allocation1 + $0x23] ss:$4 sm:$0xff] %v868_v37  ;;  %v873_v37 = vrot.slane %v4608_v40, 2 }
 0x2c1   : > { %5977 = vst [vmem:[#allocation50_spill] sm:$0xff] %v4612_v0 }
 0x2c2   : > { %v2182_v39 = vld.sshfl [vmem:[#allocation1] sm:$0xff pattern:$0x73625140] }
 0x2c3   : > { %2243 = vrot.lane.b32.xlu0 %v2182_v39, %s3845_s21  ;;  %2184 = vst [vmem:[#allocation1] ss:$4 sm:$0xff] %v789_v30  ;;  %v3657_v39 = vld [vmem:[%s3884_s17 + $0xd9] sm:$0x3f]  ;;  %v4620_v30 = vpop.permute.xlu2 %2217 }
 0x2c4   : > { %2185 = vst [vmem:[#allocation1 + $0x1] ss:$4 sm:$0xff] %v3655_v21  ;;  %v795_v21 = vrot.slane %v3657_v39, 2  ;;  %v4627_v44 = vpop.permute.xlu0 %2034 }
 0x2c5   : > { %2186 = vst [vmem:[#allocation1 + $0x2] ss:$4 sm:$0xff] %v790_v55  ;;  %v796_v55 = vrot.slane %v3657_v39, 4  ;;  %v4625_v1 = vpop.permute.xlu1 %2030 }
 0x2c6   : > { %2187 = vst [vmem:[#allocation1 + $0x3] ss:$4 sm:$0xff] %v791_v18  ;;  %v3668_v18 = vld [vmem:[%s3884_s17 + $0x52] sm:$0xff] }
 0x2c7   : > { %v2308_v9 = vld.sshfl [vmem:[#allocation1 + $0x20] sm:$0xff pattern:$0x73625140]  ;;  %5978 = vst [vmem:[#allocation51_spill] sm:$0xff] %v4620_v30 }
 0x2c8   : > { %2418 = vrot.lane.b32.xlu1 %v2308_v9, %s3846_s22  ;;  %2313 = vst [vmem:[#allocation1 + $0x20] ss:$4 sm:$0xff] %v872_v12  ;;  %v878_v9 = vrot.slane %v3668_v18, 2 }
 0x2c9   : > { %2314 = vst [vmem:[#allocation1 + $0x21] ss:$4 sm:$0xff] %v4608_v40 }
 0x2ca   : > { %2315 = vst [vmem:[#allocation1 + $0x22] ss:$4 sm:$0xff] %v873_v37  ;;  %v880_v37 = vrot.slane %v3668_v18, 6 }
 0x2cb   : > { %2316 = vst [vmem:[#allocation1 + $0x23] ss:$4 sm:$0xff] %v874_v8  ;;  %v879_v8 = vrot.slane %v3668_v18, 4  ;;  %v4632_v30 = vpop.permute.xlu2 %2050 }
 0x2cc   : > { %5979 = vst [vmem:[#allocation52_spill] sm:$0xff] %v4632_v30 }
 0x2cd   : > { %v2192_v0 = vld.sshfl [vmem:[#allocation1] sm:$0xff pattern:$0x73625140] }
 0x2ce   : > { %2247 = vrot.lane.b32.xlu2 %v2192_v0, %s3845_s21  ;;  %2197 = vst [vmem:[#allocation1 + $0x3] ss:$4 sm:$0xff] %v4543_v5  ;;  %v800_v0 = vrot.slane %v4556_v19, 2  ;;  %v801_v5 = vrot.slane %v4556_v19, 4 }
 0x2cf   : > { %2194 = vst [vmem:[#allocation1] ss:$4 sm:$0xff] %v3657_v39  ;;  %v3105_v39 = vsel %vm3102_vm0, %v3902_v32, %v4260_v14 }
 0x2d0   : > { %2195 = vst [vmem:[#allocation1 + $0x1] ss:$4 sm:$0xff] %v795_v21  ;;  %v3131_v19 = vsel %vm3128_vm1, %v3105_v39, %v4403_v57 }
 0x2d1   : > { %2196 = vst [vmem:[#allocation1 + $0x2] ss:$4 sm:$0xff] %v796_v55  ;;  %v4638_v55 = vld [vmem:[%s3884_s17 + $0x62] sm:$0xff] }
 0x2d2   : > { %v2318_v12 = vld.sshfl [vmem:[#allocation1 + $0x20] sm:$0xff pattern:$0x73625140]  ;;  %v884_v32 = vrot.slane %v4638_v55, 4  ;;  %v885_v14 = vrot.slane %v4638_v55, 6 }
 0x2d3   : > { %2422 = vrot.lane.b32.xlu0 %v2318_v12, %s3846_s22  ;;  %2323 = vst [vmem:[#allocation1 + $0x20] ss:$4 sm:$0xff] %v3668_v18  ;;  %v4640_v18 = vpop.permute.xlu1 %2048  ;;  %v4642_v12 = vpop.permute.xlu0 %2213 }
 0x2d4   : > { %2324 = vst [vmem:[#allocation1 + $0x21] ss:$4 sm:$0xff] %v878_v9  ;;  %v883_v9 = vrot.slane %v4638_v55, 2 }
 0x2d5   : > { %2325 = vst [vmem:[#allocation1 + $0x22] ss:$4 sm:$0xff] %v879_v8  ;;  %v3660_v8 = vld [vmem:[%s3884_s17 + $0x12] sm:$0xff] }
 0x2d6   : > { %2326 = vst [vmem:[#allocation1 + $0x23] ss:$4 sm:$0xff] %v880_v37  ;;  %v3157_v37 = vsel %vm3154_vm2, %v3131_v19, %v4551_v10  ;;  %v858_v57 = vrot.slane %v3660_v8, 2  ;;  %v860_v10 = vrot.slane %v3660_v8, 6 }
 0x2d7   : > { %5980 = vst [vmem:[#allocation53_spill] sm:$0xff] %v4642_v12 }
 0x2d8   : > { %v2202_v21 = vld.sshfl [vmem:[#allocation1] sm:$0xff pattern:$0x73625140] }
 0x2d9   : > { %2251 = vrot.lane.b32.xlu1 %v2202_v21, %s3845_s21  ;;  %2204 = vst [vmem:[#allocation1] ss:$4 sm:$0xff] %v800_v0  ;;  %v4655_v0 = vld [vmem:[%s3884_s17 + $0x6a] sm:$0x3f]  ;;  %v859_v21 = vrot.slane %v3660_v8, 4 }
 0x2da   : > { %2205 = vst [vmem:[#allocation1 + $0x1] ss:$4 sm:$0xff] %v801_v5  ;;  %v2212_v5 = vpop.permute.xlu2 %2211 }
 0x2db   : > { %v4658_v12 = vsel %vm3180_vm3, %v3157_v37, %v2212_v5  ;;  %v4664_v19 = vpop.permute.xlu0 %2046  ;;  %v4678_v5 = vld [vmem:[%s3884_s17 + $0x7a] sm:$0x3f] }
 0x2dc   : > { %5981 = vst [vmem:[#allocation54_spill] sm:$0xff] %v4658_v12 }
 0x2dd   : > { %v2328_v30 = vld.sshfl [vmem:[#allocation1 + $0x20] sm:$0xff pattern:$0x73625140] }
 0x2de   : > { %2426 = vrot.lane.b32.xlu2 %v2328_v30, %s3846_s22  ;;  %2333 = vst [vmem:[#allocation1 + $0x20] ss:$4 sm:$0xff] %v883_v9  ;;  %v4662_v30 = vpop.permute.xlu1 %2209  ;;  %v3114_v9 = vsel %vm3102_vm0, %v3920_v59, %v4256_v17 }
 0x2df   : > { %2334 = vst [vmem:[#allocation1 + $0x21] ss:$4 sm:$0xff] %v884_v32  ;;  %v4670_v32 = vld [vmem:[%s3884_s17 + $0x72] sm:$0xff]  ;;  %v3140_v37 = vsel %vm3128_vm1, %v3114_v9, %v4415_v45  ;;  %v863_v45 = vrot.slane %v4573_v6, 2 }
 0x2e0   : > { %2335 = vst [vmem:[#allocation1 + $0x22] ss:$4 sm:$0xff] %v885_v14  ;;  %v3103_v14 = vsel %vm3102_vm0, %v3897_v23, %v4247_v62  ;;  %v890_v17 = vrot.slane %v4670_v32, 6  ;;  %v891_v23 = vrot.slane %v4678_v5, 2 }
 0x2e1   : > { %v2206_v39 = vld.sshfl [vmem:[#allocation1] sm:$0xff pattern:$0x73625140]  ;;  %2336 = vst [vmem:[#allocation1 + $0x23] ss:$4 sm:$0xff] %v4655_v0  ;;  %v3129_v59 = vsel %vm3128_vm1, %v3103_v14, %v4401_v2  ;;  %v3111_v14 = vsel %vm3102_vm0, %v3922_v63, %v4243_v60 }
 0x2e2   : > { %2255 = vrot.lane.b32.xlu0 %v2206_v39, %s3845_s21  ;;  %2282 = vst [vmem:[#allocation1] ss:$4 sm:$0xff] %v3660_v8  ;;  %v889_v39 = vrot.slane %v4670_v32, 4  ;;  %v3166_v8 = vsel %vm3154_vm2, %v3140_v37, %v4568_v46  ;;  %v3155_v62 = vsel %vm3154_vm2, %v3129_v59, %v4497_v26  ;;  %v2230_v2 = vpop.permute.xlu2 %2229  ;;  %v4709_v37 = vld [vmem:[%s3884_s17 + $0x82] sm:$0xff]  ;;  %v3675_v59 = vld [vmem:[%s3884_s17 + $0x8a] sm:$0x3f]  ;;  %v3137_v63 = vsel %vm3128_vm1, %v3111_v14, %v4437_v35 }
 0x2e3   : > { %2284 = vst [vmem:[#allocation1 + $0x1] ss:$4 sm:$0xff] %v858_v57  ;;  %v864_v57 = vrot.slane %v4573_v6, 4  ;;  %v2208_v26 = vpop.permute.xlu0 %2207 }
 0x2e4   : > { %2286 = vst [vmem:[#allocation1 + $0x2] ss:$4 sm:$0xff] %v859_v21  ;;  %v865_v21 = vrot.slane %v4573_v6, 6  ;;  %v3110_v6 = vsel %vm3102_vm0, %v3906_v38, %v4281_v47  ;;  %v895_v38 = vrot.slane %v4709_v37, 6  ;;  %v896_v47 = vrot.slane %v3675_v59, 2 }
 0x2e5   : > { %2288 = vst [vmem:[#allocation1 + $0x3] ss:$4 sm:$0xff] %v860_v10  ;;  %v4697_v10 = vsel %vm3180_vm3, %v3166_v8, %v2230_v2  ;;  %v897_v8 = vrot.slane %v3675_v59, 4 }
 0x2e6   : > { %v4694_v46 = vpop.permute.xlu1 %2042 }
 0x2e8   : > { %v2338_v12 = vld.sshfl [vmem:[#allocation1 + $0x20] sm:$0xff pattern:$0x73625140] }
 0x2e9   : > { %2430 = vrot.lane.b32.xlu1 %v2338_v12, %s3846_s22  ;;  %2343 = vst [vmem:[#allocation1 + $0x20] ss:$4 sm:$0xff] %v889_v39  ;;  %v4700_v12 = vsel %vm3180_vm3, %v3155_v62, %v2208_v26  ;;  %v3112_v39 = vsel %vm3102_vm0, %v3914_v50, %v4283_v48  ;;  %v3163_v48 = vsel %vm3154_vm2, %v3137_v63, %v4591_v58 }
 0x2ea   : > { %2344 = vst [vmem:[#allocation1 + $0x21] ss:$4 sm:$0xff] %v890_v17  ;;  %v3136_v17 = vsel %vm3128_vm1, %v3110_v6, %v4361_v33  ;;  %v3138_v60 = vsel %vm3128_vm1, %v3112_v39, %v4413_v61  ;;  %v870_v61 = vrot.slane %v4588_v28, 6  ;;  %v2224_v62 = vpop.permute.xlu2 %2223  ;;  %v3109_v26 = vsel %vm3102_vm0, %v3916_v53, %v4262_v25  ;;  %v3667_v6 = vld [vmem:[%s3884_s17 + $0x4a] sm:$0x3f] }
 0x2eb   : > { %2345 = vst [vmem:[#allocation1 + $0x22] ss:$4 sm:$0xff] %v4678_v5  ;;  %v3162_v50 = vsel %vm3154_vm2, %v3136_v17, %v4539_v11  ;;  %v3164_v35 = vsel %vm3154_vm2, %v3138_v60, %v4518_v52  ;;  %v4737_v58 = vsel %vm3180_vm3, %v3163_v48, %v2224_v62  ;;  %v871_v52 = vrot.slane %v4602_v24, 2 }
 0x2ec   : > { %2346 = vst [vmem:[#allocation1 + $0x23] ss:$4 sm:$0xff] %v891_v23  ;;  %v2297_v9 = vld.sshfl [vmem:[#allocation1] sm:$0xff pattern:$0x73625140]  ;;  %v877_v63 = vrot.slane %v3667_v6, 4  ;;  %v3117_v60 = vsel %vm3102_vm0, %v3941_v34, %v4278_v36 }
 0x2ed   : > { %2299 = vst [vmem:[#allocation1] ss:$4 sm:$0xff] %v863_v45  ;;  %v2226_v45 = vpop.permute.xlu0 %2225 }
 0x2ee   : > { %2300 = vst [vmem:[#allocation1 + $0x1] ss:$4 sm:$0xff] %v864_v57  ;;  %v2222_v23 = vpop.permute.xlu1 %2221  ;;  %v4741_v2 = vsel %vm3180_vm3, %v3164_v35, %v2226_v45 }
 0x2ef   : > { %2301 = vst [vmem:[#allocation1 + $0x2] ss:$4 sm:$0xff] %v865_v21  ;;  %v4734_v11 = vsel %vm3180_vm3, %v3162_v50, %v2222_v23  ;;  %v3120_v21 = vsel %vm3102_vm0, %v3939_v29, %v4299_v7  ;;  %v3135_v29 = vsel %vm3128_vm1, %v3109_v26, %v4434_v27  ;;  %v4771_v27 = vld [vmem:[%s3884_s17 + $0xa2] sm:$0xff]  ;;  %v4790_v50 = vld [vmem:[%s3884_s17 + $0xaa] sm:$0x3f] }
 0x2f0   : > { %2302 = vst [vmem:[#allocation1 + $0x3] ss:$4 sm:$0xff] %v4581_v4  ;;  %v869_v4 = vrot.slane %v4588_v28, 4  ;;  %v3107_v28 = vsel %vm3102_vm0, %v3909_v43, %v4231_v42  ;;  %v3146_v43 = vsel %vm3128_vm1, %v3120_v21, %v4455_v15  ;;  %v875_v15 = vrot.slane %v4608_v40, 6  ;;  %v5983_v21 = vld [vmem:[#allocation11_spill] sm:$0xff] }
 0x2f1   : > { %2412 = vrot.lane.b32.xlu1 %v2297_v9, %s3846_s22  ;;  %v3677_v9 = vld [vmem:[%s3884_s17 + $0x9a] sm:$0x3f]  ;;  %v3133_v14 = vsel %vm3128_vm1, %v3107_v28, %v4380_v54  ;;  %v3172_v25 = vsel %vm3154_vm2, %v3146_v43, %v4610_v31  ;;  %v3161_v54 = vsel %vm3154_vm2, %v3135_v29, %v4534_v41  ;;  %v906_v34 = vrot.slane %v4790_v50, 2  ;;  %v5982_v28 = vld [vmem:[#allocation21_spill] sm:$0xff] }
 0x2f2   : > { %v901_v42 = vrot.slane %v3677_v9, 2  ;;  %v902_v7 = vrot.slane %v3677_v9, 4  ;;  %v3159_v53 = vsel %vm3154_vm2, %v3133_v14, %v4553_v22  ;;  %v876_v22 = vrot.slane %v3667_v6, 2  ;;  %v5985_v14 = vld [vmem:[#allocation5_spill] sm:$0xff] }
 0x2f3   : > { %v2348_v33 = vld.sshfl [vmem:[#allocation1 + $0x20] sm:$0xff pattern:$0x73625140]  ;;  %v3126_v26 = vsel %vm3102_vm0, %v5983_v21, %v5982_v28  ;;  %v5997_v21 = vld [vmem:[#allocation43_spill] sm:$0xff] }
 0x2f4   : > { %2434 = vrot.lane.b32.xlu0 %v2348_v33, %s3846_s22  ;;  %2353 = vst [vmem:[#allocation1 + $0x20] ss:$4 sm:$0xff] %v895_v38  ;;  %v3143_v33 = vsel %vm3128_vm1, %v3117_v60, %v4471_v13  ;;  %v3669_v13 = vld [vmem:[%s3884_s17 + $0x5a] sm:$0x3f]  ;;  %v4830_v29 = vld [vmem:[%s3884_s17 + $0xc2] sm:$0xff] }
 0x2f5   : > { %2354 = vst [vmem:[#allocation1 + $0x21] ss:$4 sm:$0xff] %v3675_v59  ;;  %v2242_v59 = vpop.permute.xlu2 %2241  ;;  %v2220_v41 = vpop.permute.xlu0 %2219  ;;  %v881_v23 = vrot.slane %v3669_v13, 2  ;;  %v882_v45 = vrot.slane %v3669_v13, 4 }
 0x2f6   : > { %2355 = vst [vmem:[#allocation1 + $0x22] ss:$4 sm:$0xff] %v896_v47  ;;  %v2216_v39 = vpop.permute.xlu1 %2215  ;;  %v4777_v17 = vsel %vm3180_vm3, %v3172_v25, %v2242_v59  ;;  %v4781_v38 = vsel %vm3180_vm3, %v3161_v54, %v2220_v41  ;;  %v3116_v47 = vsel %vm3102_vm0, %v3925_v3, %v4313_v49  ;;  %v907_v3 = vrot.slane %v4790_v50, 4  ;;  %v5990_v41 = vld [vmem:[#allocation48_spill] sm:$0xff] }
 0x2f7   : > { %2356 = vst [vmem:[#allocation1 + $0x23] ss:$4 sm:$0xff] %v897_v8  ;;  %v2307_v57 = vld.sshfl [vmem:[#allocation1] sm:$0xff pattern:$0x73625140]  ;;  %v4774_v31 = vsel %vm3180_vm3, %v3159_v53, %v2216_v39  ;;  %v3142_v48 = vsel %vm3128_vm1, %v3116_v47, %v4398_v56  ;;  %v4797_v8 = vld [vmem:[%s3884_s17 + $0xb2] sm:$0xff]  ;;  %v3169_v49 = vsel %vm3154_vm2, %v3143_v33, %v4625_v1 }
 0x2f8   : > { %2309 = vst [vmem:[#allocation1] ss:$4 sm:$0xff] %v869_v4  ;;  %v3168_v36 = vsel %vm3154_vm2, %v3142_v48, %v4570_v20  ;;  %v908_v56 = vrot.slane %v4797_v8, 2  ;;  %v5988_v53 = vld [vmem:[#allocation31_spill] sm:$0xff]  ;;  %v914_v39 = vrot.slane %v4830_v29, 4  ;;  %v886_v59 = vrot.slane %v4655_v0, 2 }
 0x2f9   : > { %2310 = vst [vmem:[#allocation1 + $0x1] ss:$4 sm:$0xff] %v870_v61 }
 0x2fa   : > { %2311 = vst [vmem:[#allocation1 + $0x2] ss:$4 sm:$0xff] %v4602_v24 }
 0x2fb   : > { %2312 = vst [vmem:[#allocation1 + $0x3] ss:$4 sm:$0xff] %v871_v52  ;;  %v3118_v52 = vsel %vm3102_vm0, %v3933_v16, %v4315_v51  ;;  %v5987_v51 = vld [vmem:[#allocation39_spill] sm:$0xff] }
 0x2fc   : > { %2416 = vrot.lane.b32.xlu0 %v2307_v57, %s3846_s22  ;;  %v4821_v57 = vld [vmem:[%s3884_s17 + $0xba] sm:$0x3f] }
 0x2fd   : > { %v912_v16 = vrot.slane %v4821_v57, 4  ;;  %v2238_v60 = vpop.permute.xlu0 %2237 }
 0x2fe   : > { %v2358_v24 = vld.sshfl [vmem:[#allocation1 + $0x20] sm:$0xff pattern:$0x73625140]  ;;  %v2234_v4 = vpop.permute.xlu1 %2233 }
 0x2ff   : > { %2438 = vrot.lane.b32.xlu2 %v2358_v24, %s3846_s22  ;;  %2363 = vst [vmem:[#allocation1 + $0x20] ss:$4 sm:$0xff] %v3677_v9  ;;  %v4811_v20 = vsel %vm3180_vm3, %v3168_v36, %v2234_v4  ;;  %v5984_v9 = vld [vmem:[#allocation18_spill] sm:$0xff]  ;;  %v913_v24 = vrot.slane %v4830_v29, 2 }
 0x300   : > { %2364 = vst [vmem:[#allocation1 + $0x21] ss:$4 sm:$0xff] %v901_v42  ;;  %v3113_v43 = vsel %vm3102_vm0, %v5985_v14, %v5984_v9  ;;  %v5986_v42 = vld [vmem:[#allocation34_spill] sm:$0xff] }
 0x301   : > { %2365 = vst [vmem:[#allocation1 + $0x22] ss:$4 sm:$0xff] %v902_v7  ;;  %v3144_v7 = vsel %vm3128_vm1, %v3118_v52, %v5986_v42  ;;  %v3139_v25 = vsel %vm3128_vm1, %v3113_v43, %v5988_v53  ;;  %v5994_v4 = vld [vmem:[#allocation6_spill] sm:$0xff]  ;;  %v5996_v52 = vld [vmem:[#allocation36_spill] sm:$0xff] }
 0x302   : > { %2366 = vst [vmem:[#allocation1 + $0x23] ss:$4 sm:$0xff] %v4771_v27  ;;  %v2317_v40 = vld.sshfl [vmem:[#allocation1] sm:$0xff pattern:$0x73625140]  ;;  %v5998_v42 = vld [vmem:[#allocation20_spill] sm:$0xff] }
 0x303   : > { %2319 = vst [vmem:[#allocation1] ss:$4 sm:$0xff] %v875_v15 }
 0x304   : > { %2320 = vst [vmem:[#allocation1 + $0x1] ss:$4 sm:$0xff] %v3667_v6  ;;  %v5989_v6 = vld [vmem:[#allocation45_spill] sm:$0xff] }
 0x305   : > { %2321 = vst [vmem:[#allocation1 + $0x2] ss:$4 sm:$0xff] %v876_v22  ;;  %v3170_v54 = vsel %vm3154_vm2, %v3144_v7, %v5989_v6  ;;  %v5999_v7 = vld [vmem:[#allocation12_spill] sm:$0xff] }
 0x306   : > { %2322 = vst [vmem:[#allocation1 + $0x3] ss:$4 sm:$0xff] %v877_v63  ;;  %v2236_v61 = vpop.permute.xlu2 %2235  ;;  %v887_v63 = vrot.slane %v4655_v0, 4  ;;  %v4853_v48 = vsel %vm3180_vm3, %v3170_v54, %v2238_v60 }
 0x307   : > { %2420 = vrot.lane.b32.xlu2 %v2317_v40, %s3846_s22  ;;  %v4814_v1 = vsel %vm3180_vm3, %v3169_v49, %v2236_v61  ;;  %v3165_v40 = vsel %vm3154_vm2, %v3139_v25, %v5990_v41  ;;  %v888_v49 = vrot.slane %v4670_v32, 2  ;;  %v6002_v25 = vld [vmem:[#allocation46_spill] sm:$0xff] }
 0x308   : > { %v2228_v47 = vpop.permute.xlu1 %2227 }
 0x309   : > { %v2368_v35 = vld.sshfl [vmem:[#allocation1 + $0x20] sm:$0xff pattern:$0x73625140]  ;;  %v4856_v33 = vsel %vm3180_vm3, %v3165_v40, %v2228_v47  ;;  %v6003_v40 = vld [vmem:[#allocation32_spill] sm:$0xff] }
 0x30a   : > { %2442 = vrot.lane.b32.xlu1 %v2368_v35, %s3846_s22  ;;  %2373 = vst [vmem:[#allocation1 + $0x20] ss:$4 sm:$0xff] %v906_v34  ;;  %v5991_v34 = vld [vmem:[#allocation16_spill] sm:$0xff]  ;;  %v4902_v47 = vld [vmem:[%s3884_s17 + $0xe2] sm:$0xff] }
 0x30b   : > { %2374 = vst [vmem:[#allocation1 + $0x21] ss:$4 sm:$0xff] %v907_v3  ;;  %v5992_v3 = vld [vmem:[#allocation2_spill] sm:$0xff] }
 0x30c   : > { %2375 = vst [vmem:[#allocation1 + $0x22] ss:$4 sm:$0xff] %v4797_v8  ;;  %v3104_v36 = vsel %vm3102_vm0, %v5992_v3, %v5991_v34 }
 0x30d   : > { %2376 = vst [vmem:[#allocation1 + $0x23] ss:$4 sm:$0xff] %v908_v56  ;;  %v2327_v62 = vld.sshfl [vmem:[#allocation1] sm:$0xff pattern:$0x73625140]  ;;  %v3684_v56 = vld [vmem:[%s3884_s17 + $0xd2] sm:$0xff] }
 0x30e   : > { %2332 = vst [vmem:[#allocation1 + $0x3] ss:$4 sm:$0xff] %v4638_v55  ;;  %v3152_v55 = vsel %vm3128_vm1, %v3126_v26, %v5987_v51  ;;  %v919_v9 = vrot.slane %v3684_v56, 4  ;;  %v920_v43 = vrot.slane %v3684_v56, 6  ;;  %v892_v51 = vrot.slane %v4678_v5, 4 }
 0x30f   : > { %2329 = vst [vmem:[#allocation1] ss:$4 sm:$0xff] %v3669_v13  ;;  %v3178_v22 = vsel %vm3154_vm2, %v3152_v55, %v4640_v18  ;;  %v2254_v18 = vpop.permute.xlu2 %2253  ;;  %v5993_v13 = vld [vmem:[#allocation19_spill] sm:$0xff]  ;;  %v893_v5 = vrot.slane %v4709_v37, 2 }
 0x310   : > { %2330 = vst [vmem:[#allocation1 + $0x1] ss:$4 sm:$0xff] %v881_v23  ;;  %v4863_v35 = vsel %vm3180_vm3, %v3178_v22, %v2254_v18  ;;  %v3115_v61 = vsel %vm3102_vm0, %v5994_v4, %v5993_v13  ;;  %v5995_v23 = vld [vmem:[#allocation24_spill] sm:$0xff]  ;;  %v6001_v55 = vld [vmem:[#allocation7_spill] sm:$0xff]  ;;  %v894_v22 = vrot.slane %v4709_v37, 4  ;;  %v6005_v18 = vld [vmem:[#allocation50_spill] sm:$0xff] }
 0x311   : > { %2331 = vst [vmem:[#allocation1 + $0x2] ss:$4 sm:$0xff] %v882_v45  ;;  %v918_v45 = vrot.slane %v3684_v56, 2  ;;  %v3141_v28 = vsel %vm3128_vm1, %v3115_v61, %v5996_v52  ;;  %v3676_v4 = vld [vmem:[%s3884_s17 + $0x92] sm:$0xff]  ;;  %v2246_v61 = vpop.permute.xlu1 %2245  ;;  %v6008_v52 = vld [vmem:[#allocation22_spill] sm:$0xff] }
 0x312   : > { %2424 = vrot.lane.b32.xlu1 %v2327_v62, %s3846_s22  ;;  %v3130_v62 = vsel %vm3128_vm1, %v3104_v36, %v5995_v23  ;;  %v923_v36 = vrot.slane %v4902_v47, 2 }
 0x313   : > { %v3156_v26 = vsel %vm3154_vm2, %v3130_v62, %v5997_v21  ;;  %v2232_v54 = vpop.permute.xlu0 %2231 }
 0x314   : > { %v2378_v15 = vld.sshfl [vmem:[#allocation1 + $0x20] sm:$0xff pattern:$0x73625140]  ;;  %v3182_v6 = vsel %vm3180_vm3, %v3156_v26, %v4662_v30  ;;  %v4928_v26 = vld [vmem:[%s3884_s17 + $0xea] sm:$0x3f] }
 0x315   : > { %2446 = vrot.lane.b32.xlu0 %v2378_v15, %s3846_s22  ;;  %2383 = vst [vmem:[#allocation1 + $0x20] ss:$4 sm:$0xff] %v912_v16  ;;  %v3123_v16 = vsel %vm3102_vm0, %v5999_v7, %v5998_v42  ;;  %v899_v42 = vrot.slane %v3676_v4, 4  ;;  %v6011_v7 = vld [vmem:[#allocation33_spill] sm:$0xff] }
 0x316   : > { %2384 = vst [vmem:[#allocation1 + $0x21] ss:$4 sm:$0xff] %v4830_v29 }
 0x317   : > { %2385 = vst [vmem:[#allocation1 + $0x22] ss:$4 sm:$0xff] %v913_v24  ;;  %v3167_v24 = vsel %vm3154_vm2, %v3141_v28, %v6002_v25  ;;  %v2415_v15 = vpop.permute.xlu2 %2414  ;;  %v6009_v28 = vld [vmem:[#allocation8_spill] sm:$0xff]  ;;  %v3689_v25 = vld [vmem:[%s3884_s17 + $0x28] sm:$0x3f] }
 0x318   : > { %2386 = vst [vmem:[#allocation1 + $0x23] ss:$4 sm:$0xff] %v914_v39  ;;  %v2337_v0 = vld.sshfl [vmem:[#allocation1] sm:$0xff pattern:$0x73625140]  ;;  %v4891_v39 = vsel %vm3180_vm3, %v3167_v24, %v2232_v54  ;;  %v3119_v21 = vsel %vm3102_vm0, %v6009_v28, %v6008_v52 }
 0x319   : > { %2339 = vst [vmem:[#allocation1] ss:$4 sm:$0xff] %v886_v59  ;;  %v4894_v59 = vsel %vm3206_vm4, %v3182_v6, %v2415_v15  ;;  %v6013_v15 = vld [vmem:[#allocation17_spill] sm:$0xff] }
 0x31a   : > { %2340 = vst [vmem:[#allocation1 + $0x1] ss:$4 sm:$0xff] %v887_v63  ;;  %v6004_v63 = vld [vmem:[#allocation41_spill] sm:$0xff] }
 0x31b   : > { %2341 = vst [vmem:[#allocation1 + $0x2] ss:$4 sm:$0xff] %v4670_v32  ;;  %v6000_v32 = vld [vmem:[#allocation25_spill] sm:$0xff]  ;;  %v3149_v60 = vsel %vm3128_vm1, %v3123_v16, %v6004_v63  ;;  %v3145_v16 = vsel %vm3128_vm1, %v3119_v21, %v6011_v7  ;;  %v2250_v6 = vpop.permute.xlu0 %2249  ;;  %v989_v63 = vrot.slane %v3689_v25, 4  ;;  %v4972_v21 = vld [vmem:[%s3884_s17 + $0x38] sm:$0x3f] }
 0x31c   : > { %2342 = vst [vmem:[#allocation1 + $0x3] ss:$4 sm:$0xff] %v888_v49  ;;  %v3122_v53 = vsel %vm3102_vm0, %v6001_v55, %v6000_v32  ;;  %v3175_v3 = vsel %vm3154_vm2, %v3149_v60, %v4694_v46  ;;  %v924_v49 = vrot.slane %v4902_v47, 4  ;;  %v900_v32 = vrot.slane %v3676_v4, 6  ;;  %v6012_v55 = vld [vmem:[#allocation47_spill] sm:$0xff]  ;;  %v6016_v60 = vld [vmem:[#allocation10_spill] sm:$0xff] }
 0x31d   : > { %2428 = vrot.lane.b32.xlu0 %v2337_v0, %s3846_s22  ;;  %v3148_v30 = vsel %vm3128_vm1, %v3122_v53, %v6003_v40  ;;  %v6006_v0 = vld [vmem:[#allocation26_spill] sm:$0xff]  ;;  %v3171_v24 = vsel %vm3154_vm2, %v3145_v16, %v4627_v44  ;;  %v6015_v44 = vld [vmem:[#allocation23_spill] sm:$0xff] }
 0x31e   : > { %v3174_v34 = vsel %vm3154_vm2, %v3148_v30, %v6005_v18  ;;  %v988_v30 = vrot.slane %v3689_v25, 2  ;;  %v3121_v18 = vsel %vm3102_vm0, %v6016_v60, %v6015_v44  ;;  %v911_v44 = vrot.slane %v4821_v57, 2 }
 0x31f   : > { %v2388_v14 = vld.sshfl [vmem:[#allocation1 + $0x20] sm:$0xff pattern:$0x73625140] }
 0x320   : > { %2450 = vrot.lane.b32.xlu2 %v2388_v14, %s3846_s22  ;;  %2393 = vst [vmem:[#allocation1 + $0x20] ss:$4 sm:$0xff] %v3684_v56  ;;  %v6007_v56 = vld [vmem:[#allocation9_spill] sm:$0xff] }
 0x321   : > { %2394 = vst [vmem:[#allocation1 + $0x21] ss:$4 sm:$0xff] %v918_v45  ;;  %v3124_v13 = vsel %vm3102_vm0, %v6007_v56, %v6006_v0  ;;  %v4918_v45 = vsel %vm3180_vm3, %v3174_v34, %v2246_v61  ;;  %v6017_v34 = vld [vmem:[#allocation29_spill] sm:$0xff]  ;;  %v4958_v0 = vld [vmem:[%s3884_s17 + $0x30] sm:$0xff]  ;;  %v904_v56 = vrot.slane %v4771_v27, 4 }
 0x322   : > { %2395 = vst [vmem:[#allocation1 + $0x22] ss:$4 sm:$0xff] %v919_v9  ;;  %v6010_v9 = vld [vmem:[#allocation38_spill] sm:$0xff] }
 0x323   : > { %2396 = vst [vmem:[#allocation1 + $0x23] ss:$4 sm:$0xff] %v920_v43  ;;  %v2347_v41 = vld.sshfl [vmem:[#allocation1] sm:$0xff pattern:$0x73625140]  ;;  %v3150_v14 = vsel %vm3128_vm1, %v3124_v13, %v6010_v9  ;;  %v898_v43 = vrot.slane %v3676_v4, 2 }
 0x324   : > { %2349 = vst [vmem:[#allocation1] ss:$4 sm:$0xff] %v892_v51  ;;  %v3176_v53 = vsel %vm3154_vm2, %v3150_v14, %v6012_v55  ;;  %v6018_v13 = vld [vmem:[#allocation37_spill] sm:$0xff]  ;;  %v6022_v55 = vld [vmem:[#allocation15_spill] sm:$0xff] }
 0x325   : > { %2350 = vst [vmem:[#allocation1 + $0x1] ss:$4 sm:$0xff] %v4709_v37  ;;  %v925_v37 = vrot.slane %v4902_v47, 6  ;;  %v6020_v9 = vld [vmem:[#allocation49_spill] sm:$0xff] }
 0x326   : > { %2351 = vst [vmem:[#allocation1 + $0x2] ss:$4 sm:$0xff] %v893_v5  ;;  %v6014_v5 = vld [vmem:[#allocation3_spill] sm:$0xff] }
 0x327   : > { %2352 = vst [vmem:[#allocation1 + $0x3] ss:$4 sm:$0xff] %v894_v22  ;;  %v3106_v22 = vsel %vm3102_vm0, %v6014_v5, %v6013_v15  ;;  %v6024_v15 = vld [vmem:[#allocation30_spill] sm:$0xff] }
 0x328   : > { %2432 = vrot.lane.b32.xlu2 %v2347_v41, %s3846_s22  ;;  %v2248_v23 = vpop.permute.xlu2 %2247  ;;  %v4944_v41 = vsel %vm3180_vm3, %v3176_v53, %v2250_v6  ;;  %v6023_v53 = vld [vmem:[#allocation4_spill] sm:$0xff] }
 0x329   : > { %v4921_v46 = vsel %vm3180_vm3, %v3175_v3, %v2248_v23  ;;  %v2240_v54 = vpop.permute.xlu1 %2239  ;;  %v3132_v3 = vsel %vm3128_vm1, %v3106_v22, %v6017_v34  ;;  %v905_v23 = vrot.slane %v4771_v27, 6  ;;  %v910_v22 = vrot.slane %v4797_v8, 6  ;;  %v6026_v34 = vld [vmem:[#allocation51_spill] sm:$0xff] }
 0x32a   : > { %v2398_v62 = vld.sshfl [vmem:[#allocation1 + $0x20] sm:$0xff pattern:$0x73625140]  ;;  %v4947_v40 = vsel %vm3180_vm3, %v3171_v24, %v2240_v54  ;;  %v994_v24 = vrot.slane %v4972_v21, 4 }
 0x32b   : > { %2454 = vrot.lane.b32.xlu1 %v2398_v62, %s3846_s22  ;;  %2403 = vst [vmem:[#allocation1 + $0x20] ss:$4 sm:$0xff] %v923_v36 }
 0x32c   : > { %2404 = vst [vmem:[#allocation1 + $0x21] ss:$4 sm:$0xff] %v924_v49  ;;  %v903_v49 = vrot.slane %v4771_v27, 2 }
 0x32d   : > { %2405 = vst [vmem:[#allocation1 + $0x22] ss:$4 sm:$0xff] %v925_v37  ;;  %v3158_v37 = vsel %vm3154_vm2, %v3132_v3, %v6018_v13  ;;  %v6027_v13 = vld [vmem:[#allocation27_spill] sm:$0xff] }
 0x32e   : > { %2406 = vst [vmem:[#allocation1 + $0x23] ss:$4 sm:$0xff] %v4928_v26  ;;  %v2357_v51 = vld.sshfl [vmem:[#allocation1] sm:$0xff pattern:$0x73625140] }
 0x32f   : > { %2359 = vst [vmem:[#allocation1] ss:$4 sm:$0xff] %v3676_v4  ;;  %v6019_v4 = vld [vmem:[#allocation40_spill] sm:$0xff] }
 0x330   : > { %2360 = vst [vmem:[#allocation1 + $0x1] ss:$4 sm:$0xff] %v898_v43  ;;  %v3147_v61 = vsel %vm3128_vm1, %v3121_v18, %v6019_v4  ;;  %v6021_v43 = vld [vmem:[#allocation53_spill] sm:$0xff]  ;;  %v5005_v18 = vld [vmem:[%s3884_s17 + $0x48] sm:$0x3f] }
 0x331   : > { %2361 = vst [vmem:[#allocation1 + $0x2] ss:$4 sm:$0xff] %v899_v42  ;;  %v3173_v14 = vsel %vm3154_vm2, %v3147_v61, %v6020_v9  ;;  %v3184_v42 = vsel %vm3180_vm3, %v3158_v37, %v6021_v43  ;;  %v6028_v37 = vld [vmem:[#allocation13_spill] sm:$0xff] }
 0x332   : > { %2362 = vst [vmem:[#allocation1 + $0x3] ss:$4 sm:$0xff] %v900_v32  ;;  %v993_v32 = vrot.slane %v4972_v21, 2  ;;  %v3125_v4 = vsel %vm3102_vm0, %v6028_v37, %v6027_v13  ;;  %v5058_v37 = vld [vmem:[%s3884_s17 + $0x78] sm:$0x3f] }
 0x333   : > { %2436 = vrot.lane.b32.xlu1 %v2357_v51, %s3846_s22 }
 0x335   : > { %v2408_v36 = vld.sshfl [vmem:[#allocation1 + $0x20] sm:$0xff pattern:$0x73625140]  ;;  %v2244_v7 = vpop.permute.xlu0 %2243 }
 0x336   : > { %2458 = vrot.lane.b32.xlu0 %v2408_v36, %s3846_s22  ;;  %2495 = vst [vmem:[#allocation1 + $0x20] ss:$4 sm:$0xff] %v3689_v25  ;;  %v4982_v51 = vsel %vm3180_vm3, %v3173_v14, %v2244_v7  ;;  %v3108_v25 = vsel %vm3102_vm0, %v6023_v53, %v6022_v55  ;;  %v915_v14 = vrot.slane %v4830_v29, 6  ;;  %v3696_v29 = vld [vmem:[%s3884_s17 + $0x60] sm:$0xff] }
 0x337   : > { %2497 = vst [vmem:[#allocation1 + $0x21] ss:$4 sm:$0xff] %v988_v30  ;;  %v3134_v5 = vsel %vm3128_vm1, %v3108_v25, %v6024_v15  ;;  %v6025_v30 = vld [vmem:[#allocation44_spill] sm:$0xff]  ;;  %v1005_v53 = vrot.slane %v3696_v29, 2  ;;  %v1007_v25 = vrot.slane %v3696_v29, 6 }
 0x338   : > { %2499 = vst [vmem:[#allocation1 + $0x22] ss:$4 sm:$0xff] %v989_v63  ;;  %v2427_v62 = vpop.permute.xlu2 %2426  ;;  %v3160_v63 = vsel %vm3154_vm2, %v3134_v5, %v6025_v30  ;;  %v5046_v30 = vld [vmem:[%s3884_s17 + $0x70] sm:$0xff] }
 0x339   : > { %2501 = vst [vmem:[#allocation1 + $0x23] ss:$4 sm:$0xff] %v4958_v0  ;;  %v2367_v52 = vld.sshfl [vmem:[#allocation1] sm:$0xff pattern:$0x73625140]  ;;  %v4969_v28 = vsel %vm3206_vm4, %v4734_v11, %v2427_v62  ;;  %v3186_v3 = vsel %vm3180_vm3, %v3160_v63, %v6026_v34  ;;  %v6030_v63 = vld [vmem:[#allocation28_spill] sm:$0xff] }
 0x33a   : > { %2369 = vst [vmem:[#allocation1] ss:$4 sm:$0xff] %v903_v49  ;;  %v2419_v27 = vpop.permute.xlu1 %2418  ;;  %v4986_v11 = vld [vmem:[%s3884_s17 + $0x40] sm:$0xff]  ;;  %v999_v49 = vrot.slane %v5005_v18, 4  ;;  %v3683_v62 = vld [vmem:[%s3884_s17 + $0xca] sm:$0x3f] }
 0x33b   : > { %2370 = vst [vmem:[#allocation1 + $0x1] ss:$4 sm:$0xff] %v904_v56  ;;  %v4979_v16 = vsel %vm3206_vm4, %v3184_v42, %v2419_v27  ;;  %v995_v54 = vrot.slane %v4986_v11, 2  ;;  %v916_v43 = vrot.slane %v3683_v62, 2  ;;  %v917_v7 = vrot.slane %v3683_v62, 4 }
 0x33c   : > { %2371 = vst [vmem:[#allocation1 + $0x2] ss:$4 sm:$0xff] %v905_v23  ;;  %v1010_v34 = vrot.slane %v5046_v30, 2 }
 0x33d   : > { %2372 = vst [vmem:[#allocation1 + $0x3] ss:$4 sm:$0xff] %v4790_v50  ;;  %v909_v50 = vrot.slane %v4797_v8, 4  ;;  %v5011_v8 = vld [vmem:[%s3884_s17 + $0x50] sm:$0xff] }
 0x33e   : > { %2440 = vrot.lane.b32.xlu0 %v2367_v52, %s3846_s22  ;;  %v1000_v61 = vrot.slane %v5011_v8, 2  ;;  %v6029_v52 = vld [vmem:[#allocation35_spill] sm:$0xff] }
 0x33f   : > { %v3151_v9 = vsel %vm3128_vm1, %v3125_v4, %v6029_v52  ;;  %v6033_v4 = vld [vmem:[#allocation52_spill] sm:$0xff] }
 0x340   : > { %v2503_v6 = vld.sshfl [vmem:[#allocation1 + $0x20] sm:$0xff pattern:$0x73625140]  ;;  %v3177_v42 = vsel %vm3154_vm2, %v3151_v9, %v4664_v19  ;;  %v1006_v19 = vrot.slane %v3696_v29, 4 }
 0x341   : > { %2619 = vrot.lane.b32.xlu2 %v2503_v6, %s3847_s23  ;;  %2508 = vst [vmem:[#allocation1 + $0x20] ss:$4 sm:$0xff] %v993_v32  ;;  %v3685_v6 = vld [vmem:[%s3884_s17 + $0xda] sm:$0x3f] }
 0x342   : > { %2509 = vst [vmem:[#allocation1 + $0x21] ss:$4 sm:$0xff] %v994_v24 }
 0x343   : > { %2510 = vst [vmem:[#allocation1 + $0x22] ss:$4 sm:$0xff] %v4986_v11 }
 0x344   : > { %v2377_v60 = vld.sshfl [vmem:[#allocation1] sm:$0xff pattern:$0x73625140]  ;;  %2511 = vst [vmem:[#allocation1 + $0x23] ss:$4 sm:$0xff] %v995_v54  ;;  %v921_v54 = vrot.slane %v3685_v6, 2 }
 0x345   : > { %2379 = vst [vmem:[#allocation1] ss:$4 sm:$0xff] %v909_v50  ;;  %v2423_v36 = vpop.permute.xlu0 %2422  ;;  %v922_v50 = vrot.slane %v3685_v6, 4 }
 0x346   : > { %2380 = vst [vmem:[#allocation1 + $0x1] ss:$4 sm:$0xff] %v910_v22  ;;  %v5015_v56 = vsel %vm3206_vm4, %v3186_v3, %v2423_v36  ;;  %v1011_v3 = vrot.slane %v5046_v30, 4  ;;  %v6032_v36 = vld [vmem:[#allocation42_spill] sm:$0xff] }
 0x347   : > { %2381 = vst [vmem:[#allocation1 + $0x2] ss:$4 sm:$0xff] %v4821_v57  ;;  %v1001_v57 = vrot.slane %v5011_v8, 4 }
 0x348   : > { %2382 = vst [vmem:[#allocation1 + $0x3] ss:$4 sm:$0xff] %v911_v44  ;;  %v6031_v44 = vld [vmem:[#allocation14_spill] sm:$0xff] }
 0x349   : > { %2444 = vrot.lane.b32.xlu2 %v2377_v60, %s3846_s22  ;;  %v3127_v60 = vsel %vm3102_vm0, %v6031_v44, %v6030_v63  ;;  %v5099_v63 = vld [vmem:[%s3884_s17 + $0x90] sm:$0xff]  ;;  %v3703_v44 = vld [vmem:[%s3884_s17 + $0x98] sm:$0x3f] }
 0x34b   : > { %v2513_v23 = vld.sshfl [vmem:[#allocation1 + $0x20] sm:$0xff pattern:$0x73625140]  ;;  %v2252_v32 = vpop.permute.xlu1 %2251 }
 0x34c   : > { %2518 = vst [vmem:[#allocation1 + $0x20] ss:$4 sm:$0xff] %v999_v49  ;;  %v5032_v55 = vsel %vm3180_vm3, %v3177_v42, %v2252_v32  ;;  %v1012_v49 = vrot.slane %v5046_v30, 6  ;;  %v5078_v42 = vld [vmem:[%s3884_s17 + $0x80] sm:$0xff] }
 0x34d   : > { %2519 = vst [vmem:[#allocation1 + $0x21] ss:$4 sm:$0xff] %v5011_v8  ;;  %v3688_v32 = vld [vmem:[%s3884_s17 + $0x20] sm:$0xff] }
 0x34e   : > { %2520 = vst [vmem:[#allocation1 + $0x22] ss:$4 sm:$0xff] %v1000_v61 }
 0x34f   : > { %v2387_v27 = vld.sshfl [vmem:[#allocation1] sm:$0xff pattern:$0x73625140]  ;;  %2521 = vst [vmem:[#allocation1 + $0x23] ss:$4 sm:$0xff] %v1001_v57 }
 0x350   : > { %2448 = vrot.lane.b32.xlu1 %v2387_v27, %s3846_s22  ;;  %2389 = vst [vmem:[#allocation1] ss:$4 sm:$0xff] %v915_v14  ;;  %v5081_v27 = vld [vmem:[%s3884_s17 + $0x88] sm:$0x3f] }
 0x351   : > { %2623 = vrot.lane.b32.xlu2 %v2513_v23, %s3847_s23  ;;  %2390 = vst [vmem:[#allocation1 + $0x1] ss:$4 sm:$0xff] %v3683_v62  ;;  %v927_v23 = vrot.slane %v4928_v26, 4 }
 0x352   : > { %2391 = vst [vmem:[#allocation1 + $0x2] ss:$4 sm:$0xff] %v916_v43 }
 0x353   : > { %2392 = vst [vmem:[#allocation1 + $0x3] ss:$4 sm:$0xff] %v917_v7  ;;  %v1017_v7 = vrot.slane %v5078_v42, 6 }
 0x354   : > { %v2256_v57 = vpop.permute.xlu0 %2255 }
 0x356   : > { %v5036_v24 = vld.sshfl [vmem:[#allocation1 + $0x20] sm:$0xff pattern:$0x73625140] }
 0x357   : > { %2528 = vst [vmem:[#allocation1 + $0x20] ss:$4 sm:$0xff] %v3696_v29 }
 0x358   : > { %2529 = vst [vmem:[#allocation1 + $0x21] ss:$4 sm:$0xff] %v1005_v53  ;;  %v1018_v53 = vrot.slane %v5081_v27, 2 }
 0x359   : > { %2530 = vst [vmem:[#allocation1 + $0x22] ss:$4 sm:$0xff] %v1006_v19  ;;  %v2439_v15 = vpop.permute.xlu2 %2438  ;;  %v985_v19 = vrot.slane %v3688_v32, 2 }
 0x35a   : > { %v2397_v5 = vld.sshfl [vmem:[#allocation1] sm:$0xff pattern:$0x73625140]  ;;  %2531 = vst [vmem:[#allocation1 + $0x23] ss:$4 sm:$0xff] %v1007_v25  ;;  %v5041_v22 = vsel %vm3206_vm4, %v4811_v20, %v2439_v15  ;;  %v3153_v20 = vsel %vm3128_vm1, %v3127_v60, %v6032_v36  ;;  %v1022_v60 = vrot.slane %v5099_v63, 6 }
 0x35b   : > { %2452 = vrot.lane.b32.xlu0 %v2397_v5, %s3846_s22  ;;  %2402 = vst [vmem:[#allocation1 + $0x3] ss:$4 sm:$0xff] %v4902_v47  ;;  %v926_v47 = vrot.slane %v4928_v26, 2  ;;  %v3179_v61 = vsel %vm3154_vm2, %v3153_v20, %v6033_v4  ;;  %v2431_v62 = vpop.permute.xlu1 %2430  ;;  %v990_v36 = vrot.slane %v4958_v0, 2 }
 0x35c   : > { %2399 = vst [vmem:[#allocation1] ss:$4 sm:$0xff] %v3685_v6  ;;  %v5066_v52 = vsel %vm3206_vm4, %v4741_v2, %v2431_v62  ;;  %v5069_v9 = vsel %vm3180_vm3, %v3179_v61, %v2256_v57  ;;  %v1016_v2 = vrot.slane %v5078_v42, 4  ;;  %v3705_v62 = vld [vmem:[%s3884_s17 + $0xa8] sm:$0x3f] }
 0x35d   : > { %2400 = vst [vmem:[#allocation1 + $0x1] ss:$4 sm:$0xff] %v921_v54  ;;  %v986_v54 = vrot.slane %v3688_v32, 4  ;;  %v1029_v57 = vrot.slane %v3705_v62, 4 }
 0x35e   : > { %2401 = vst [vmem:[#allocation1 + $0x2] ss:$4 sm:$0xff] %v922_v50  ;;  %v987_v50 = vrot.slane %v3688_v32, 6 }
 0x361   : > { %v2533_v13 = vld.sshfl [vmem:[#allocation1 + $0x20] sm:$0xff pattern:$0x73625140]  ;;  %v2421_v14 = vpop.permute.xlu2 %2420 }
 0x362   : > { %2538 = vst [vmem:[#allocation1 + $0x20] ss:$4 sm:$0xff] %v1010_v34  ;;  %v5074_v26 = vsel %vm3206_vm4, %v4774_v31, %v2421_v14  ;;  %v1023_v34 = vrot.slane %v3703_v44, 2 }
 0x363   : > { %2631 = vrot.lane.b32.xlu0 %v2533_v13, %s3847_s23  ;;  %2539 = vst [vmem:[#allocation1 + $0x21] ss:$4 sm:$0xff] %v1011_v3  ;;  %v2413_v6 = vpop.permute.xlu1 %2412  ;;  %v1024_v3 = vrot.slane %v3703_v44, 4  ;;  %v6034_v13 = vld [vmem:[#allocation54_spill] sm:$0xff] }
 0x364   : > { %2540 = vst [vmem:[#allocation1 + $0x22] ss:$4 sm:$0xff] %v1012_v49  ;;  %v5096_v5 = vsel %vm3206_vm4, %v4700_v12, %v2413_v6  ;;  %v991_v12 = vrot.slane %v4958_v0, 4  ;;  %v992_v49 = vrot.slane %v4958_v0, 6  ;;  %v1028_v0 = vrot.slane %v3705_v62, 2 }
 0x365   : > { %v2407_v43 = vld.sshfl [vmem:[#allocation1] sm:$0xff pattern:$0x73625140]  ;;  %2541 = vst [vmem:[#allocation1 + $0x23] ss:$4 sm:$0xff] %v5058_v37 }
 0x366   : > { %2456 = vrot.lane.b32.xlu2 %v2407_v43, %s3846_s22  ;;  %2409 = vst [vmem:[#allocation1] ss:$4 sm:$0xff] %v926_v47  ;;  %v2435_v25 = vpop.permute.xlu0 %2434  ;;  %v996_v43 = vrot.slane %v4986_v11, 4 }
 0x367   : > { %2410 = vst [vmem:[#allocation1 + $0x1] ss:$4 sm:$0xff] %v927_v23  ;;  %v5092_v15 = vsel %vm3206_vm4, %v4697_v10, %v2435_v25 }
 0x36c   : > { %v2543_v29 = vld.sshfl [vmem:[#allocation1 + $0x20] sm:$0xff pattern:$0x73625140] }
 0x36d   : > { %2635 = vrot.lane.b32.xlu0 %v2543_v29, %s3847_s23  ;;  %2548 = vst [vmem:[#allocation1 + $0x20] ss:$4 sm:$0xff] %v1016_v2  ;;  %v5121_v2 = vld [vmem:[%s3884_s17 + $0xb0] sm:$0xff] }
 0x36e   : > { %v2411_v31 = vld.sshfl [vmem:[#allocation1] sm:$0xff pattern:$0x73625140]  ;;  %2549 = vst [vmem:[#allocation1 + $0x21] ss:$4 sm:$0xff] %v1017_v7  ;;  %v2417_v20 = vpop.permute.xlu0 %2416 }
 0x36f   : > { %2460 = vrot.lane.b32.xlu1 %v2411_v31, %s3846_s22  ;;  %2550 = vst [vmem:[#allocation1 + $0x22] ss:$4 sm:$0xff] %v5081_v27  ;;  %v5110_v47 = vsel %vm3206_vm4, %v6034_v13, %v2417_v20  ;;  %v998_v31 = vrot.slane %v5005_v18, 2  ;;  %v5162_v20 = vld [vmem:[%s3884_s17 + $0xd0] sm:$0xff] }
 0x370   : > { %2551 = vst [vmem:[#allocation1 + $0x23] ss:$4 sm:$0xff] %v1018_v53 }
 0x371   : > { %2487 = vst [vmem:[#allocation1] ss:$4 sm:$0xff] %v3688_v32 }
 0x372   : > { %2489 = vst [vmem:[#allocation1 + $0x1] ss:$4 sm:$0xff] %v985_v19  ;;  %v5135_v19 = vld [vmem:[%s3884_s17 + $0xb8] sm:$0x3f] }
 0x373   : > { %2491 = vst [vmem:[#allocation1 + $0x2] ss:$4 sm:$0xff] %v986_v54  ;;  %v3695_v54 = vld [vmem:[%s3884_s17 + $0x58] sm:$0x3f] }
 0x374   : > { %2493 = vst [vmem:[#allocation1 + $0x3] ss:$4 sm:$0xff] %v987_v50  ;;  %v1002_v50 = vrot.slane %v5011_v8, 6 }
 0x377   : > { %v5103_v10 = vld.sshfl [vmem:[#allocation1 + $0x20] sm:$0xff pattern:$0x73625140] }
 0x378   : > { %2558 = vst [vmem:[#allocation1 + $0x20] ss:$4 sm:$0xff] %v1022_v60  ;;  %v1003_v60 = vrot.slane %v3695_v54, 2 }
 0x379   : > { %2559 = vst [vmem:[#allocation1 + $0x21] ss:$4 sm:$0xff] %v3703_v44 }
 0x37a   : > { %2560 = vst [vmem:[#allocation1 + $0x22] ss:$4 sm:$0xff] %v1023_v34  ;;  %v2451_v4 = vpop.permute.xlu2 %2450 }
 0x37b   : > { %2561 = vst [vmem:[#allocation1 + $0x23] ss:$4 sm:$0xff] %v1024_v3  ;;  %v2502_v61 = vld.sshfl [vmem:[#allocation1] sm:$0xff pattern:$0x73625140]  ;;  %v5114_v23 = vsel %vm3206_vm4, %v4918_v45, %v2451_v4  ;;  %v997_v45 = vrot.slane %v4986_v11, 6 }
 0x37c   : > { %2504 = vst [vmem:[#allocation1] ss:$4 sm:$0xff] %v990_v36  ;;  %v2443_v7 = vpop.permute.xlu1 %2442  ;;  %v5139_v11 = vld [vmem:[%s3884_s17 + $0xc0] sm:$0xff]  ;;  %v1004_v36 = vrot.slane %v3695_v54, 4  ;;  %v3697_v4 = vld [vmem:[%s3884_s17 + $0x68] sm:$0x3f] }
 0x37d   : > { %2505 = vst [vmem:[#allocation1 + $0x1] ss:$4 sm:$0xff] %v991_v12  ;;  %v1035_v6 = vrot.slane %v5139_v11, 2  ;;  %v5158_v12 = vld [vmem:[%s3884_s17 + $0xc8] sm:$0x3f] }
 0x37e   : > { %2506 = vst [vmem:[#allocation1 + $0x2] ss:$4 sm:$0xff] %v992_v49  ;;  %v1040_v49 = vrot.slane %v5162_v20, 2 }
 0x37f   : > { %2507 = vst [vmem:[#allocation1 + $0x3] ss:$4 sm:$0xff] %v4972_v21  ;;  %v5126_v21 = vsel %vm3206_vm4, %v4853_v48, %v2443_v7  ;;  %v1033_v48 = vrot.slane %v5135_v19, 2  ;;  %v3712_v7 = vld [vmem:[%s3884_s17 + $0xe0] sm:$0xff] }
 0x382   : > { %v2563_v14 = vld.sshfl [vmem:[#allocation1 + $0x20] sm:$0xff pattern:$0x73625140]  ;;  %v2433_v32 = vpop.permute.xlu2 %2432 }
 0x383   : > { %2643 = vrot.lane.b32.xlu2 %v2563_v14, %s3847_s23  ;;  %2568 = vst [vmem:[#allocation1 + $0x20] ss:$4 sm:$0xff] %v3705_v62  ;;  %v5130_v29 = vsel %vm3206_vm4, %v4856_v33, %v2433_v32  ;;  %v1034_v33 = vrot.slane %v5135_v19, 4  ;;  %v1008_v62 = vrot.slane %v3697_v4, 2  ;;  %v1045_v32 = vrot.slane %v3712_v7, 2 }
 0x384   : > { %2569 = vst [vmem:[#allocation1 + $0x21] ss:$4 sm:$0xff] %v1028_v0  ;;  %v2425_v44 = vpop.permute.xlu1 %2424 }
 0x385   : > { %2570 = vst [vmem:[#allocation1 + $0x22] ss:$4 sm:$0xff] %v1029_v57  ;;  %v5155_v3 = vsel %vm3206_vm4, %v4781_v38, %v2425_v44  ;;  %v1041_v38 = vrot.slane %v5162_v20, 4 }
 0x386   : > { %2571 = vst [vmem:[#allocation1 + $0x23] ss:$4 sm:$0xff] %v5121_v2  ;;  %v2512_v53 = vld.sshfl [vmem:[#allocation1] sm:$0xff pattern:$0x73625140] }
 0x387   : > { %2514 = vst [vmem:[#allocation1] ss:$4 sm:$0xff] %v996_v43  ;;  %v1009_v43 = vrot.slane %v3697_v4, 4 }
 0x388   : > { %2515 = vst [vmem:[#allocation1 + $0x1] ss:$4 sm:$0xff] %v997_v45 }
 0x389   : > { %2516 = vst [vmem:[#allocation1 + $0x2] ss:$4 sm:$0xff] %v5005_v18  ;;  %v2447_v18 = vpop.permute.xlu0 %2446 }
 0x38a   : > { %2517 = vst [vmem:[#allocation1 + $0x3] ss:$4 sm:$0xff] %v998_v31  ;;  %v5151_v34 = vsel %vm3206_vm4, %v4777_v17, %v2447_v18  ;;  %v1039_v17 = vrot.slane %v5158_v12, 4  ;;  %v5194_v18 = vld [vmem:[%s3884_s17 + $0xf0] sm:$0xff] }
 0x38b   : > { %2617 = vrot.lane.b32.xlu2 %v2502_v61, %s3847_s23 }
 0x38d   : > { %v2573_v25 = vld.sshfl [vmem:[#allocation1 + $0x20] sm:$0xff pattern:$0x73625140] }
 0x38e   : > { %2647 = vrot.lane.b32.xlu0 %v2573_v25, %s3847_s23  ;;  %2578 = vst [vmem:[#allocation1 + $0x20] ss:$4 sm:$0xff] %v1033_v48  ;;  %v1013_v48 = vrot.slane %v5058_v37, 2 }
 0x38f   : > { %2579 = vst [vmem:[#allocation1 + $0x21] ss:$4 sm:$0xff] %v1034_v33  ;;  %v1014_v33 = vrot.slane %v5058_v37, 4  ;;  %v1050_v37 = vrot.slane %v5194_v18, 2 }
 0x390   : > { %2580 = vst [vmem:[#allocation1 + $0x22] ss:$4 sm:$0xff] %v5139_v11 }
 0x391   : > { %2581 = vst [vmem:[#allocation1 + $0x23] ss:$4 sm:$0xff] %v1035_v6  ;;  %v2522_v8 = vld.sshfl [vmem:[#allocation1] sm:$0xff pattern:$0x73625140]  ;;  %v2429_v61 = vpop.permute.xlu0 %2428 }
 0x392   : > { %2524 = vst [vmem:[#allocation1] ss:$4 sm:$0xff] %v1002_v50  ;;  %v5173_v0 = vsel %vm3206_vm4, %v4737_v58, %v2429_v61  ;;  %v1047_v58 = vrot.slane %v3712_v7, 6  ;;  %v1015_v50 = vrot.slane %v5078_v42, 2 }
 0x393   : > { %2621 = vrot.lane.b32.xlu2 %v2512_v53, %s3847_s23  ;;  %2525 = vst [vmem:[#allocation1 + $0x1] ss:$4 sm:$0xff] %v3695_v54  ;;  %v1046_v53 = vrot.slane %v3712_v7, 4 }
 0x394   : > { %2526 = vst [vmem:[#allocation1 + $0x2] ss:$4 sm:$0xff] %v1003_v60  ;;  %v1019_v60 = vrot.slane %v5081_v27, 4 }
 0x395   : > { %2527 = vst [vmem:[#allocation1 + $0x3] ss:$4 sm:$0xff] %v1004_v36 }
 0x398   : > { %v2583_v13 = vld.sshfl [vmem:[#allocation1 + $0x20] sm:$0xff pattern:$0x73625140] }
 0x399   : > { %2651 = vrot.lane.b32.xlu0 %v2583_v13, %s3847_s23  ;;  %2588 = vst [vmem:[#allocation1 + $0x20] ss:$4 sm:$0xff] %v1039_v17  ;;  %v1020_v17 = vrot.slane %v5099_v63, 2 }
 0x39a   : > { %2589 = vst [vmem:[#allocation1 + $0x21] ss:$4 sm:$0xff] %v5162_v20 }
 0x39b   : > { %2590 = vst [vmem:[#allocation1 + $0x22] ss:$4 sm:$0xff] %v1040_v49  ;;  %2625 = vrot.lane.b32.xlu2 %v2522_v8, %s3847_s23  ;;  %v2620_v57 = vpop.permute.xlu2 %2619  ;;  %v5204_v8 = vld [vmem:[%s3884_s17 + $0xf8] sm:$0x3f] }
 0x39c   : > { %2591 = vst [vmem:[#allocation1 + $0x23] ss:$4 sm:$0xff] %v1041_v38  ;;  %v2532_v14 = vld.sshfl [vmem:[#allocation1] sm:$0xff pattern:$0x73625140]  ;;  %v5177_v45 = vsel %vm3232_vm5, %v4894_v59, %v2620_v57  ;;  %v1021_v38 = vrot.slane %v5099_v63, 4 }
 0x39d   : > { %2537 = vst [vmem:[#allocation1 + $0x3] ss:$4 sm:$0xff] %v5046_v30  ;;  %v2455_v59 = vpop.permute.xlu1 %2454  ;;  %v3704_v57 = vld [vmem:[%s3884_s17 + $0xa0] sm:$0xff] }
 0x39e   : > { %2534 = vst [vmem:[#allocation1] ss:$4 sm:$0xff] %v3697_v4  ;;  %v5186_v30 = vsel %vm3206_vm4, %v4944_v41, %v2455_v59  ;;  %v1051_v41 = vrot.slane %v5194_v18, 4 }
 0x39f   : > { %2535 = vst [vmem:[#allocation1 + $0x1] ss:$4 sm:$0xff] %v1008_v62 }
 0x3a0   : > { %2536 = vst [vmem:[#allocation1 + $0x2] ss:$4 sm:$0xff] %v1009_v43 }
 0x3a3   : > { %v2593_v31 = vld.sshfl [vmem:[#allocation1 + $0x20] sm:$0xff pattern:$0x73625140]  ;;  %v2445_v25 = vpop.permute.xlu2 %2444 }
 0x3a4   : > { %2655 = vrot.lane.b32.xlu0 %v2593_v31, %s3847_s23  ;;  %2598 = vst [vmem:[#allocation1 + $0x20] ss:$4 sm:$0xff] %v3712_v7  ;;  %v5190_v6 = vsel %vm3206_vm4, %v4947_v40, %v2445_v25  ;;  %v1052_v40 = vrot.slane %v5194_v18, 6  ;;  %v1027_v31 = vrot.slane %v3704_v57, 6 }
 0x3a5   : > { %2599 = vst [vmem:[#allocation1 + $0x21] ss:$4 sm:$0xff] %v1045_v32  ;;  %v2437_v36 = vpop.permute.xlu1 %2436  ;;  %v1026_v32 = vrot.slane %v3704_v57, 4 }
 0x3a6   : > { %2600 = vst [vmem:[#allocation1 + $0x22] ss:$4 sm:$0xff] %v1046_v53  ;;  %v5213_v27 = vsel %vm3206_vm4, %v4891_v39, %v2437_v36 }
 0x3a7   : > { %2601 = vst [vmem:[#allocation1 + $0x23] ss:$4 sm:$0xff] %v1047_v58  ;;  %v2542_v54 = vld.sshfl [vmem:[#allocation1] sm:$0xff pattern:$0x73625140] }
 0x3a8   : > { %2544 = vst [vmem:[#allocation1] ss:$4 sm:$0xff] %v1013_v48  ;;  %v5240_v58 = vld [vmem:[%s3884_s17 + $0x41] sm:$0xff] }
 0x3a9   : > { %2545 = vst [vmem:[#allocation1 + $0x1] ss:$4 sm:$0xff] %v1014_v33  ;;  %v1121_v25 = vrot.slane %v5240_v58, 2 }
 0x3aa   : > { %2546 = vst [vmem:[#allocation1 + $0x2] ss:$4 sm:$0xff] %v5078_v42  ;;  %v2459_v42 = vpop.permute.xlu0 %2458 }
 0x3ab   : > { %2547 = vst [vmem:[#allocation1 + $0x3] ss:$4 sm:$0xff] %v1015_v50  ;;  %v5209_v49 = vsel %vm3206_vm4, %v4863_v35, %v2459_v42  ;;  %v2624_v13 = vpop.permute.xlu2 %2623  ;;  %v3717_v35 = vld [vmem:[%s3884_s17 + $0x29] sm:$0x3f]  ;;  %v1031_v50 = vrot.slane %v5121_v2, 4  ;;  %v5259_v42 = vld [vmem:[%s3884_s17 + $0x51] sm:$0xff] }
 0x3ac   : > { %2629 = vrot.lane.b32.xlu0 %v2532_v14, %s3847_s23  ;;  %v5219_v61 = vsel %vm3232_vm5, %v4979_v16, %v2624_v13  ;;  %v1114_v39 = vrot.slane %v3717_v35, 2  ;;  %v1115_v62 = vrot.slane %v3717_v35, 4  ;;  %v5231_v16 = vld [vmem:[%s3884_s17 + $0x31] sm:$0xff]  ;;  %v1126_v36 = vrot.slane %v5259_v42, 2 }
 0x3ad   : > { %v1036_v13 = vrot.slane %v5139_v11, 4 }
 0x3ae   : > { %v2603_v44 = vld.sshfl [vmem:[#allocation1 + $0x20] sm:$0xff pattern:$0x73625140] }
 0x3af   : > { %2659 = vrot.lane.b32.xlu1 %v2603_v44, %s3847_s23  ;;  %2608 = vst [vmem:[#allocation1 + $0x20] ss:$4 sm:$0xff] %v1050_v37 }
 0x3b0   : > { %2609 = vst [vmem:[#allocation1 + $0x21] ss:$4 sm:$0xff] %v1051_v41  ;;  %v1032_v41 = vrot.slane %v5121_v2, 6 }
 0x3b1   : > { %2610 = vst [vmem:[#allocation1 + $0x22] ss:$4 sm:$0xff] %v1052_v40 }
 0x3b2   : > { %2611 = vst [vmem:[#allocation1 + $0x23] ss:$4 sm:$0xff] %v5204_v8  ;;  %v2552_v4 = vld.sshfl [vmem:[#allocation1] sm:$0xff pattern:$0x73625140]  ;;  %v2441_v14 = vpop.permute.xlu0 %2440 }
 0x3b3   : > { %2554 = vst [vmem:[#allocation1] ss:$4 sm:$0xff] %v1019_v60  ;;  %v5227_v7 = vsel %vm3206_vm4, %v4814_v1, %v2441_v14  ;;  %v5237_v1 = vld [vmem:[%s3884_s17 + $0x39] sm:$0x3f]  ;;  %v5256_v60 = vld [vmem:[%s3884_s17 + $0x49] sm:$0x3f] }
 0x3b4   : > { %2633 = vrot.lane.b32.xlu0 %v2542_v54, %s3847_s23  ;;  %2555 = vst [vmem:[#allocation1 + $0x1] ss:$4 sm:$0xff] %v5099_v63  ;;  %v1025_v63 = vrot.slane %v3704_v57, 2  ;;  %v1119_v48 = vrot.slane %v5237_v1, 2  ;;  %v1120_v33 = vrot.slane %v5237_v1, 4  ;;  %v1030_v54 = vrot.slane %v5121_v2, 2 }
 0x3b5   : > { %2556 = vst [vmem:[#allocation1 + $0x2] ss:$4 sm:$0xff] %v1020_v17  ;;  %v1125_v2 = vrot.slane %v5256_v60, 4 }
 0x3b6   : > { %2557 = vst [vmem:[#allocation1 + $0x3] ss:$4 sm:$0xff] %v1021_v38  ;;  %v1037_v38 = vrot.slane %v5139_v11, 6 }
 0x3b9   : > { %v2613_v43 = vld.sshfl [vmem:[#allocation1 + $0x20] sm:$0xff pattern:$0x73625140] }
 0x3ba   : > { %2663 = vrot.lane.b32.xlu1 %v2613_v43, %s3847_s23  ;;  %2700 = vst [vmem:[#allocation1 + $0x20] ss:$4 sm:$0xff] %v3717_v35  ;;  %v1038_v35 = vrot.slane %v5158_v12, 2 }
 0x3bb   : > { %2702 = vst [vmem:[#allocation1 + $0x21] ss:$4 sm:$0xff] %v1114_v39 }
 0x3bc   : > { %2704 = vst [vmem:[#allocation1 + $0x22] ss:$4 sm:$0xff] %v1115_v62  ;;  %2637 = vrot.lane.b32.xlu0 %v2552_v4, %s3847_s23  ;;  %v3724_v62 = vld [vmem:[%s3884_s17 + $0x61] sm:$0xff] }
 0x3bd   : > { %2706 = vst [vmem:[#allocation1 + $0x23] ss:$4 sm:$0xff] %v5231_v16  ;;  %v2562_v53 = vld.sshfl [vmem:[#allocation1] sm:$0xff pattern:$0x73625140]  ;;  %v1131_v11 = vrot.slane %v3724_v62, 2 }
 0x3be   : > { %2641 = vrot.lane.b32.xlu2 %v2562_v53, %s3847_s23  ;;  %2564 = vst [vmem:[#allocation1] ss:$4 sm:$0xff] %v3704_v57  ;;  %v1132_v57 = vrot.slane %v3724_v62, 4  ;;  %v1133_v14 = vrot.slane %v3724_v62, 6 }
 0x3bf   : > { %2565 = vst [vmem:[#allocation1 + $0x1] ss:$4 sm:$0xff] %v1025_v63  ;;  %v1042_v63 = vrot.slane %v5162_v20, 6  ;;  %v5291_v20 = vld [vmem:[%s3884_s17 + $0x71] sm:$0xff] }
 0x3c0   : > { %2566 = vst [vmem:[#allocation1 + $0x2] ss:$4 sm:$0xff] %v1026_v32  ;;  %v2457_v37 = vpop.permute.xlu2 %2456 }
 0x3c1   : > { %2567 = vst [vmem:[#allocation1 + $0x3] ss:$4 sm:$0xff] %v1027_v31  ;;  %v5252_v40 = vsel %vm3206_vm4, %v5032_v55, %v2457_v37  ;;  %v1127_v55 = vrot.slane %v5259_v42, 4  ;;  %v3713_v37 = vld [vmem:[%s3884_s17 + $0xe8] sm:$0x3f] }
 0x3c2   : > { %v2449_v4 = vpop.permute.xlu1 %2448 }
 0x3c4   : > { %v2708_v59 = vld.sshfl [vmem:[#allocation1 + $0x20] sm:$0xff pattern:$0x73625140] }
 0x3c5   : > { %2824 = vrot.lane.b32.xlu1 %v2708_v59, %s3848_s24  ;;  %2713 = vst [vmem:[#allocation1 + $0x20] ss:$4 sm:$0xff] %v1119_v48 }
 0x3c6   : > { %2714 = vst [vmem:[#allocation1 + $0x21] ss:$4 sm:$0xff] %v1120_v33 }
 0x3c7   : > { %2715 = vst [vmem:[#allocation1 + $0x22] ss:$4 sm:$0xff] %v5240_v58 }
 0x3c8   : > { %2716 = vst [vmem:[#allocation1 + $0x23] ss:$4 sm:$0xff] %v1121_v25  ;;  %v2572_v44 = vld.sshfl [vmem:[#allocation1] sm:$0xff pattern:$0x73625140]  ;;  %v1137_v25 = vrot.slane %v5291_v20, 4 }
 0x3c9   : > { %2645 = vrot.lane.b32.xlu0 %v2572_v44, %s3847_s23  ;;  %2574 = vst [vmem:[#allocation1] ss:$4 sm:$0xff] %v1030_v54  ;;  %v1138_v54 = vrot.slane %v5291_v20, 6 }
 0x3ca   : > { %2575 = vst [vmem:[#allocation1 + $0x1] ss:$4 sm:$0xff] %v1031_v50 }
 0x3cb   : > { %2576 = vst [vmem:[#allocation1 + $0x2] ss:$4 sm:$0xff] %v1032_v41 }
 0x3cc   : > { %2577 = vst [vmem:[#allocation1 + $0x3] ss:$4 sm:$0xff] %v5135_v19  ;;  %v5271_v19 = vsel %vm3206_vm4, %v4982_v51, %v2449_v4  ;;  %v3711_v51 = vld [vmem:[%s3884_s17 + $0xd8] sm:$0x3f]  ;;  %v5316_v4 = vld [vmem:[%s3884_s17 + $0x89] sm:$0x3f] }
 0x3cd   : > { %v2453_v32 = vpop.permute.xlu0 %2452  ;;  %v1043_v31 = vrot.slane %v3711_v51, 2  ;;  %v1044_v33 = vrot.slane %v3711_v51, 4 }
 0x3ce   : > { %v5283_v53 = vsel %vm3206_vm4, %v4921_v46, %v2453_v32  ;;  %v1136_v46 = vrot.slane %v5291_v20, 2  ;;  %v1054_v32 = vrot.slane %v5204_v8, 4 }
 0x3cf   : > { %v2718_v17 = vld.sshfl [vmem:[#allocation1 + $0x20] sm:$0xff pattern:$0x73625140] }
 0x3d0   : > { %2828 = vrot.lane.b32.xlu1 %v2718_v17, %s3848_s24  ;;  %2723 = vst [vmem:[#allocation1 + $0x20] ss:$4 sm:$0xff] %v1125_v2  ;;  %v1048_v2 = vrot.slane %v3713_v37, 2 }
 0x3d1   : > { %2724 = vst [vmem:[#allocation1 + $0x21] ss:$4 sm:$0xff] %v5259_v42 }
 0x3d2   : > { %2725 = vst [vmem:[#allocation1 + $0x22] ss:$4 sm:$0xff] %v1126_v36 }
 0x3d3   : > { %v2582_v39 = vld.sshfl [vmem:[#allocation1] sm:$0xff pattern:$0x73625140]  ;;  %2726 = vst [vmem:[#allocation1 + $0x23] ss:$4 sm:$0xff] %v1127_v55 }
 0x3d4   : > { %2649 = vrot.lane.b32.xlu0 %v2582_v39, %s3847_s23  ;;  %2584 = vst [vmem:[#allocation1] ss:$4 sm:$0xff] %v1036_v13  ;;  %v1049_v13 = vrot.slane %v3713_v37, 4 }
 0x3d5   : > { %2585 = vst [vmem:[#allocation1 + $0x1] ss:$4 sm:$0xff] %v1037_v38  ;;  %v2632_v41 = vpop.permute.xlu0 %2631  ;;  %v5313_v38 = vld [vmem:[%s3884_s17 + $0x81] sm:$0xff] }
 0x3d6   : > { %2586 = vst [vmem:[#allocation1 + $0x2] ss:$4 sm:$0xff] %v5158_v12  ;;  %v5303_v36 = vsel %vm3232_vm5, %v4969_v28, %v2632_v41  ;;  %v1142_v28 = vrot.slane %v5313_v38, 4 }
 0x3d7   : > { %2587 = vst [vmem:[#allocation1 + $0x3] ss:$4 sm:$0xff] %v1038_v35 }
 0x3da   : > { %v5277_v43 = vld.sshfl [vmem:[#allocation1 + $0x20] sm:$0xff pattern:$0x73625140] }
 0x3db   : > { %2733 = vst [vmem:[#allocation1 + $0x20] ss:$4 sm:$0xff] %v3724_v62 }
 0x3dc   : > { %2734 = vst [vmem:[#allocation1 + $0x21] ss:$4 sm:$0xff] %v1131_v11  ;;  %v1144_v11 = vrot.slane %v5316_v4, 2 }
 0x3dd   : > { %2735 = vst [vmem:[#allocation1 + $0x22] ss:$4 sm:$0xff] %v1132_v57  ;;  %v2644_v12 = vpop.permute.xlu2 %2643 }
 0x3de   : > { %2736 = vst [vmem:[#allocation1 + $0x23] ss:$4 sm:$0xff] %v1133_v14  ;;  %v2592_v48 = vld.sshfl [vmem:[#allocation1] sm:$0xff pattern:$0x73625140]  ;;  %v5287_v59 = vsel %vm3232_vm5, %v5041_v22, %v2644_v12 }
 0x3df   : > { %2653 = vrot.lane.b32.xlu0 %v2592_v48, %s3847_s23  ;;  %2594 = vst [vmem:[#allocation1] ss:$4 sm:$0xff] %v1042_v63  ;;  %v5299_v22 = vld [vmem:[%s3884_s17 + $0x79] sm:$0x3f]  ;;  %v2636_v35 = vpop.permute.xlu0 %2635 }
 0x3e0   : > { %2595 = vst [vmem:[#allocation1 + $0x1] ss:$4 sm:$0xff] %v3711_v51  ;;  %v1053_v51 = vrot.slane %v5204_v8, 2 }
 0x3e1   : > { %2596 = vst [vmem:[#allocation1 + $0x2] ss:$4 sm:$0xff] %v1043_v31  ;;  %v2461_v39 = vpop.permute.xlu1 %2460  ;;  %v3731_v31 = vld [vmem:[%s3884_s17 + $0x99] sm:$0x3f] }
 0x3e2   : > { %2597 = vst [vmem:[#allocation1 + $0x3] ss:$4 sm:$0xff] %v1044_v33  ;;  %v5327_v57 = vsel %vm3206_vm4, %v5069_v9, %v2461_v39  ;;  %v5339_v9 = vld [vmem:[%s3884_s17 + $0x91] sm:$0xff]  ;;  %v1149_v8 = vrot.slane %v3731_v31, 2  ;;  %v3716_v33 = vld [vmem:[%s3884_s17 + $0x21] sm:$0xff]  ;;  %v1118_v39 = vrot.slane %v5231_v16, 6 }
 0x3e3   : > { %v1148_v12 = vrot.slane %v5339_v9, 6  ;;  %v1113_v41 = vrot.slane %v3716_v33, 6 }
 0x3e5   : > { %v2738_v50 = vld.sshfl [vmem:[#allocation1 + $0x20] sm:$0xff pattern:$0x73625140]  ;;  %v2618_v44 = vpop.permute.xlu2 %2617 }
 0x3e6   : > { %2836 = vrot.lane.b32.xlu2 %v2738_v50, %s3848_s24  ;;  %2743 = vst [vmem:[#allocation1 + $0x20] ss:$4 sm:$0xff] %v1136_v46  ;;  %v5307_v17 = vsel %vm3232_vm5, %v5096_v5, %v2618_v44  ;;  %v1143_v5 = vrot.slane %v5313_v38, 6  ;;  %v1150_v46 = vrot.slane %v3731_v31, 4  ;;  %v1111_v50 = vrot.slane %v3716_v33, 2 }
 0x3e7   : > { %2744 = vst [vmem:[#allocation1 + $0x21] ss:$4 sm:$0xff] %v1137_v25  ;;  %v3733_v44 = vld [vmem:[%s3884_s17 + $0xa9] sm:$0x3f] }
 0x3e8   : > { %2745 = vst [vmem:[#allocation1 + $0x22] ss:$4 sm:$0xff] %v1138_v54 }
 0x3e9   : > { %2746 = vst [vmem:[#allocation1 + $0x23] ss:$4 sm:$0xff] %v5299_v22  ;;  %v2602_v55 = vld.sshfl [vmem:[#allocation1] sm:$0xff pattern:$0x73625140] }
 0x3ea   : > { %2657 = vrot.lane.b32.xlu1 %v2602_v55, %s3847_s23  ;;  %2607 = vst [vmem:[#allocation1 + $0x3] ss:$4 sm:$0xff] %v5194_v18  ;;  %v5323_v18 = vsel %vm3232_vm5, %v5066_v52, %v2636_v35 }
 0x3eb   : > { %2604 = vst [vmem:[#allocation1] ss:$4 sm:$0xff] %v3713_v37  ;;  %v1112_v37 = vrot.slane %v3716_v33, 4 }
 0x3ec   : > { %2605 = vst [vmem:[#allocation1 + $0x1] ss:$4 sm:$0xff] %v1048_v2  ;;  %v1155_v2 = vrot.slane %v3733_v44, 4 }
 0x3ed   : > { %2606 = vst [vmem:[#allocation1 + $0x2] ss:$4 sm:$0xff] %v1049_v13  ;;  %v2622_v14 = vpop.permute.xlu2 %2621  ;;  %v1116_v13 = vrot.slane %v5231_v16, 2 }
 0x3ee   : > { %v5333_v63 = vsel %vm3232_vm5, %v5110_v47, %v2622_v14  ;;  %v5366_v14 = vld [vmem:[%s3884_s17 + $0xb9] sm:$0x3f] }
 0x3f0   : > { %v2748_v62 = vld.sshfl [vmem:[#allocation1 + $0x20] sm:$0xff pattern:$0x73625140] }
 0x3f1   : > { %2840 = vrot.lane.b32.xlu2 %v2748_v62, %s3848_s24  ;;  %2753 = vst [vmem:[#allocation1 + $0x20] ss:$4 sm:$0xff] %v1142_v28  ;;  %v5356_v28 = vld [vmem:[%s3884_s17 + $0xb1] sm:$0xff] }
 0x3f2   : > { %2754 = vst [vmem:[#allocation1 + $0x21] ss:$4 sm:$0xff] %v1143_v5  ;;  %v1117_v5 = vrot.slane %v5231_v16, 4  ;;  %v1159_v16 = vrot.slane %v5366_v14, 2 }
 0x3f3   : > { %2755 = vst [vmem:[#allocation1 + $0x22] ss:$4 sm:$0xff] %v5316_v4 }
 0x3f4   : > { %v2612_v52 = vld.sshfl [vmem:[#allocation1] sm:$0xff pattern:$0x73625140]  ;;  %2756 = vst [vmem:[#allocation1 + $0x23] ss:$4 sm:$0xff] %v1144_v11 }
 0x3f5   : > { %2661 = vrot.lane.b32.xlu1 %v2612_v52, %s3847_s23  ;;  %2614 = vst [vmem:[#allocation1] ss:$4 sm:$0xff] %v1053_v51  ;;  %v2626_v48 = vpop.permute.xlu2 %2625  ;;  %v5370_v51 = vld [vmem:[%s3884_s17 + $0xc1] sm:$0xff] }
 0x3f6   : > { %2615 = vst [vmem:[#allocation1 + $0x1] ss:$4 sm:$0xff] %v1054_v32  ;;  %v5345_v47 = vsel %vm3232_vm5, %v5074_v26, %v2626_v48  ;;  %v1154_v26 = vrot.slane %v3733_v44, 2  ;;  %v1123_v48 = vrot.slane %v5240_v58, 6 }
 0x3fb   : > { %v5348_v25 = vld.sshfl [vmem:[#allocation1 + $0x20] sm:$0xff pattern:$0x73625140] }
 0x3fc   : > { %2763 = vst [vmem:[#allocation1 + $0x20] ss:$4 sm:$0xff] %v1148_v12 }
 0x3fd   : > { %v5350_v54 = vld.sshfl [vmem:[#allocation1] sm:$0xff pattern:$0x73625140]  ;;  %2764 = vst [vmem:[#allocation1 + $0x21] ss:$4 sm:$0xff] %v3731_v31  ;;  %v1161_v31 = vrot.slane %v5370_v51, 2 }
 0x3fe   : > { %2765 = vst [vmem:[#allocation1 + $0x22] ss:$4 sm:$0xff] %v1149_v8  ;;  %v1124_v8 = vrot.slane %v5256_v60, 2 }
 0x3ff   : > { %2766 = vst [vmem:[#allocation1 + $0x23] ss:$4 sm:$0xff] %v1150_v46  ;;  %v5385_v46 = vld [vmem:[%s3884_s17 + $0xc9] sm:$0x3f] }
 0x400   : > { %2692 = vst [vmem:[#allocation1] ss:$4 sm:$0xff] %v3716_v33  ;;  %v2648_v35 = vpop.permute.xlu0 %2647 }
 0x401   : > { %2694 = vst [vmem:[#allocation1 + $0x1] ss:$4 sm:$0xff] %v1111_v50  ;;  %v5362_v62 = vsel %vm3232_vm5, %v5126_v21, %v2648_v35  ;;  %v1160_v21 = vrot.slane %v5366_v14, 4 }
 0x402   : > { %2696 = vst [vmem:[#allocation1 + $0x2] ss:$4 sm:$0xff] %v1112_v37  ;;  %v1165_v37 = vrot.slane %v5385_v46, 4 }
 0x403   : > { %2698 = vst [vmem:[#allocation1 + $0x3] ss:$4 sm:$0xff] %v1113_v41 }
 0x406   : > { %v2768_v55 = vld.sshfl [vmem:[#allocation1 + $0x20] sm:$0xff pattern:$0x73625140] }
 0x407   : > { %2848 = vrot.lane.b32.xlu1 %v2768_v55, %s3848_s24  ;;  %2773 = vst [vmem:[#allocation1 + $0x20] ss:$4 sm:$0xff] %v3733_v44 }
 0x408   : > { %2774 = vst [vmem:[#allocation1 + $0x21] ss:$4 sm:$0xff] %v1154_v26 }
 0x409   : > { %2775 = vst [vmem:[#allocation1 + $0x22] ss:$4 sm:$0xff] %v1155_v2 }
 0x40a   : > { %v2707_v11 = vld.sshfl [vmem:[#allocation1] sm:$0xff pattern:$0x73625140]  ;;  %2776 = vst [vmem:[#allocation1 + $0x23] ss:$4 sm:$0xff] %v5356_v28 }
 0x40b   : > { %2709 = vst [vmem:[#allocation1] ss:$4 sm:$0xff] %v1116_v13  ;;  %v2652_v32 = vpop.permute.xlu0 %2651  ;;  %v1128_v13 = vrot.slane %v5259_v42, 6  ;;  %v3740_v42 = vld [vmem:[%s3884_s17 + $0xe1] sm:$0xff] }
 0x40c   : > { %2710 = vst [vmem:[#allocation1 + $0x1] ss:$4 sm:$0xff] %v1117_v5  ;;  %v5378_v12 = vsel %vm3232_vm5, %v5151_v34, %v2652_v32  ;;  %v5389_v34 = vld [vmem:[%s3884_s17 + $0xd1] sm:$0xff]  ;;  %v1172_v32 = vrot.slane %v3740_v42, 4 }
 0x40d   : > { %2711 = vst [vmem:[#allocation1 + $0x2] ss:$4 sm:$0xff] %v1118_v39  ;;  %v1166_v26 = vrot.slane %v5389_v34, 2  ;;  %v1167_v2 = vrot.slane %v5389_v34, 4 }
 0x40e   : > { %2712 = vst [vmem:[#allocation1 + $0x3] ss:$4 sm:$0xff] %v5237_v1  ;;  %v1122_v1 = vrot.slane %v5240_v58, 4 }
 0x40f   : > { %2822 = vrot.lane.b32.xlu1 %v2707_v11, %s3848_s24 }
 0x411   : > { %v2778_v52 = vld.sshfl [vmem:[#allocation1 + $0x20] sm:$0xff pattern:$0x73625140] }
 0x412   : > { %2783 = vst [vmem:[#allocation1 + $0x20] ss:$4 sm:$0xff] %v1159_v16 }
 0x413   : > { %2784 = vst [vmem:[#allocation1 + $0x21] ss:$4 sm:$0xff] %v1160_v21  ;;  %v1171_v21 = vrot.slane %v3740_v42, 2 }
 0x414   : > { %2785 = vst [vmem:[#allocation1 + $0x22] ss:$4 sm:$0xff] %v5370_v51 }
 0x415   : > { %2786 = vst [vmem:[#allocation1 + $0x23] ss:$4 sm:$0xff] %v1161_v31  ;;  %v2717_v33 = vld.sshfl [vmem:[#allocation1] sm:$0xff pattern:$0x73625140]  ;;  %v1173_v31 = vrot.slane %v3740_v42, 6 }
 0x416   : > { %2719 = vst [vmem:[#allocation1] ss:$4 sm:$0xff] %v1122_v1  ;;  %v2656_v50 = vpop.permute.xlu0 %2655  ;;  %v3725_v1 = vld [vmem:[%s3884_s17 + $0x69] sm:$0x3f] }
 0x417   : > { %2852 = vrot.lane.b32.xlu1 %v2778_v52, %s3848_s24  ;;  %2720 = vst [vmem:[#allocation1 + $0x1] ss:$4 sm:$0xff] %v1123_v48  ;;  %v5395_v41 = vsel %vm3232_vm5, %v5114_v23, %v2656_v50 }
 0x418   : > { %2721 = vst [vmem:[#allocation1 + $0x2] ss:$4 sm:$0xff] %v5256_v60  ;;  %v2642_v58 = vpop.permute.xlu2 %2641  ;;  %v3723_v60 = vld [vmem:[%s3884_s17 + $0x59] sm:$0x3f] }
 0x419   : > { %2722 = vst [vmem:[#allocation1 + $0x3] ss:$4 sm:$0xff] %v1124_v8  ;;  %v5399_v44 = vsel %vm3232_vm5, %v5213_v27, %v2642_v58  ;;  %v1129_v23 = vrot.slane %v3723_v60, 2  ;;  %v1130_v5 = vrot.slane %v3723_v60, 4  ;;  %v5421_v8 = vld [vmem:[%s3884_s17 + $0xf1] sm:$0xff] }
 0x41c   : > { %v2788_v55 = vld.sshfl [vmem:[#allocation1 + $0x20] sm:$0xff pattern:$0x73625140] }
 0x41d   : > { %2793 = vst [vmem:[#allocation1 + $0x20] ss:$4 sm:$0xff] %v1165_v37 }
 0x41e   : > { %2794 = vst [vmem:[#allocation1 + $0x21] ss:$4 sm:$0xff] %v5389_v34  ;;  %v2630_v35 = vpop.permute.xlu0 %2629 }
 0x41f   : > { %2795 = vst [vmem:[#allocation1 + $0x22] ss:$4 sm:$0xff] %v1166_v26  ;;  %2826 = vrot.lane.b32.xlu1 %v2717_v33, %s3848_s24  ;;  %v5409_v11 = vsel %vm3232_vm5, %v5155_v3, %v2630_v35  ;;  %v1134_v3 = vrot.slane %v3725_v1, 2  ;;  %v1177_v26 = vrot.slane %v5421_v8, 4 }
 0x420   : > { %2796 = vst [vmem:[#allocation1 + $0x23] ss:$4 sm:$0xff] %v1167_v2  ;;  %v2727_v27 = vld.sshfl [vmem:[#allocation1] sm:$0xff pattern:$0x73625140]  ;;  %v1178_v2 = vrot.slane %v5421_v8, 6 }
 0x421   : > { %2729 = vst [vmem:[#allocation1] ss:$4 sm:$0xff] %v1128_v13  ;;  %v2660_v39 = vpop.permute.xlu1 %2659  ;;  %v1141_v13 = vrot.slane %v5313_v38, 2 }
 0x422   : > { %2730 = vst [vmem:[#allocation1 + $0x1] ss:$4 sm:$0xff] %v3723_v60  ;;  %v5414_v16 = vsel %vm3232_vm5, %v5186_v30, %v2660_v39  ;;  %v1135_v30 = vrot.slane %v3725_v1, 4  ;;  %v5438_v60 = vld [vmem:[%s3884_s17 + $0xf9] sm:$0x3f] }
 0x423   : > { %2731 = vst [vmem:[#allocation1 + $0x2] ss:$4 sm:$0xff] %v1129_v23 }
 0x424   : > { %2732 = vst [vmem:[#allocation1 + $0x3] ss:$4 sm:$0xff] %v1130_v5  ;;  %v3745_v5 = vld [vmem:[%s3884_s17 + $0x2a] sm:$0x3f] }
 0x425   : > { %v1241_v39 = vrot.slane %v3745_v5, 4 }
 0x426   : > { %v2634_v50 = vpop.permute.xlu0 %2633 }
 0x427   : > { %v2798_v52 = vld.sshfl [vmem:[#allocation1 + $0x20] sm:$0xff pattern:$0x73625140]  ;;  %2856 = vrot.lane.b32.xlu1 %v2788_v55, %s3848_s24  ;;  %v5429_v37 = vsel %vm3232_vm5, %v5173_v0, %v2634_v50  ;;  %v1140_v0 = vrot.slane %v5299_v22, 4 }
 0x428   : > { %2860 = vrot.lane.b32.xlu2 %v2798_v52, %s3848_s24  ;;  %2803 = vst [vmem:[#allocation1 + $0x20] ss:$4 sm:$0xff] %v3740_v42  ;;  %v3732_v50 = vld [vmem:[%s3884_s17 + $0xa1] sm:$0xff] }
 0x429   : > { %2804 = vst [vmem:[#allocation1 + $0x21] ss:$4 sm:$0xff] %v1171_v21  ;;  %v1145_v21 = vrot.slane %v5316_v4, 4 }
 0x42a   : > { %2805 = vst [vmem:[#allocation1 + $0x22] ss:$4 sm:$0xff] %v1172_v32  ;;  %v5452_v32 = vld [vmem:[%s3884_s17 + $0x32] sm:$0xff] }
 0x42b   : > { %v2737_v48 = vld.sshfl [vmem:[#allocation1] sm:$0xff pattern:$0x73625140]  ;;  %2806 = vst [vmem:[#allocation1 + $0x23] ss:$4 sm:$0xff] %v1173_v31  ;;  %v1147_v31 = vrot.slane %v5339_v9, 4 }
 0x42c   : > { %2742 = vst [vmem:[#allocation1 + $0x3] ss:$4 sm:$0xff] %v5291_v20  ;;  %v2664_v33 = vpop.permute.xlu1 %2663  ;;  %v1176_v20 = vrot.slane %v5421_v8, 2 }
 0x42d   : > { %2739 = vst [vmem:[#allocation1] ss:$4 sm:$0xff] %v3725_v1  ;;  %v5425_v58 = vsel %vm3232_vm5, %v5209_v49, %v2664_v33  ;;  %v1139_v49 = vrot.slane %v5299_v22, 2 }
 0x42e   : > { %2740 = vst [vmem:[#allocation1 + $0x1] ss:$4 sm:$0xff] %v1134_v3  ;;  %v2638_v35 = vpop.permute.xlu0 %2637  ;;  %v5465_v3 = vld [vmem:[%s3884_s17 + $0x3a] sm:$0x3f] }
 0x42f   : > { %2830 = vrot.lane.b32.xlu1 %v2727_v27, %s3848_s24  ;;  %2741 = vst [vmem:[#allocation1 + $0x2] ss:$4 sm:$0xff] %v1135_v30  ;;  %v1240_v27 = vrot.slane %v3745_v5, 2  ;;  %v5448_v22 = vsel %vm3232_vm5, %v5130_v29, %v2638_v35  ;;  %v1245_v30 = vrot.slane %v5465_v3, 2  ;;  %v1246_v33 = vrot.slane %v5465_v3, 4 }
 0x430   : > { %2834 = vrot.lane.b32.xlu2 %v2737_v48, %s3848_s24  ;;  %v5469_v48 = vld [vmem:[%s3884_s17 + $0x42] sm:$0xff]  ;;  %v5491_v35 = vld [vmem:[%s3884_s17 + $0x4a] sm:$0x3f] }
 0x432   : > { %v2808_v55 = vld.sshfl [vmem:[#allocation1 + $0x20] sm:$0xff pattern:$0x73625140] }
 0x433   : > { %2813 = vst [vmem:[#allocation1 + $0x20] ss:$4 sm:$0xff] %v1176_v20 }
 0x434   : > { %2814 = vst [vmem:[#allocation1 + $0x21] ss:$4 sm:$0xff] %v1177_v26  ;;  %v1151_v26 = vrot.slane %v3732_v50, 2 }
 0x435   : > { %2815 = vst [vmem:[#allocation1 + $0x22] ss:$4 sm:$0xff] %v1178_v2 }
 0x436   : > { %v2747_v23 = vld.sshfl [vmem:[#allocation1] sm:$0xff pattern:$0x73625140]  ;;  %2816 = vst [vmem:[#allocation1 + $0x23] ss:$4 sm:$0xff] %v5438_v60 }
 0x437   : > { %2749 = vst [vmem:[#allocation1] ss:$4 sm:$0xff] %v1139_v49  ;;  %v5456_v52 = vpop.permute.xlu1 %2824 }
 0x438   : > { %2864 = vrot.lane.b32.xlu2 %v2808_v55, %s3848_s24  ;;  %2750 = vst [vmem:[#allocation1 + $0x1] ss:$4 sm:$0xff] %v1140_v0  ;;  %v1152_v55 = vrot.slane %v3732_v50, 4 }
 0x439   : > { %2751 = vst [vmem:[#allocation1 + $0x2] ss:$4 sm:$0xff] %v5313_v38  ;;  %v1146_v38 = vrot.slane %v5339_v9, 2 }
 0x43a   : > { %2752 = vst [vmem:[#allocation1 + $0x3] ss:$4 sm:$0xff] %v1141_v13 }
 0x43d   : > { %v2818_v42 = vld.sshfl [vmem:[#allocation1 + $0x20] sm:$0xff pattern:$0x73625140] }
 0x43e   : > { %2905 = vst [vmem:[#allocation1 + $0x20] ss:$4 sm:$0xff] %v3745_v5  ;;  %v1153_v5 = vrot.slane %v3732_v50, 6 }
 0x43f   : > { %2907 = vst [vmem:[#allocation1 + $0x21] ss:$4 sm:$0xff] %v1240_v27 }
 0x440   : > { %2838 = vrot.lane.b32.xlu2 %v2747_v23, %s3848_s24  ;;  %2909 = vst [vmem:[#allocation1 + $0x22] ss:$4 sm:$0xff] %v1241_v39  ;;  %v2837_v29 = vpop.permute.xlu2 %2836 }
 0x441   : > { %v2757_v1 = vld.sshfl [vmem:[#allocation1] sm:$0xff pattern:$0x73625140]  ;;  %2911 = vst [vmem:[#allocation1 + $0x23] ss:$4 sm:$0xff] %v5452_v32  ;;  %v5462_v4 = vsel %vm3258_vm6, %v5303_v36, %v2837_v29  ;;  %v1247_v36 = vrot.slane %v5469_v48, 2 }
 0x442   : > { %2759 = vst [vmem:[#allocation1] ss:$4 sm:$0xff] %v1145_v21  ;;  %v2829_v2 = vpop.permute.xlu1 %2828  ;;  %v1156_v21 = vrot.slane %v5356_v28, 2 }
 0x443   : > { %2760 = vst [vmem:[#allocation1 + $0x1] ss:$4 sm:$0xff] %v5339_v9  ;;  %v2646_v9 = vpop.permute.xlu0 %2645  ;;  %v5479_v49 = vsel %vm3258_vm6, %v5219_v61, %v2829_v2  ;;  %v5494_v61 = vld [vmem:[%s3884_s17 + $0x52] sm:$0xff]  ;;  %v1163_v2 = vrot.slane %v5370_v51, 6 }
 0x444   : > { %2761 = vst [vmem:[#allocation1 + $0x2] ss:$4 sm:$0xff] %v1146_v38  ;;  %v5483_v13 = vsel %vm3232_vm5, %v5227_v7, %v2646_v9  ;;  %v1251_v7 = vrot.slane %v5491_v35, 4  ;;  %v1252_v39 = vrot.slane %v5494_v61, 2  ;;  %v1157_v38 = vrot.slane %v5356_v28, 4  ;;  %v5520_v9 = vld [vmem:[%s3884_s17 + $0x72] sm:$0xff] }
 0x445   : > { %2762 = vst [vmem:[#allocation1 + $0x3] ss:$4 sm:$0xff] %v1147_v31  ;;  %v1158_v31 = vrot.slane %v5356_v28, 6 }
 0x448   : > { %2868 = vrot.lane.b32.xlu2 %v2818_v42, %s3848_s24  ;;  %v2913_v20 = vld.sshfl [vmem:[#allocation1 + $0x20] sm:$0xff pattern:$0x73625140] }
 0x449   : > { %2918 = vst [vmem:[#allocation1 + $0x20] ss:$4 sm:$0xff] %v1245_v30 }
 0x44a   : > { %2919 = vst [vmem:[#allocation1 + $0x21] ss:$4 sm:$0xff] %v1246_v33 }
 0x44b   : > { %2920 = vst [vmem:[#allocation1 + $0x22] ss:$4 sm:$0xff] %v5469_v48  ;;  %v2841_v0 = vpop.permute.xlu2 %2840  ;;  %v2650_v29 = vpop.permute.xlu0 %2649 }
 0x44c   : > { %v2767_v23 = vld.sshfl [vmem:[#allocation1] sm:$0xff pattern:$0x73625140]  ;;  %2921 = vst [vmem:[#allocation1 + $0x23] ss:$4 sm:$0xff] %v1247_v36  ;;  %v5487_v27 = vsel %vm3258_vm6, %v5323_v18, %v2841_v0  ;;  %v1253_v18 = vrot.slane %v5494_v61, 4  ;;  %v5506_v30 = vsel %vm3232_vm5, %v5190_v6, %v2650_v29 }
 0x44d   : > { %2846 = vrot.lane.b32.xlu0 %v2767_v23, %s3848_s24  ;;  %2769 = vst [vmem:[#allocation1] ss:$4 sm:$0xff] %v3732_v50  ;;  %v3752_v50 = vld [vmem:[%s3884_s17 + $0x62] sm:$0xff]  ;;  %v1162_v6 = vrot.slane %v5370_v51, 4  ;;  %v1262_v51 = vrot.slane %v5520_v9, 2  ;;  %v1264_v0 = vrot.slane %v5520_v9, 6 }
 0x44e   : > { %2770 = vst [vmem:[#allocation1 + $0x1] ss:$4 sm:$0xff] %v1151_v26  ;;  %v1258_v28 = vrot.slane %v3752_v50, 4  ;;  %v1259_v36 = vrot.slane %v3752_v50, 6  ;;  %v5543_v29 = vld [vmem:[%s3884_s17 + $0x8a] sm:$0x3f] }
 0x44f   : > { %2771 = vst [vmem:[#allocation1 + $0x2] ss:$4 sm:$0xff] %v1152_v55  ;;  %v1263_v55 = vrot.slane %v5520_v9, 4 }
 0x450   : > { %3029 = vrot.lane.b32.xlu2 %v2913_v20, %s3849_s25  ;;  %2772 = vst [vmem:[#allocation1 + $0x3] ss:$4 sm:$0xff] %v1153_v5  ;;  %v1257_v20 = vrot.slane %v3752_v50, 2  ;;  %v3739_v5 = vld [vmem:[%s3884_s17 + $0xd9] sm:$0x3f] }
 0x453   : > { %v2923_v42 = vld.sshfl [vmem:[#allocation1 + $0x20] sm:$0xff pattern:$0x73625140] }
 0x454   : > { %2928 = vst [vmem:[#allocation1 + $0x20] ss:$4 sm:$0xff] %v1251_v7  ;;  %v1168_v7 = vrot.slane %v5389_v34, 6  ;;  %v5540_v34 = vld [vmem:[%s3884_s17 + $0x82] sm:$0xff] }
 0x455   : > { %2929 = vst [vmem:[#allocation1 + $0x21] ss:$4 sm:$0xff] %v5494_v61 }
 0x456   : > { %2930 = vst [vmem:[#allocation1 + $0x22] ss:$4 sm:$0xff] %v1252_v39  ;;  %v5530_v39 = vld [vmem:[%s3884_s17 + $0x7a] sm:$0x3f] }
 0x457   : > { %v2777_v33 = vld.sshfl [vmem:[#allocation1] sm:$0xff pattern:$0x73625140]  ;;  %2931 = vst [vmem:[#allocation1 + $0x23] ss:$4 sm:$0xff] %v1253_v18 }
 0x458   : > { %2850 = vrot.lane.b32.xlu1 %v2777_v33, %s3848_s24  ;;  %2779 = vst [vmem:[#allocation1] ss:$4 sm:$0xff] %v1156_v21  ;;  %2842 = vrot.lane.b32.xlu2 %v2757_v1, %s3848_s24  ;;  %v1164_v1 = vrot.slane %v5385_v46, 2  ;;  %v1269_v33 = vrot.slane %v5540_v34, 6 }
 0x459   : > { %2780 = vst [vmem:[#allocation1 + $0x1] ss:$4 sm:$0xff] %v1157_v38 }
 0x45a   : > { %2781 = vst [vmem:[#allocation1 + $0x2] ss:$4 sm:$0xff] %v1158_v31  ;;  %v1268_v31 = vrot.slane %v5540_v34, 4 }
 0x45b   : > { %2782 = vst [vmem:[#allocation1 + $0x3] ss:$4 sm:$0xff] %v5366_v14 }
 0x45c   : > { %v2658_v18 = vpop.permute.xlu1 %2657 }
 0x45d   : > { %v5537_v38 = vsel %vm3232_vm5, %v5283_v53, %v2658_v18 }
 0x45e   : > { %v5512_v26 = vld.sshfl [vmem:[#allocation1 + $0x20] sm:$0xff pattern:$0x73625140] }
 0x45f   : > { %2938 = vst [vmem:[#allocation1 + $0x20] ss:$4 sm:$0xff] %v3752_v50 }
 0x460   : > { %2939 = vst [vmem:[#allocation1 + $0x21] ss:$4 sm:$0xff] %v1257_v20  ;;  %3033 = vrot.lane.b32.xlu2 %v2923_v42, %s3849_s25  ;;  %v1170_v42 = vrot.slane %v3739_v5, 4  ;;  %v1270_v20 = vrot.slane %v5543_v29, 2 }
 0x461   : > { %2940 = vst [vmem:[#allocation1 + $0x22] ss:$4 sm:$0xff] %v1258_v28  ;;  %v3741_v28 = vld [vmem:[%s3884_s17 + $0xe9] sm:$0x3f] }
 0x462   : > { %2941 = vst [vmem:[#allocation1 + $0x23] ss:$4 sm:$0xff] %v1259_v36  ;;  %v2787_v14 = vld.sshfl [vmem:[#allocation1] sm:$0xff pattern:$0x73625140]  ;;  %v1174_v36 = vrot.slane %v3741_v28, 2 }
 0x463   : > { %2854 = vrot.lane.b32.xlu1 %v2787_v14, %s3848_s24  ;;  %2789 = vst [vmem:[#allocation1] ss:$4 sm:$0xff] %v1162_v6  ;;  %v5558_v14 = vld [vmem:[%s3884_s17 + $0x92] sm:$0xff] }
 0x464   : > { %2790 = vst [vmem:[#allocation1 + $0x1] ss:$4 sm:$0xff] %v1163_v2 }
 0x465   : > { %2791 = vst [vmem:[#allocation1 + $0x2] ss:$4 sm:$0xff] %v5385_v46  ;;  %v1169_v46 = vrot.slane %v3739_v5, 2 }
 0x466   : > { %2792 = vst [vmem:[#allocation1 + $0x3] ss:$4 sm:$0xff] %v1164_v1  ;;  %v1175_v1 = vrot.slane %v3741_v28, 4 }
 0x467   : > { %v2662_v53 = vpop.permute.xlu1 %2661 }
 0x468   : > { %v5553_v6 = vsel %vm3232_vm5, %v5252_v40, %v2662_v53 }
 0x469   : > { %v2943_v23 = vld.sshfl [vmem:[#allocation1 + $0x20] sm:$0xff pattern:$0x73625140] }
 0x46a   : > { %3041 = vrot.lane.b32.xlu0 %v2943_v23, %s3849_s25  ;;  %2948 = vst [vmem:[#allocation1 + $0x20] ss:$4 sm:$0xff] %v1262_v51  ;;  %v3759_v51 = vld [vmem:[%s3884_s17 + $0x9a] sm:$0x3f] }
 0x46b   : > { %2949 = vst [vmem:[#allocation1 + $0x21] ss:$4 sm:$0xff] %v1263_v55  ;;  %v1274_v55 = vrot.slane %v5558_v14, 6  ;;  %v1276_v23 = vrot.slane %v3759_v51, 4 }
 0x46c   : > { %2950 = vst [vmem:[#allocation1 + $0x22] ss:$4 sm:$0xff] %v1264_v0  ;;  %v1275_v0 = vrot.slane %v3759_v51, 2 }
 0x46d   : > { %2951 = vst [vmem:[#allocation1 + $0x23] ss:$4 sm:$0xff] %v5530_v39  ;;  %v5533_v21 = vld.sshfl [vmem:[#allocation1] sm:$0xff pattern:$0x73625140] }
 0x46e   : > { %2799 = vst [vmem:[#allocation1] ss:$4 sm:$0xff] %v1168_v7  ;;  %v1180_v7 = vrot.slane %v5438_v60, 4 }
 0x46f   : > { %2800 = vst [vmem:[#allocation1 + $0x1] ss:$4 sm:$0xff] %v3739_v5  ;;  %v1179_v5 = vrot.slane %v5438_v60, 2  ;;  %v3761_v60 = vld [vmem:[%s3884_s17 + $0xaa] sm:$0x3f] }
 0x470   : > { %2801 = vst [vmem:[#allocation1 + $0x2] ss:$4 sm:$0xff] %v1169_v46 }
 0x471   : > { %2802 = vst [vmem:[#allocation1 + $0x3] ss:$4 sm:$0xff] %v1170_v42 }
 0x474   : > { %v2953_v50 = vld.sshfl [vmem:[#allocation1 + $0x20] sm:$0xff pattern:$0x73625140] }
 0x475   : > { %3045 = vrot.lane.b32.xlu0 %v2953_v50, %s3849_s25  ;;  %2958 = vst [vmem:[#allocation1 + $0x20] ss:$4 sm:$0xff] %v1268_v31  ;;  %v1281_v50 = vrot.slane %v3761_v60, 4 }
 0x476   : > { %2959 = vst [vmem:[#allocation1 + $0x21] ss:$4 sm:$0xff] %v1269_v33  ;;  %v1280_v33 = vrot.slane %v3761_v60, 2 }
 0x477   : > { %2960 = vst [vmem:[#allocation1 + $0x22] ss:$4 sm:$0xff] %v5543_v29 }
 0x478   : > { %v2807_v2 = vld.sshfl [vmem:[#allocation1] sm:$0xff pattern:$0x73625140]  ;;  %2961 = vst [vmem:[#allocation1 + $0x23] ss:$4 sm:$0xff] %v1270_v20 }
 0x479   : > { %2862 = vrot.lane.b32.xlu2 %v2807_v2, %s3848_s24  ;;  %2812 = vst [vmem:[#allocation1 + $0x3] ss:$4 sm:$0xff] %v5421_v8  ;;  %v2849_v8 = vpop.permute.xlu1 %2848  ;;  %v3744_v20 = vld [vmem:[%s3884_s17 + $0x22] sm:$0xff] }
 0x47a   : > { %2809 = vst [vmem:[#allocation1] ss:$4 sm:$0xff] %v3741_v28  ;;  %v5568_v18 = vsel %vm3258_vm6, %v5287_v59, %v2849_v8  ;;  %v5579_v59 = vld [vmem:[%s3884_s17 + $0xb2] sm:$0xff]  ;;  %v1238_v2 = vrot.slane %v3744_v20, 4 }
 0x47b   : > { %2810 = vst [vmem:[#allocation1 + $0x1] ss:$4 sm:$0xff] %v1174_v36 }
 0x47c   : > { %2811 = vst [vmem:[#allocation1 + $0x2] ss:$4 sm:$0xff] %v1175_v1 }
 0x47f   : > { %v5562_v40 = vld.sshfl [vmem:[#allocation1 + $0x20] sm:$0xff pattern:$0x73625140] }
 0x480   : > { %2968 = vst [vmem:[#allocation1 + $0x20] ss:$4 sm:$0xff] %v1274_v55  ;;  %v1239_v55 = vrot.slane %v3744_v20, 6 }
 0x481   : > { %2969 = vst [vmem:[#allocation1 + $0x21] ss:$4 sm:$0xff] %v3759_v51  ;;  %v5583_v1 = vpop.permute.xlu1 %2822 }
 0x482   : > { %2970 = vst [vmem:[#allocation1 + $0x22] ss:$4 sm:$0xff] %v1275_v0  ;;  %v2861_v46 = vpop.permute.xlu2 %2860  ;;  %v5591_v0 = vld [vmem:[%s3884_s17 + $0xba] sm:$0x3f] }
 0x483   : > { %2971 = vst [vmem:[#allocation1 + $0x23] ss:$4 sm:$0xff] %v1276_v23  ;;  %v2817_v42 = vld.sshfl [vmem:[#allocation1] sm:$0xff pattern:$0x73625140]  ;;  %v5572_v31 = vsel %vm3258_vm6, %v5395_v41, %v2861_v46  ;;  %v1237_v41 = vrot.slane %v3744_v20, 2 }
 0x484   : > { %2866 = vrot.lane.b32.xlu2 %v2817_v42, %s3848_s24  ;;  %2819 = vst [vmem:[#allocation1] ss:$4 sm:$0xff] %v1179_v5  ;;  %v5594_v23 = vld [vmem:[%s3884_s17 + $0xc2] sm:$0xff]  ;;  %v1285_v5 = vrot.slane %v5591_v0, 2  ;;  %v1243_v42 = vrot.slane %v5452_v32, 4 }
 0x485   : > { %2820 = vst [vmem:[#allocation1 + $0x1] ss:$4 sm:$0xff] %v1180_v7  ;;  %v1286_v7 = vrot.slane %v5591_v0, 4  ;;  %v1287_v46 = vrot.slane %v5594_v23, 2 }
 0x48a   : > { %v2973_v28 = vld.sshfl [vmem:[#allocation1 + $0x20] sm:$0xff pattern:$0x73625140]  ;;  %v2835_v36 = vpop.permute.xlu2 %2834 }
 0x48b   : > { %3053 = vrot.lane.b32.xlu0 %v2973_v28, %s3849_s25  ;;  %2978 = vst [vmem:[#allocation1 + $0x20] ss:$4 sm:$0xff] %v3761_v60  ;;  %v5587_v51 = vsel %vm3258_vm6, %v5409_v11, %v2835_v36  ;;  %v1242_v11 = vrot.slane %v5452_v32, 2  ;;  %v2853_v60 = vpop.permute.xlu1 %2852  ;;  %v5614_v36 = vld [vmem:[%s3884_s17 + $0xca] sm:$0x3f] }
 0x48c   : > { %v5581_v53 = vld.sshfl [vmem:[#allocation1] sm:$0xff pattern:$0x73625140]  ;;  %2979 = vst [vmem:[#allocation1 + $0x21] ss:$4 sm:$0xff] %v1280_v33 }
 0x48d   : > { %2980 = vst [vmem:[#allocation1 + $0x22] ss:$4 sm:$0xff] %v1281_v50  ;;  %v1244_v50 = vrot.slane %v5452_v32, 6  ;;  %v5617_v32 = vld [vmem:[%s3884_s17 + $0xd2] sm:$0xff] }
 0x48e   : > { %2981 = vst [vmem:[#allocation1 + $0x23] ss:$4 sm:$0xff] %v5579_v59 }
 0x48f   : > { %2897 = vst [vmem:[#allocation1] ss:$4 sm:$0xff] %v3744_v20  ;;  %v5606_v20 = vsel %vm3258_vm6, %v5362_v62, %v2853_v60  ;;  %v1291_v62 = vrot.slane %v5614_v36, 4 }
 0x490   : > { %2899 = vst [vmem:[#allocation1 + $0x1] ss:$4 sm:$0xff] %v1237_v41 }
 0x491   : > { %2901 = vst [vmem:[#allocation1 + $0x2] ss:$4 sm:$0xff] %v1238_v2  ;;  %v1292_v2 = vrot.slane %v5617_v32, 2 }
 0x492   : > { %2903 = vst [vmem:[#allocation1 + $0x3] ss:$4 sm:$0xff] %v1239_v55  ;;  %v2865_v33 = vpop.permute.xlu2 %2864 }
 0x493   : > { %v5610_v28 = vsel %vm3258_vm6, %v5414_v16, %v2865_v33  ;;  %v1293_v16 = vrot.slane %v5617_v32, 4 }
 0x495   : > { %v2983_v8 = vld.sshfl [vmem:[#allocation1 + $0x20] sm:$0xff pattern:$0x73625140] }
 0x496   : > { %3057 = vrot.lane.b32.xlu0 %v2983_v8, %s3849_s25  ;;  %2988 = vst [vmem:[#allocation1 + $0x20] ss:$4 sm:$0xff] %v1285_v5  ;;  %v1248_v5 = vrot.slane %v5469_v48, 4  ;;  %v5627_v8 = vpop.permute.xlu1 %2826 }
 0x497   : > { %2989 = vst [vmem:[#allocation1 + $0x21] ss:$4 sm:$0xff] %v1286_v7  ;;  %v1249_v7 = vrot.slane %v5469_v48, 6  ;;  %v3768_v48 = vld [vmem:[%s3884_s17 + $0xe2] sm:$0xff] }
 0x498   : > { %2990 = vst [vmem:[#allocation1 + $0x22] ss:$4 sm:$0xff] %v5594_v23  ;;  %v1297_v60 = vrot.slane %v3768_v48, 2  ;;  %v1298_v33 = vrot.slane %v3768_v48, 4 }
 0x499   : > { %2991 = vst [vmem:[#allocation1 + $0x23] ss:$4 sm:$0xff] %v1287_v46  ;;  %v2912_v41 = vld.sshfl [vmem:[#allocation1] sm:$0xff pattern:$0x73625140] }
 0x49a   : > { %3027 = vrot.lane.b32.xlu2 %v2912_v41, %s3849_s25  ;;  %2914 = vst [vmem:[#allocation1] ss:$4 sm:$0xff] %v1242_v11 }
 0x49b   : > { %2915 = vst [vmem:[#allocation1 + $0x1] ss:$4 sm:$0xff] %v1243_v42  ;;  %v1250_v42 = vrot.slane %v5491_v35, 2 }
 0x49c   : > { %2916 = vst [vmem:[#allocation1 + $0x2] ss:$4 sm:$0xff] %v1244_v50 }
 0x49d   : > { %2917 = vst [vmem:[#allocation1 + $0x3] ss:$4 sm:$0xff] %v5465_v3  ;;  %v2839_v3 = vpop.permute.xlu2 %2838 }
 0x49e   : > { %v5631_v46 = vsel %vm3258_vm6, %v5429_v37, %v2839_v3  ;;  %v2857_v50 = vpop.permute.xlu1 %2856  ;;  %v1299_v37 = vrot.slane %v3768_v48, 6 }
 0x4a0   : > { %v2993_v55 = vld.sshfl [vmem:[#allocation1 + $0x20] sm:$0xff pattern:$0x73625140] }
 0x4a1   : > { %3061 = vrot.lane.b32.xlu0 %v2993_v55, %s3849_s25  ;;  %2998 = vst [vmem:[#allocation1 + $0x20] ss:$4 sm:$0xff] %v1291_v62  ;;  %v5640_v55 = vsel %vm3258_vm6, %v5378_v12, %v2857_v50  ;;  %v5650_v12 = vld [vmem:[%s3884_s17 + $0xf2] sm:$0xff] }
 0x4a2   : > { %2999 = vst [vmem:[#allocation1 + $0x21] ss:$4 sm:$0xff] %v5617_v32 }
 0x4a3   : > { %3000 = vst [vmem:[#allocation1 + $0x22] ss:$4 sm:$0xff] %v1292_v2  ;;  %v3751_v2 = vld [vmem:[%s3884_s17 + $0x5a] sm:$0x3f] }
 0x4a4   : > { %3001 = vst [vmem:[#allocation1 + $0x23] ss:$4 sm:$0xff] %v1293_v16  ;;  %v2922_v11 = vld.sshfl [vmem:[#allocation1] sm:$0xff pattern:$0x73625140]  ;;  %v1256_v3 = vrot.slane %v3751_v2, 4 }
 0x4a5   : > { %3031 = vrot.lane.b32.xlu2 %v2922_v11, %s3849_s25  ;;  %2924 = vst [vmem:[#allocation1] ss:$4 sm:$0xff] %v1248_v5  ;;  %v2869_v41 = vpop.permute.xlu2 %2868  ;;  %v1254_v5 = vrot.slane %v5494_v61, 6  ;;  %v1302_v61 = vrot.slane %v5650_v12, 2  ;;  %v1303_v11 = vrot.slane %v5650_v12, 4 }
 0x4a6   : > { %2925 = vst [vmem:[#allocation1 + $0x1] ss:$4 sm:$0xff] %v1249_v7  ;;  %v5644_v16 = vsel %vm3258_vm6, %v5425_v58, %v2869_v41 }
 0x4a7   : > { %2926 = vst [vmem:[#allocation1 + $0x2] ss:$4 sm:$0xff] %v5491_v35  ;;  %v1255_v35 = vrot.slane %v3751_v2, 2 }
 0x4a8   : > { %2927 = vst [vmem:[#allocation1 + $0x3] ss:$4 sm:$0xff] %v1250_v42  ;;  %v1304_v42 = vrot.slane %v5650_v12, 6 }
 0x4ab   : > { %v3003_v62 = vld.sshfl [vmem:[#allocation1 + $0x20] sm:$0xff pattern:$0x73625140] }
 0x4ac   : > { %3065 = vrot.lane.b32.xlu1 %v3003_v62, %s3849_s25  ;;  %3008 = vst [vmem:[#allocation1 + $0x20] ss:$4 sm:$0xff] %v3768_v48 }
 0x4ad   : > { %3009 = vst [vmem:[#allocation1 + $0x21] ss:$4 sm:$0xff] %v1297_v60  ;;  %v5652_v58 = vpop.permute.xlu2 %3029  ;;  %v3753_v60 = vld [vmem:[%s3884_s17 + $0x6a] sm:$0x3f] }
 0x4ae   : > { %3010 = vst [vmem:[#allocation1 + $0x22] ss:$4 sm:$0xff] %v1298_v33  ;;  %v5660_v33 = vld [vmem:[%s3884_s17 + $0xfa] sm:$0x3f]  ;;  %v1260_v50 = vrot.slane %v3753_v60, 2  ;;  %v1261_v62 = vrot.slane %v3753_v60, 4 }
 0x4af   : > { %3011 = vst [vmem:[#allocation1 + $0x23] ss:$4 sm:$0xff] %v1299_v37  ;;  %v2932_v7 = vld.sshfl [vmem:[#allocation1] sm:$0xff pattern:$0x73625140] }
 0x4b0   : > { %3035 = vrot.lane.b32.xlu2 %v2932_v7, %s3849_s25  ;;  %2934 = vst [vmem:[#allocation1] ss:$4 sm:$0xff] %v1254_v5  ;;  %v1265_v5 = vrot.slane %v5530_v39, 2  ;;  %v1267_v7 = vrot.slane %v5540_v34, 2 }
 0x4b1   : > { %2935 = vst [vmem:[#allocation1 + $0x1] ss:$4 sm:$0xff] %v3751_v2 }
 0x4b2   : > { %2936 = vst [vmem:[#allocation1 + $0x2] ss:$4 sm:$0xff] %v1255_v35  ;;  %v5674_v35 = vpop.permute.xlu0 %2653 }
 0x4b3   : > { %2937 = vst [vmem:[#allocation1 + $0x3] ss:$4 sm:$0xff] %v1256_v3 }
 0x4b5   : > { %v2843_v37 = vpop.permute.xlu2 %2842 }
 0x4b6   : > { %v3013_v48 = vld.sshfl [vmem:[#allocation1 + $0x20] sm:$0xff pattern:$0x73625140]  ;;  %v5669_v2 = vsel %vm3258_vm6, %v5448_v22, %v2843_v37  ;;  %v5680_v22 = vpop.permute.xlu1 %2830 }
 0x4b7   : > { %3069 = vrot.lane.b32.xlu1 %v3013_v48, %s3849_s25  ;;  %3018 = vst [vmem:[#allocation1 + $0x20] ss:$4 sm:$0xff] %v1302_v61 }
 0x4b8   : > { %3019 = vst [vmem:[#allocation1 + $0x21] ss:$4 sm:$0xff] %v1303_v11  ;;  %2870 = vrot.lane.b32.xlu2 %v5581_v53, %s3848_s24  ;;  %v1271_v11 = vrot.slane %v5543_v29, 4  ;;  %v3760_v29 = vld [vmem:[%s3884_s17 + $0xa2] sm:$0xff] }
 0x4b9   : > { %3020 = vst [vmem:[#allocation1 + $0x22] ss:$4 sm:$0xff] %v1304_v42  ;;  %v1272_v42 = vrot.slane %v5558_v14, 2 }
 0x4ba   : > { %3021 = vst [vmem:[#allocation1 + $0x23] ss:$4 sm:$0xff] %v5660_v33  ;;  %v2942_v41 = vld.sshfl [vmem:[#allocation1] sm:$0xff pattern:$0x73625140] }
 0x4bb   : > { %3039 = vrot.lane.b32.xlu0 %v2942_v41, %s3849_s25  ;;  %2947 = vst [vmem:[#allocation1 + $0x3] ss:$4 sm:$0xff] %v5520_v9  ;;  %v1266_v9 = vrot.slane %v5530_v39, 4  ;;  %v1277_v41 = vrot.slane %v3760_v29, 2 }
 0x4bc   : > { %2944 = vst [vmem:[#allocation1] ss:$4 sm:$0xff] %v3753_v60  ;;  %v1273_v60 = vrot.slane %v5558_v14, 4 }
 0x4bd   : > { %2945 = vst [vmem:[#allocation1 + $0x1] ss:$4 sm:$0xff] %v1260_v50 }
 0x4be   : > { %2946 = vst [vmem:[#allocation1 + $0x2] ss:$4 sm:$0xff] %v1261_v62  ;;  %v1278_v62 = vrot.slane %v3760_v29, 4 }
 0x4bf   : > { %v2847_v61 = vpop.permute.xlu0 %2846 }
 0x4c0   : > { %2627 = vrot.lane.b32.xlu2 %v5036_v24, %s3847_s23  ;;  %v5685_v24 = vpop.permute.xlu2 %3033  ;;  %v5689_v39 = vsel %vm3258_vm6, %v5399_v44, %v2847_v61  ;;  %v1288_v61 = vrot.slane %v5594_v23, 4 }
 0x4c1   : > { %v3023_v53 = vld.sshfl [vmem:[#allocation1 + $0x20] sm:$0xff pattern:$0x73625140] }
 0x4c2   : > { %3073 = vrot.lane.b32.xlu1 %v3023_v53, %s3849_s25  ;;  %v1279_v53 = vrot.slane %v3760_v29, 6 }
 0x4c5   : > { %v2952_v3 = vld.sshfl [vmem:[#allocation1] sm:$0xff pattern:$0x73625140] }
 0x4c6   : > { %3043 = vrot.lane.b32.xlu0 %v2952_v3, %s3849_s25  ;;  %2954 = vst [vmem:[#allocation1] ss:$4 sm:$0xff] %v1265_v5  ;;  %v1282_v5 = vrot.slane %v5579_v59, 2  ;;  %v3314_v3 = vld [vmem:[%s5926_s1 + $0x20] sm:$0xf] }
 0x4c7   : > { %2955 = vst [vmem:[#allocation1 + $0x1] ss:$4 sm:$0xff] %v1266_v9  ;;  %v1284_v9 = vrot.slane %v5579_v59, 6  ;;  %3772 = vmatpush.msk.msra.mxu0 %vm3395_vm7, %v3314_v3  ;;  %3803 = vmatpush.msk.msra.mxu3 %vm3395_vm7, %v3314_v3 }
 0x4c8   : > { %2956 = vst [vmem:[#allocation1 + $0x2] ss:$4 sm:$0xff] %v5540_v34  ;;  %2844 = vrot.lane.b32.xlu2 %v5348_v25, %s3848_s24  ;;  %3801 = vmatpush.msk.msra.mxu1 %vm3395_vm7, %v3314_v3 }
 0x4c9   : > { %2957 = vst [vmem:[#allocation1 + $0x3] ss:$4 sm:$0xff] %v1267_v7  ;;  %3802 = vmatpush.msk.msra.mxu2 %vm3395_vm7, %v3314_v3 }
 0x4ca   : > { %v2851_v48 = vpop.permute.xlu1 %2850 }
 0x4cb   : > { %v5696_v25 = vsel %vm3258_vm6, %v5483_v13, %v2851_v48  ;;  %v1290_v48 = vrot.slane %v5614_v36, 2 }
 0x4d0   : > { %v2962_v34 = vld.sshfl [vmem:[#allocation1] sm:$0xff pattern:$0x73625140] }
 0x4d1   : > { %2964 = vst [vmem:[#allocation1] ss:$4 sm:$0xff] %v1271_v11  ;;  %v3311_v11 = vld [vmem:[%s5926_s1 + $0x8] sm:$0xff] }
 0x4d2   : > { %2965 = vst [vmem:[#allocation1 + $0x1] ss:$4 sm:$0xff] %v5558_v14 }
 0x4d3   : > { %2966 = vst [vmem:[#allocation1 + $0x2] ss:$4 sm:$0xff] %v1272_v42  ;;  %v2863_v50 = vpop.permute.xlu2 %2862  ;;  %v3310_v42 = vld [vmem:[%s5926_s1] sm:$0xff] }
 0x4d4   : > { %2967 = vst [vmem:[#allocation1 + $0x3] ss:$4 sm:$0xff] %v1273_v60  ;;  %v5701_v44 = vsel %vm3258_vm6, %v5537_v38, %v2863_v50  ;;  %v1283_v38 = vrot.slane %v5579_v59, 4 }
 0x4db   : > { %v2972_v37 = vld.sshfl [vmem:[#allocation1] sm:$0xff pattern:$0x73625140] }
 0x4dc   : > { %3051 = vrot.lane.b32.xlu1 %v2972_v37, %s3849_s25  ;;  %2974 = vst [vmem:[#allocation1] ss:$4 sm:$0xff] %v3760_v29  ;;  %v5725_v59 = vpop.permute.xlu0 %3041 }
 0x4dd   : > { %2975 = vst [vmem:[#allocation1 + $0x1] ss:$4 sm:$0xff] %v1277_v41  ;;  %v3767_v41 = vld [vmem:[%s3884_s17 + $0xda] sm:$0x3f] }
 0x4de   : > { %2976 = vst [vmem:[#allocation1 + $0x2] ss:$4 sm:$0xff] %v1278_v62  ;;  %v2867_v13 = vpop.permute.xlu2 %2866  ;;  %v1294_v62 = vrot.slane %v5617_v32, 6  ;;  %v1296_v37 = vrot.slane %v3767_v41, 4 }
 0x4df   : > { %2977 = vst [vmem:[#allocation1 + $0x3] ss:$4 sm:$0xff] %v1279_v53  ;;  %v5707_v14 = vsel %vm3258_vm6, %v5553_v6, %v2867_v13  ;;  %v3313_v6 = vld [vmem:[%s5926_s1 + $0x18] sm:$0xff] }
 0x4e0   : > { %3411 = vmatpush.msra.mxu0 %v3313_v6  ;;  %3806 = vmatpush.msra.mxu3 %v3313_v6 }
 0x4e1   : > { %3804 = vmatpush.msra.mxu1 %v3313_v6  ;;  %3805 = vmatpush.msra.mxu2 %v3313_v6 }
 0x4e4   : > { %2665 = vrot.lane.b32.xlu1 %v5350_v54, %s3847_s23  ;;  %v3312_v54 = vld [vmem:[%s5926_s1 + $0x10] sm:$0xff] }
 0x4e5   : > { %3412 = vmatpush.msra.mxu0 %v3312_v54  ;;  %3809 = vmatpush.msra.mxu3 %v3312_v54 }
 0x4e6   : > { %v2982_v7 = vld.sshfl [vmem:[#allocation1] sm:$0xff pattern:$0x73625140]  ;;  %3807 = vmatpush.msra.mxu1 %v3312_v54  ;;  %3808 = vmatpush.msra.mxu2 %v3312_v54 }
 0x4e7   : > { %3055 = vrot.lane.b32.xlu0 %v2982_v7, %s3849_s25  ;;  %2984 = vst [vmem:[#allocation1] ss:$4 sm:$0xff] %v1282_v5  ;;  %3413 = vmatpush.msra.mxu0 %v3311_v11  ;;  %v5741_v50 = vpop.permute.xlu0 %3045 }
 0x4e8   : > { %2985 = vst [vmem:[#allocation1 + $0x1] ss:$4 sm:$0xff] %v1283_v38  ;;  %3812 = vmatpush.msra.mxu3 %v3311_v11  ;;  %3810 = vmatpush.msra.mxu1 %v3311_v11  ;;  %v3769_v38 = vld [vmem:[%s3884_s17 + $0xea] sm:$0x3f] }
 0x4e9   : > { %2986 = vst [vmem:[#allocation1 + $0x2] ss:$4 sm:$0xff] %v1284_v9  ;;  %3811 = vmatpush.msra.mxu2 %v3311_v11  ;;  %3414 = vmatpush.msra.mxu0 %v3310_v42  ;;  %v1300_v9 = vrot.slane %v3769_v38, 2  ;;  %v3292_v11 = vsel %vm3284_vm9, %v5462_v4, %v5725_v59 }
 0x4ea   : > { %2987 = vst [vmem:[#allocation1 + $0x3] ss:$4 sm:$0xff] %v5591_v0  ;;  %v1289_v0 = vrot.slane %v5594_v23, 6  ;;  %3815 = vmatpush.msra.mxu3 %v3310_v42  ;;  %v3259_v23 = vsel %vm3258_vm6, %v5307_v17, %v5583_v1  ;;  %3813 = vmatpush.msra.mxu1 %v3310_v42  ;;  %v1295_v17 = vrot.slane %v3767_v41, 2  ;;  %v3260_v1 = vsel %vm3258_vm6, %v5177_v45, %v5456_v52 }
 0x4eb   : > { %3814 = vmatpush.msra.mxu2 %v3310_v42  ;;  %v3286_v13 = vsel %vm3284_vm9, %v3260_v1, %v5652_v58  ;;  %v3261_v45 = vsel %vm3258_vm6, %v5333_v63, %v5627_v8  ;;  %v3288_v63 = vsel %vm3284_vm9, %v5479_v49, %v5685_v24  ;;  %v1306_v8 = vrot.slane %v5660_v33, 4 }
 0x4ec   : > { %v3263_v49 = vsel %vm3258_vm6, %v5345_v47, %v5680_v22 }
 0x4ef   : > { %3047 = vrot.lane.b32.xlu0 %v2962_v34, %s3849_s25 }
 0x4f1   : > { %v2992_v60 = vld.sshfl [vmem:[#allocation1] sm:$0xff pattern:$0x73625140] }
 0x4f2   : > { %2994 = vst [vmem:[#allocation1] ss:$4 sm:$0xff] %v1288_v61 }
 0x4f3   : > { %2995 = vst [vmem:[#allocation1 + $0x1] ss:$4 sm:$0xff] %v1289_v0 }
 0x4f4   : > { %2996 = vst [vmem:[#allocation1 + $0x2] ss:$4 sm:$0xff] %v5614_v36  ;;  %v3028_v34 = vpop.permute.xlu2 %3027 }
 0x4f5   : > { %2997 = vst [vmem:[#allocation1 + $0x3] ss:$4 sm:$0xff] %v1290_v48  ;;  %v3285_v29 = vsel %vm3284_vm9, %v3259_v23, %v3028_v34 }
 0x4f6   : > { %3773 = vmatmul.msk.f32.vlgmr.msra.gmra.mxu0 %vm3319_vm8, %v3285_v29 }
 0x4f7   : > { %3059 = vrot.lane.b32.xlu0 %v2992_v60, %s3849_s25 }
 0x4fc   : > { %v3002_v36 = vld.sshfl [vmem:[#allocation1] sm:$0xff pattern:$0x73625140] }
 0x4fd   : > { %3004 = vst [vmem:[#allocation1] ss:$4 sm:$0xff] %v1294_v62  ;;  %v3054_v53 = vpop.permute.xlu0 %3053 }
 0x4fe   : > { %3005 = vst [vmem:[#allocation1 + $0x1] ss:$4 sm:$0xff] %v3767_v41  ;;  %3774 = vmatmul.msk.f32.gmra.mxu0 %vm3319_vm8, %v3286_v13  ;;  %v3298_v5 = vsel %vm3284_vm9, %v5568_v18, %v3054_v53  ;;  %v1301_v18 = vrot.slane %v3769_v38, 4 }
 0x4ff   : > { %3063 = vrot.lane.b32.xlu0 %v3002_v36, %s3849_s25  ;;  %3006 = vst [vmem:[#allocation1 + $0x2] ss:$4 sm:$0xff] %v1295_v17  ;;  %v3032_v32 = vpop.permute.xlu2 %3031  ;;  %v3251_v36 = vsel %vm3232_vm5, %v5271_v19, %v5674_v35 }
 0x500   : > { %3007 = vst [vmem:[#allocation1 + $0x3] ss:$4 sm:$0xff] %v1296_v37  ;;  %v3287_v52 = vsel %vm3284_vm9, %v3261_v45, %v3032_v32 }
 0x506   : > { %3775 = vmatmul.msk.f32.gmra.mxu0 %vm3319_vm8, %v3287_v52 }
 0x507   : > { %v3012_v58 = vld.sshfl [vmem:[#allocation1] sm:$0xff pattern:$0x73625140]  ;;  %2639 = vrot.lane.b32.xlu0 %v5103_v10, %s3847_s23  ;;  %v1305_v10 = vrot.slane %v5660_v33, 2 }
 0x508   : > { %3067 = vrot.lane.b32.xlu1 %v3012_v58, %s3849_s25  ;;  %3017 = vst [vmem:[#allocation1 + $0x3] ss:$4 sm:$0xff] %v5650_v12  ;;  %v3058_v7 = vpop.permute.xlu0 %3057 }
 0x509   : > { %3014 = vst [vmem:[#allocation1] ss:$4 sm:$0xff] %v3769_v38  ;;  %v3300_v3 = vsel %vm3284_vm9, %v5606_v20, %v3058_v7 }
 0x50a   : > { %3015 = vst [vmem:[#allocation1 + $0x1] ss:$4 sm:$0xff] %v1300_v9  ;;  %v3036_v20 = vpop.permute.xlu2 %3035 }
 0x50b   : > { %3016 = vst [vmem:[#allocation1 + $0x2] ss:$4 sm:$0xff] %v1301_v18  ;;  %v3289_v54 = vsel %vm3284_vm9, %v3263_v49, %v3036_v20 }
 0x50e   : > { %3776 = vmatmul.msk.f32.gmra.mxu0 %vm3319_vm8, %v3288_v63 }
 0x50f   : > { %3037 = vrot.lane.b32.xlu0 %v5512_v26, %s3849_s25  ;;  %v2855_v26 = vpop.permute.xlu1 %2854 }
 0x510   : > { %2858 = vrot.lane.b32.xlu1 %v5533_v21, %s3848_s24 }
 0x512   : > { %v3022_v12 = vld.sshfl [vmem:[#allocation1] sm:$0xff pattern:$0x73625140]  ;;  %v2871_v32 = vpop.permute.xlu2 %2870 }
 0x513   : > { %3024 = vst [vmem:[#allocation1] ss:$4 sm:$0xff] %v1305_v10  ;;  %v3062_v6 = vpop.permute.xlu0 %3061 }
 0x514   : > { %3025 = vst [vmem:[#allocation1 + $0x1] ss:$4 sm:$0xff] %v1306_v8  ;;  %v3302_v24 = vsel %vm3284_vm9, %v5640_v55, %v3062_v6 }
 0x516   : > { %3777 = vmatmul.msk.f32.gmra.mxu0 %vm3319_vm8, %v3289_v54 }
 0x518   : > { %3071 = vrot.lane.b32.xlu1 %v3022_v12, %s3849_s25 }
 0x51a   : > { %v2628_v18 = vpop.permute.xlu2 %2627 }
 0x51b   : > { %v3026_v47 = vld.sshfl [vmem:[#allocation1] sm:$0xff pattern:$0x73625140] }
 0x51e   : > { %v3066_v21 = vpop.permute.xlu1 %3065 }
 0x51f   : > { %v3304_v33 = vsel %vm3284_vm9, %v5572_v31, %v3066_v21 }
 0x520   : > { %2832 = vrot.lane.b32.xlu1 %v5277_v43, %s3848_s24  ;;  %3792 = vmatmul.msk.f32.vlgmr.msra.gmra.mxu3 %vm3319_vm8, %v3304_v33 }
 0x528   : > { %3075 = vrot.lane.b32.xlu1 %v3026_v47, %s3849_s25 }
 0x529   : > { %v3070_v55 = vpop.permute.xlu1 %3069 }
 0x52a   : > { %v3306_v22 = vsel %vm3284_vm9, %v5610_v28, %v3070_v55 }
 0x52d   : > { %v3040_v61 = vpop.permute.xlu0 %3039 }
 0x52e   : > { %v3291_v0 = vsel %vm3284_vm9, %v5587_v51, %v3040_v61 }
 0x52f   : > { %3779 = vmatmul.msk.f32.vlgmr.msra.gmra.mxu1 %vm3319_vm8, %v3291_v0 }
 0x530   : > { %3049 = vrot.lane.b32.xlu1 %v5562_v40, %s3849_s25  ;;  %v3294_v40 = vsel %vm3284_vm9, %v5487_v27, %v5741_v50 }
 0x534   : > { %v3074_v31 = vpop.permute.xlu1 %3073 }
 0x535   : > { %v5802_v43 = vsel %vm3284_vm9, %v5644_v16, %v3074_v31 }
 0x537   : > { %3780 = vmatmul.msk.f32.gmra.mxu1 %vm3319_vm8, %v3292_v11 }
 0x538   : > { %v3044_v28 = vpop.permute.xlu0 %3043 }
 0x539   : > { %v3293_v51 = vsel %vm3284_vm9, %v5631_v46, %v3044_v28 }
 0x53f   : > { %3781 = vmatmul.msk.f32.gmra.mxu1 %vm3319_vm8, %v3293_v51 }
 0x547   : > { %3782 = vmatmul.msk.f32.gmra.mxu1 %vm3319_vm8, %v3294_v40 }
 0x54e   : > { %v3052_v16 = vpop.permute.xlu1 %3051 }
 0x54f   : > { %v3297_v42 = vsel %vm3284_vm9, %v5689_v39, %v3052_v16  ;;  %v3275_v39 = vsel %vm3258_vm6, %v5506_v30, %v2855_v26  ;;  %v2845_v26 = vpop.permute.xlu2 %2844 }
 0x550   : > { %3785 = vmatmul.msk.f32.vlgmr.msra.gmra.mxu2 %vm3319_vm8, %v3297_v42 }
 0x556   : > { %v2666_v23 = vpop.permute.xlu1 %2665 }
 0x557   : > { %v3257_v6 = vsel %vm3232_vm5, %v5327_v57, %v2666_v23 }
 0x558   : > { %3786 = vmatmul.msk.f32.gmra.mxu2 %vm3319_vm8, %v3298_v5  ;;  %v3283_v49 = vsel %vm3258_vm6, %v3257_v6, %v2871_v32 }
 0x559   : > { %v3056_v4 = vpop.permute.xlu0 %3055 }
 0x55a   : > { %v3299_v46 = vsel %vm3284_vm9, %v5696_v25, %v3056_v4  ;;  %v5833_v25 = vld [vmem:[%s5927_s2] ss:$0 sm:$0xff] }
 0x560   : > { %3787 = vmatmul.msk.f32.gmra.mxu2 %vm3319_vm8, %v3299_v46 }
 0x561   : > { %v3048_v59 = vpop.permute.xlu0 %3047 }
 0x562   : > { %v3295_v27 = vsel %vm3284_vm9, %v5669_v2, %v3048_v59 }
 0x563   : > { %3783 = vmatmul.msk.f32.gmra.mxu1 %vm3319_vm8, %v3295_v27 }
 0x568   : > { %3788 = vmatmul.msk.f32.gmra.mxu2 %vm3319_vm8, %v3300_v3  ;;  %v3238_v3 = vsel %vm3232_vm5, %v5015_v56, %v2628_v18 }
 0x569   : > { %v3060_v48 = vpop.permute.xlu0 %3059 }
 0x56a   : > { %v3301_v60 = vsel %vm3284_vm9, %v3275_v39, %v3060_v48 }
 0x570   : > { %3789 = vmatmul.msk.f32.gmra.mxu2 %vm3319_vm8, %v3301_v60 }
 0x571   : > { %v3064_v1 = vpop.permute.xlu0 %3063 }
 0x573   : > { %v3416_v2 = vpop.f32.mrf.mxu0 }
 0x574   : > { %v3417_v34 = vadd.f32 %v5833_v25, %v3416_v2 }
 0x576   : > { %v3491_v30 = vmax.f32 %v3417_v34, 0.0 }
 0x578   : > { %3790 = vmatmul.msk.f32.gmra.mxu2 %vm3319_vm8, %v3302_v24  ;;  %3516 = vst [vmem:[%s5840_s16] sm:$0xff] %v3491_v30 }
 0x579   : > { %v2640_v45 = vpop.permute.xlu0 %2639 }
 0x57a   : > { %v3068_v50 = vpop.permute.xlu1 %3067  ;;  %v3244_v54 = vsel %vm3232_vm5, %v5092_v15, %v2640_v45 }
 0x57b   : > { %v3305_v29 = vsel %vm3284_vm9, %v5701_v44, %v3068_v50  ;;  %v3419_v41 = vpop.f32.mrf.mxu0  ;;  %v3270_v21 = vsel %vm3258_vm6, %v3244_v54, %v2845_v26 }
 0x57c   : > { %3793 = vmatmul.msk.f32.gmra.mxu3 %vm3319_vm8, %v3305_v29  ;;  %v3420_v62 = vadd.f32 %v5833_v25, %v3419_v41 }
 0x57e   : > { %v3492_v17 = vmax.f32 %v3420_v62, 0.0 }
 0x580   : > { %3517 = vst [vmem:[%s5840_s16 + $0x8] sm:$0xff] %v3492_v17 }
 0x581   : > { %v3038_v7 = vpop.permute.xlu0 %3037 }
 0x582   : > { %v2859_v37 = vpop.permute.xlu1 %2858 }
 0x583   : > { %v3277_v53 = vsel %vm3258_vm6, %v3251_v36, %v2859_v37  ;;  %v3422_v13 = vpop.f32.mrf.mxu0 }
 0x584   : > { %3794 = vmatmul.msk.f32.gmra.mxu3 %vm3319_vm8, %v3306_v22  ;;  %v3303_v44 = vsel %vm3284_vm9, %v3277_v53, %v3064_v1  ;;  %v3423_v5 = vadd.f32 %v5833_v25, %v3422_v13 }
 0x585   : > { %3791 = vmatmul.msk.f32.gmra.mxu2 %vm3319_vm8, %v3303_v44 }
 0x586   : > { %v3493_v38 = vmax.f32 %v3423_v5, 0.0 }
 0x588   : > { %3518 = vst [vmem:[%s5840_s16 + $0x10] sm:$0xff] %v3493_v38 }
 0x58a   : > { %v3072_v52 = vpop.permute.xlu1 %3071 }
 0x58b   : > { %v3307_v19 = vsel %vm3284_vm9, %v5707_v14, %v3072_v52  ;;  %v3425_v35 = vpop.f32.mrf.mxu0 }
 0x58c   : > { %3795 = vmatmul.msk.f32.gmra.mxu3 %vm3319_vm8, %v3307_v19  ;;  %v3426_v9 = vadd.f32 %v5833_v25, %v3425_v35 }
 0x58e   : > { %v3494_v58 = vmax.f32 %v3426_v9, 0.0 }
 0x590   : > { %3519 = vst [vmem:[%s5840_s16 + $0x18] sm:$0xff] %v3494_v58 }
 0x592   : > { %v2833_v63 = vpop.permute.xlu1 %2832 }
 0x593   : > { %v3264_v10 = vsel %vm3258_vm6, %v3238_v3, %v2833_v63  ;;  %v3428_v8 = vpop.f32.mrf.mxu0 }
 0x594   : > { %3796 = vmatmul.msk.f32.gmra.mxu3 %vm3319_vm8, %v5802_v43  ;;  %v3290_v14 = vsel %vm3284_vm9, %v3264_v10, %v3038_v7  ;;  %v3429_v12 = vadd.f32 %v5833_v25, %v3428_v8 }
 0x595   : > { %3778 = vmatmul.msk.f32.gmra.mxu0 %vm3319_vm8, %v3290_v14 }
 0x596   : > { %v3495_v20 = vmax.f32 %v3429_v12, 0.0 }
 0x598   : > { %3520 = vst [vmem:[%s5840_s16 + $0x20] sm:$0xff] %v3495_v20 }
 0x59a   : > { %v3076_v56 = vpop.permute.xlu1 %3075 }
 0x59b   : > { %v3309_v24 = vsel %vm3284_vm9, %v3283_v49, %v3076_v56 }
 0x59c   : > { %3797 = vmatmul.msk.f32.gmra.mxu3 %vm3319_vm8, %v3309_v24 }
 0x5a2   : > { %v3050_v33 = vpop.permute.xlu1 %3049 }
 0x5a3   : > { %v3296_v47 = vsel %vm3284_vm9, %v3270_v21, %v3050_v33  ;;  %v3473_v57 = vpop.f32.mrf.mxu3 }
 0x5a4   : > { %3784 = vmatmul.msk.f32.gmra.mxu1 %vm3319_vm8, %v3296_v47  ;;  %v3474_v55 = vadd.f32 %v5833_v25, %v3473_v57 }
 0x5a6   : > { %v3510_v22 = vmax.f32 %v3474_v55, 0.0 }
 0x5a8   : > { %3535 = vst [vmem:[%s5840_s16 + $0x98] sm:$0xff] %v3510_v22 }
 0x5ac   : > { %v3434_v61 = vpop.f32.mrf.mxu1 }
 0x5ad   : > { %v3435_v0 = vadd.f32 %v5833_v25, %v3434_v61 }
 0x5af   : > { %v3497_v15 = vmax.f32 %v3435_v0, 0.0 }
 0x5b1   : > { %3522 = vst [vmem:[%s5840_s16 + $0x30] sm:$0xff] %v3497_v15 }
 0x5b4   : > { %v3437_v31 = vpop.f32.mrf.mxu1 }
 0x5b5   : > { %v3438_v43 = vadd.f32 %v5833_v25, %v3437_v31 }
 0x5b7   : > { %v3498_v11 = vmax.f32 %v3438_v43, 0.0 }
 0x5b9   : > { %3523 = vst [vmem:[%s5840_s16 + $0x38] sm:$0xff] %v3498_v11 }
 0x5bc   : > { %v3440_v28 = vpop.f32.mrf.mxu1 }
 0x5bd   : > { %v3441_v51 = vadd.f32 %v5833_v25, %v3440_v28 }
 0x5bf   : > { %v3499_v40 = vmax.f32 %v3441_v51, 0.0 }
 0x5c1   : > { %3524 = vst [vmem:[%s5840_s16 + $0x40] sm:$0xff] %v3499_v40 }
 0x5c4   : > { %v3443_v16 = vpop.f32.mrf.mxu1 }
 0x5c5   : > { %v3444_v42 = vadd.f32 %v5833_v25, %v3443_v16 }
 0x5c7   : > { %v3500_v4 = vmax.f32 %v3444_v42, 0.0 }
 0x5c9   : > { %3525 = vst [vmem:[%s5840_s16 + $0x48] sm:$0xff] %v3500_v4 }
 0x5d3   : > { %v3452_v46 = vpop.f32.mrf.mxu2 }
 0x5d4   : > { %v3453_v59 = vadd.f32 %v5833_v25, %v3452_v46 }
 0x5d6   : > { %v3503_v27 = vmax.f32 %v3453_v59, 0.0 }
 0x5d8   : > { %3528 = vst [vmem:[%s5840_s16 + $0x60] sm:$0xff] %v3503_v27 }
 0x5db   : > { %v3455_v48 = vpop.f32.mrf.mxu2 }
 0x5dc   : > { %v3456_v39 = vadd.f32 %v5833_v25, %v3455_v48 }
 0x5de   : > { %v3504_v60 = vmax.f32 %v3456_v39, 0.0 }
 0x5e0   : > { %3529 = vst [vmem:[%s5840_s16 + $0x68] sm:$0xff] %v3504_v60  ;;  %v3446_v23 = vpop.f32.mrf.mxu1 }
 0x5e1   : > { %v3447_v2 = vadd.f32 %v5833_v25, %v3446_v23 }
 0x5e3   : > { %v3501_v34 = vmax.f32 %v3447_v2, 0.0  ;;  %v3458_v30 = vpop.f32.mrf.mxu2 }
 0x5e4   : > { %v3459_v50 = vadd.f32 %v5833_v25, %v3458_v30 }
 0x5e5   : > { %3526 = vst [vmem:[%s5840_s16 + $0x50] sm:$0xff] %v3501_v34 }
 0x5e6   : > { %v3505_v29 = vmax.f32 %v3459_v50, 0.0 }
 0x5e8   : > { %3530 = vst [vmem:[%s5840_s16 + $0x70] sm:$0xff] %v3505_v29 }
 0x5eb   : > { %v3461_v41 = vpop.f32.mrf.mxu2 }
 0x5ec   : > { %v3462_v62 = vadd.f32 %v5833_v25, %v3461_v41 }
 0x5ee   : > { %v3506_v17 = vmax.f32 %v3462_v62, 0.0 }
 0x5f0   : > { %3531 = vst [vmem:[%s5840_s16 + $0x78] sm:$0xff] %v3506_v17 }
 0x5f3   : > { %v3464_v1 = vpop.f32.mrf.mxu2 }
 0x5f4   : > { %v3465_v36 = vadd.f32 %v5833_v25, %v3464_v1 }
 0x5f6   : > { %v3507_v37 = vmax.f32 %v3465_v36, 0.0 }
 0x5f8   : > { %3532 = vst [vmem:[%s5840_s16 + $0x80] sm:$0xff] %v3507_v37 }
 0x5fb   : > { %v3467_v53 = vpop.f32.mrf.mxu2 }
 0x5fc   : > { %v3468_v13 = vadd.f32 %v5833_v25, %v3467_v53 }
 0x5fe   : > { %v3508_v44 = vmax.f32 %v3468_v13, 0.0 }
 0x5ff   : > { %v3476_v5 = vpop.f32.mrf.mxu3 }
 0x600   : > { %v3477_v32 = vadd.f32 %v5833_v25, %v3476_v5  ;;  %3533 = vst [vmem:[%s5840_s16 + $0x88] sm:$0xff] %v3508_v44 }
 0x602   : > { %v3511_v38 = vmax.f32 %v3477_v32, 0.0 }
 0x604   : > { %3536 = vst [vmem:[%s5840_s16 + $0xa0] sm:$0xff] %v3511_v38 }
 0x607   : > { %v3479_v45 = vpop.f32.mrf.mxu3 }
 0x608   : > { %v3480_v52 = vadd.f32 %v5833_v25, %v3479_v45  ;;  %v3470_v19 = vpop.f32.mrf.mxu2 }
 0x609   : > { %v3471_v35 = vadd.f32 %v5833_v25, %v3470_v19 }
 0x60a   : > { %v3512_v9 = vmax.f32 %v3480_v52, 0.0 }
 0x60b   : > { %v3509_v58 = vmax.f32 %v3471_v35, 0.0 }
 0x60c   : > { %3537 = vst [vmem:[%s5840_s16 + $0xa8] sm:$0xff] %v3512_v9 }
 0x60d   : > { %3534 = vst [vmem:[%s5840_s16 + $0x90] sm:$0xff] %v3509_v58 }
 0x60f   : > { %v3482_v18 = vpop.f32.mrf.mxu3 }
 0x610   : > { %v3483_v7 = vadd.f32 %v5833_v25, %v3482_v18 }
 0x612   : > { %v3513_v3 = vmax.f32 %v3483_v7, 0.0  ;;  %v3431_v63 = vpop.f32.mrf.mxu0 }
 0x613   : > { %v3432_v10 = vadd.f32 %v5833_v25, %v3431_v63 }
 0x614   : > { %3538 = vst [vmem:[%s5840_s16 + $0xb0] sm:$0xff] %v3513_v3 }
 0x615   : > { %v3496_v8 = vmax.f32 %v3432_v10, 0.0 }
 0x617   : > { %3521 = vst [vmem:[%s5840_s16 + $0x28] sm:$0xff] %v3496_v8  ;;  %v3485_v14 = vpop.f32.mrf.mxu3 }
 0x618   : > { %v3486_v12 = vadd.f32 %v5833_v25, %v3485_v14 }
 0x61a   : > { %v3514_v20 = vmax.f32 %v3486_v12, 0.0 }
 0x61c   : > { %3539 = vst [vmem:[%s5840_s16 + $0xb8] sm:$0xff] %v3514_v20 }
 0x61f   : > { %v3488_v6 = vpop.f32.mrf.mxu3 }
 0x620   : > { %v3489_v56 = vadd.f32 %v5833_v25, %v3488_v6 }
 0x621   : > { %v3449_v49 = vpop.f32.mrf.mxu1 }
 0x622   : > { %v3515_v24 = vmax.f32 %v3489_v56, 0.0  ;;  %v3450_v54 = vadd.f32 %v5833_v25, %v3449_v49 }
 0x624   : > { %3540 = vst [vmem:[%s5840_s16 + $0xc0] sm:$0xf] %v3515_v24  ;;  %v3502_v26 = vmax.f32 %v3450_v54, 0.0 }
 0x626   : > { %3527 = vst [vmem:[%s5840_s16 + $0x58] sm:$0xff] %v3502_v26 }
 0x627 PF: > { %s13_s12 = sadd.s32 1, %s3840_s12  }
 0x628   : > { %p10_p4 = scmp.ge.s32.totalorder %s13_s12, 4  }
 0x62a   :  { %12 = sbr.rel (!%p10_p4) target bundleno = 1 (0x1), region = 127 }

</bundles_post_ra>
